<compile_context>
chip_gen: v5e
topology: v5e:2x2
jax: 0.10.0
libtpu: 0.0.40
codegen_flags: <defaults>
</compile_context>

<pallas_src>
import functools

import jax
import jax.numpy as jnp
from jax.experimental import pallas as pl
from jax.experimental.pallas import tpu as pltpu

# ---------------- model hyper-parameters (small, deterministic) ----------------
VOCAB = 32      # vocab_size
HID = 32        # hidden_size
LAT = 16        # latent_size
PAD_IDX = 0
NUM_LAYERS = 2
BATCH = 8
SEQ = 8

GP = 128        # per-gate lane padding (gate g lives at lanes [g*GP : g*GP+HID])
FEAT = HID + LAT


def _gru_gates(gi, gh, h_prev):
    """Standard GRU cell update; gi/gh are gate-padded (B, 3*GP) slabs, r|z|n order."""
    i_r = gi[:, 0:HID]
    i_z = gi[:, GP:GP + HID]
    i_n = gi[:, 2 * GP:2 * GP + HID]
    h_r = gh[:, 0:HID]
    h_z = gh[:, GP:GP + HID]
    h_n = gh[:, 2 * GP:2 * GP + HID]
    r = jax.nn.sigmoid(i_r + h_r)
    zg = jax.nn.sigmoid(i_z + h_z)
    n = jnp.tanh(i_n + r * h_n)
    return (1.0 - zg) * n + zg * h_prev


# ---------------------------- Pallas kernel ----------------------------
def _decoder_kernel(x_ref, wd_ref, bd_ref, wih0_ref, bih0_ref, whh0_ref, bhh0_ref,
                    wf_ref, bf_ref, wo_ref, bo_ref, o_ref, gi0_buf, outh_buf, *, B, S):
    """Single-invocation kernel (grid=(1,)).

    x_ref    : (S*B, H+L)            time-major concat(embedding, z)
    wd_ref   : (H+L, H), bd_ref (1, H)          dense Linear (pre-transposed)
    wih0_ref : (H, 3*GP), bih0_ref (1, 3*GP)    layer-0 input-hidden (gate-padded)
    whh0_ref : (H, 3*GP), bhh0_ref (1, 3*GP)    layer-0 hidden-hidden (gate-padded)
    wf_ref   : (L-1, 2H, 6*GP), bf_ref (L-1, 1, 6*GP)  fused block-diag [Wih|Whh] layers>=1
    wo_ref   : (H, V), bo_ref (1, V)            output2vocab (pre-transposed)
    o_ref    : (S*B, V)                         logits (time-major, flattened)
    gi0_buf  : VMEM (S*B, 3*GP)                 hoisted layer-0 input gates, all timesteps
    outh_buf : VMEM (S*B, H)                    top-layer hidden outputs, all timesteps
    """
    # ---- hoisted, non-recurrent matmuls over all S*B rows at once ----
    dense = jnp.dot(x_ref[...], wd_ref[...],
                    preferred_element_type=jnp.float32) + bd_ref[...]
    dense = jnp.maximum(dense, 0.0)                                   # (S*B, H)
    gi0_buf[...] = (jnp.dot(dense, wih0_ref[...],
                            preferred_element_type=jnp.float32) + bih0_ref[...])

    # ---- hoisted loads / bias broadcasts (loop is unrolled; avoid re-broadcasting) ----
    whh0 = whh0_ref[...]
    bhh0_b = jnp.broadcast_to(bhh0_ref[...], (B, 3 * GP))
    wf = [wf_ref[l] for l in range(NUM_LAYERS - 1)]
    bf_b = [jnp.broadcast_to(bf_ref[l], (B, 6 * GP)) for l in range(NUM_LAYERS - 1)]

    hs = [jnp.zeros((B, HID), jnp.float32) for _ in range(NUM_LAYERS)]

    # ---- sequential recurrence, fully unrolled (S is small & static) ----
    for t in range(S):
        r0 = t * B
        # layer 0: input gates precomputed, only the hidden-hidden matmul is recurrent
        gi0 = gi0_buf[pl.ds(r0, B), :]                                # (B, 3*GP)
        gh0 = jnp.dot(hs[0], whh0, preferred_element_type=jnp.float32) + bhh0_b
        hs[0] = _gru_gates(gi0, gh0, hs[0])
        x_l = hs[0]

        # layers >= 1: fused [gi | gh] via block-diagonal weight, one dot per layer
        for l in range(1, NUM_LAYERS):
            xh = jnp.concatenate([x_l, hs[l]], axis=1)                # (B, 2H)
            g = jnp.dot(xh, wf[l - 1],
                        preferred_element_type=jnp.float32) + bf_b[l - 1]   # (B, 6*GP)
            hs[l] = _gru_gates(g[:, 0:3 * GP], g[:, 3 * GP:6 * GP], hs[l])
            x_l = hs[l]

        outh_buf[pl.ds(r0, B), :] = x_l

    # ---- hoisted output projection over all timesteps ----
    o_ref[...] = (jnp.dot(outh_buf[...], wo_ref[...],
                          preferred_element_type=jnp.float32) + bo_ref[...])


def _build_pallas_forward(B, S):
    kernel = functools.partial(_decoder_kernel, B=B, S=S)
    grid_spec = pltpu.PrefetchScalarGridSpec(
        num_scalar_prefetch=0,
        grid=(1,),
        in_specs=[
            pl.BlockSpec((S * B, FEAT), lambda i: (0, 0)),                       # x
            pl.BlockSpec((FEAT, HID), lambda i: (0, 0)),                         # wd
            pl.BlockSpec((1, HID), lambda i: (0, 0)),                            # bd
            pl.BlockSpec((HID, 3 * GP), lambda i: (0, 0)),                       # wih0
            pl.BlockSpec((1, 3 * GP), lambda i: (0, 0)),                         # bih0
            pl.BlockSpec((HID, 3 * GP), lambda i: (0, 0)),                       # whh0
            pl.BlockSpec((1, 3 * GP), lambda i: (0, 0)),                         # bhh0
            pl.BlockSpec((NUM_LAYERS - 1, 2 * HID, 6 * GP), lambda i: (0, 0, 0)),  # wf
            pl.BlockSpec((NUM_LAYERS - 1, 1, 6 * GP), lambda i: (0, 0, 0)),        # bf
            pl.BlockSpec((HID, VOCAB), lambda i: (0, 0)),                        # wo
            pl.BlockSpec((1, VOCAB), lambda i: (0, 0)),                          # bo
        ],
        out_specs=pl.BlockSpec((S * B, VOCAB), lambda i: (0, 0)),
        scratch_shapes=[
            pltpu.VMEM((S * B, 3 * GP), jnp.float32),   # gi0 for all timesteps
            pltpu.VMEM((S * B, HID), jnp.float32),      # top-layer hidden outputs
        ],
    )
    return pl.pallas_call(
        kernel,
        out_shape=jax.ShapeDtypeStruct((S * B, VOCAB), jnp.float32),
        grid_spec=grid_spec,
        compiler_params=pltpu.CompilerParams(dimension_semantics=("arbitrary",)),
    )


# ---------------------------- parameters ----------------------------
def init_params(key):
    ks = jax.random.split(key, 10)
    scale = 0.1
    emb = jax.random.normal(ks[0], (VOCAB, HID), jnp.float32) * scale
    emb = emb.at[PAD_IDX].set(0.0)                       # padding_idx row is zero
    wd = jax.random.normal(ks[1], (HID + LAT, HID), jnp.float32) * scale   # (in, out)
    bd = jax.random.normal(ks[2], (1, HID), jnp.float32) * scale
    wih = jax.random.normal(ks[3], (NUM_LAYERS, HID, 3 * HID), jnp.float32) * scale
    whh = jax.random.normal(ks[4], (NUM_LAYERS, HID, 3 * HID), jnp.float32) * scale
    bih = jax.random.normal(ks[5], (NUM_LAYERS, 1, 3 * HID), jnp.float32) * scale
    bhh = jax.random.normal(ks[6], (NUM_LAYERS, 1, 3 * HID), jnp.float32) * scale
    wo = jax.random.normal(ks[7], (HID, VOCAB), jnp.float32) * scale
    bo = jax.random.normal(ks[8], (1, VOCAB), jnp.float32) * scale
    return dict(emb=emb, wd=wd, bd=bd, wih=wih, whh=whh, bih=bih, bhh=bhh,
                wo=wo, bo=bo)


def pack_params(p):
    """One-time weight packing: gate-pad each r|z|n chunk to 128 lanes and build the
    block-diagonal fused [Wih|Whh] weights for layers >= 1."""
    def pad_gates(w):                        # (rows, 3H) -> (rows, 3*GP)
        rows = w.shape[0]
        out = jnp.zeros((rows, 3 * GP), jnp.float32)
        for g in range(3):
            out = out.at[:, g * GP:g * GP + HID].set(w[:, g * HID:(g + 1) * HID])
        return out

    wih0 = pad_gates(p["wih"][0])
    bih0 = pad_gates(p["bih"][0])
    whh0 = pad_gates(p["whh"][0])
    bhh0 = pad_gates(p["bhh"][0])

    wf_list, bf_list = [], []
    for l in range(1, NUM_LAYERS):
        wih_p = pad_gates(p["wih"][l])
        whh_p = pad_gates(p["whh"][l])
        wf = jnp.zeros((2 * HID, 6 * GP), jnp.float32)
        wf = wf.at[:HID, :3 * GP].set(wih_p)
        wf = wf.at[HID:, 3 * GP:].set(whh_p)
        bf = jnp.concatenate([pad_gates(p["bih"][l]), pad_gates(p["bhh"][l])], axis=1)
        wf_list.append(wf)
        bf_list.append(bf)

    return dict(emb=p["emb"], wd=p["wd"], bd=p["bd"],
                wih0=wih0, bih0=bih0, whh0=whh0, bhh0=bhh0,
                wf=jnp.stack(wf_list), bf=jnp.stack(bf_list),
                wo=p["wo"], bo=p["bo"])


# ---------------------------- wrapper (glue in plain JAX) ----------------------------
@jax.jit
def smiles_decoder_forward(inp, z, packed):
    """inp: (B, S) int32 tokens, z: (B, L) float32 -> logits (B, S, V)."""
    B, S = inp.shape
    inp_tm = jnp.transpose(inp, (1, 0))                                # (S, B) cheap int transpose
    emb = jnp.take(packed["emb"], inp_tm, axis=0)                      # (S, B, H)  time-major
    cond = jnp.broadcast_to(z[None, :, :], (S, B, LAT))                # (S, B, L)
    x = jnp.concatenate([emb, cond], axis=-1).reshape(S * B, FEAT)     # (S*B, H+L)
    kernel = _build_pallas_forward(B, S)
    logits_flat = kernel(x.astype(jnp.float32),
                         packed["wd"], packed["bd"],
                         packed["wih0"], packed["bih0"],
                         packed["whh0"], packed["bhh0"],
                         packed["wf"], packed["bf"],
                         packed["wo"], packed["bo"])                   # (S*B, V)
    return jnp.transpose(logits_flat.reshape(S, B, VOCAB), (1, 0, 2))  # (B, S, V)


# ---------------------------- pure-JAX reference ----------------------------
def reference_forward(inp, z, params):
    B, S = inp.shape
    emb = params["emb"][inp]
    cond = jnp.broadcast_to(z[:, None, :], (B, S, LAT))
    x = jnp.concatenate([emb, cond], axis=-1)
    layer_in = jax.nn.relu(x @ params["wd"] + params["bd"][0])        # (B, S, H)
    for l in range(NUM_LAYERS):
        h_l = jnp.zeros((B, HID), jnp.float32)
        outs = []
        for t in range(S):
            x_t = layer_in[:, t]
            gi = x_t @ params["wih"][l] + params["bih"][l, 0]
            gh = h_l @ params["whh"][l] + params["bhh"][l, 0]
            r = jax.nn.sigmoid(gi[:, :HID] + gh[:, :HID])
            zg = jax.nn.sigmoid(gi[:, HID:2 * HID] + gh[:, HID:2 * HID])
            n = jnp.tanh(gi[:, 2 * HID:] + r * gh[:, 2 * HID:])
            h_l = (1.0 - zg) * n + zg * h_l
            outs.append(h_l)
        layer_in = jnp.stack(outs, axis=1)
    return layer_in @ params["wo"] + params["bo"][0]


if __name__ == "__main__":
    key = jax.random.PRNGKey(0)
    k_p, k_i, k_z = jax.random.split(key, 3)
    params = init_params(k_p)
    packed = pack_params(params)

    inp = jax.random.randint(k_i, (BATCH, SEQ), 0, VOCAB, dtype=jnp.int32)
    z = jax.random.normal(k_z, (BATCH, LAT), jnp.float32)

    logits = smiles_decoder_forward(inp, z, packed)
    logits = jax.block_until_ready(logits)

    ref = reference_forward(inp, z, params)
    assert logits.shape == (BATCH, SEQ, VOCAB), logits.shape
    assert jnp.allclose(logits, ref, atol=1e-4, rtol=1e-4), \
        float(jnp.max(jnp.abs(logits - ref)))

    print("KERNEL_OK")
</pallas_src>

<mosaic_0001>
module attributes {stable_mosaic.version = 11 : i64} {
  func.func @_decoder_kernel(%arg0: i32, %arg1: memref<64x48xf32, #tpu.memory_space<vmem>>, %arg2: memref<48x32xf32, #tpu.memory_space<vmem>>, %arg3: memref<1x32xf32, #tpu.memory_space<vmem>>, %arg4: memref<32x384xf32, #tpu.memory_space<vmem>>, %arg5: memref<1x384xf32, #tpu.memory_space<vmem>>, %arg6: memref<32x384xf32, #tpu.memory_space<vmem>>, %arg7: memref<1x384xf32, #tpu.memory_space<vmem>>, %arg8: memref<1x64x768xf32, #tpu.memory_space<vmem>>, %arg9: memref<1x1x768xf32, #tpu.memory_space<vmem>>, %arg10: memref<32x32xf32, #tpu.memory_space<vmem>>, %arg11: memref<1x32xf32, #tpu.memory_space<vmem>>, %arg12: memref<64x32xf32, #tpu.memory_space<vmem>>, %arg13: memref<64x384xf32, #tpu.memory_space<vmem>>, %arg14: memref<64x32xf32, #tpu.memory_space<vmem>>) attributes {dimension_semantics = [#tpu.dimension_semantics<arbitrary>], iteration_bounds = array<i64: 1>, scalar_prefetch = 0 : i64, scratch_operands = 2 : i64, tpu.core_type = #tpu.core_type<tc>, window_params = [{pipeline_mode = #tpu.pipeline_mode<synchronous>, transform_indices = @transform_0, window_bounds = array<i64: 64, 48>}, {pipeline_mode = #tpu.pipeline_mode<synchronous>, transform_indices = @transform_1, window_bounds = array<i64: 48, 32>}, {pipeline_mode = #tpu.pipeline_mode<synchronous>, transform_indices = @transform_2, window_bounds = array<i64: 1, 32>}, {pipeline_mode = #tpu.pipeline_mode<synchronous>, transform_indices = @transform_3, window_bounds = array<i64: 32, 384>}, {pipeline_mode = #tpu.pipeline_mode<synchronous>, transform_indices = @transform_4, window_bounds = array<i64: 1, 384>}, {pipeline_mode = #tpu.pipeline_mode<synchronous>, transform_indices = @transform_5, window_bounds = array<i64: 32, 384>}, {pipeline_mode = #tpu.pipeline_mode<synchronous>, transform_indices = @transform_6, window_bounds = array<i64: 1, 384>}, {pipeline_mode = #tpu.pipeline_mode<synchronous>, transform_indices = @transform_7, window_bounds = array<i64: 1, 64, 768>}, {pipeline_mode = #tpu.pipeline_mode<synchronous>, transform_indices = @transform_8, window_bounds = array<i64: 1, 1, 768>}, {pipeline_mode = #tpu.pipeline_mode<synchronous>, transform_indices = @transform_9, window_bounds = array<i64: 32, 32>}, {pipeline_mode = #tpu.pipeline_mode<synchronous>, transform_indices = @transform_10, window_bounds = array<i64: 1, 32>}, {pipeline_mode = #tpu.pipeline_mode<synchronous>, transform_indices = @transform_11, window_bounds = array<i64: 64, 32>}]} {
    %c0 = arith.constant 0 : index
    %c0_0 = arith.constant 0 : index
    %0 = vector.load %arg1[%c0, %c0_0] : memref<64x48xf32, #tpu.memory_space<vmem>>, vector<64x48xf32>
    %c0_1 = arith.constant 0 : index
    %c0_2 = arith.constant 0 : index
    %1 = vector.load %arg2[%c0_1, %c0_2] : memref<48x32xf32, #tpu.memory_space<vmem>>, vector<48x32xf32>
    %cst = arith.constant dense<0.000000e+00> : vector<64x32xf32>
    %2 = tpu.matmul %0, %1, %cst {dimension_numbers = #tpu.dot_dimension_numbers<[1], [0], [0], [1], [0, 0, 1, 1], [], []>} : vector<64x48xf32>, vector<48x32xf32>, vector<64x32xf32> -> vector<64x32xf32>
    %c0_3 = arith.constant 0 : index
    %c0_4 = arith.constant 0 : index
    %3 = vector.load %arg3[%c0_3, %c0_4] : memref<1x32xf32, #tpu.memory_space<vmem>>, vector<1x32xf32>
    %4 = vector.broadcast %3 : vector<1x32xf32> to vector<64x32xf32>
    %5 = arith.addf %2, %4 : vector<64x32xf32>
    %cst_5 = arith.constant 0.000000e+00 : f32
    %6 = vector.broadcast %cst_5 : f32 to vector<64x32xf32>
    %7 = arith.maximumf %5, %6 : vector<64x32xf32>
    %c0_6 = arith.constant 0 : index
    %c0_7 = arith.constant 0 : index
    %8 = vector.load %arg4[%c0_6, %c0_7] : memref<32x384xf32, #tpu.memory_space<vmem>>, vector<32x384xf32>
    %cst_8 = arith.constant dense<0.000000e+00> : vector<64x384xf32>
    %9 = tpu.matmul %7, %8, %cst_8 {dimension_numbers = #tpu.dot_dimension_numbers<[1], [0], [0], [1], [0, 0, 1, 1], [], []>} : vector<64x32xf32>, vector<32x384xf32>, vector<64x384xf32> -> vector<64x384xf32>
    %c0_9 = arith.constant 0 : index
    %c0_10 = arith.constant 0 : index
    %10 = vector.load %arg5[%c0_9, %c0_10] : memref<1x384xf32, #tpu.memory_space<vmem>>, vector<1x384xf32>
    %11 = vector.broadcast %10 : vector<1x384xf32> to vector<64x384xf32>
    %12 = arith.addf %9, %11 : vector<64x384xf32>
    %c0_11 = arith.constant 0 : index
    %c0_12 = arith.constant 0 : index
    %13 = vector.load %arg13[%c0_11, %c0_12] : memref<64x384xf32, #tpu.memory_space<vmem>>, vector<64x384xf32>
    tpu.vector_store %arg13[%c0_11, %c0_12], %12 {strides = array<i32>} : memref<64x384xf32, #tpu.memory_space<vmem>>, vector<64x384xf32>,
    %c0_13 = arith.constant 0 : index
    %c0_14 = arith.constant 0 : index
    %14 = vector.load %arg6[%c0_13, %c0_14] : memref<32x384xf32, #tpu.memory_space<vmem>>, vector<32x384xf32>
    %c0_15 = arith.constant 0 : index
    %c0_16 = arith.constant 0 : index
    %15 = vector.load %arg7[%c0_15, %c0_16] : memref<1x384xf32, #tpu.memory_space<vmem>>, vector<1x384xf32>
    %16 = vector.shape_cast %15 : vector<1x384xf32> to vector<1x384xf32>
    %17 = vector.broadcast %16 : vector<1x384xf32> to vector<8x384xf32>
    %c0_17 = arith.constant 0 : index
    %c0_18 = arith.constant 0 : index
    %c0_19 = arith.constant 0 : index
    %18 = vector.load %arg8[%c0_17, %c0_18, %c0_19] : memref<1x64x768xf32, #tpu.memory_space<vmem>>, vector<1x64x768xf32>
    %19 = vector.shape_cast %18 : vector<1x64x768xf32> to vector<64x768xf32>
    %c0_20 = arith.constant 0 : index
    %c0_21 = arith.constant 0 : index
    %c0_22 = arith.constant 0 : index
    %20 = vector.load %arg9[%c0_20, %c0_21, %c0_22] : memref<1x1x768xf32, #tpu.memory_space<vmem>>, vector<1x1x768xf32>
    %21 = vector.shape_cast %20 : vector<1x1x768xf32> to vector<1x768xf32>
    %22 = vector.shape_cast %21 : vector<1x768xf32> to vector<1x768xf32>
    %23 = vector.broadcast %22 : vector<1x768xf32> to vector<8x768xf32>
    %cst_23 = arith.constant 0.000000e+00 : f32
    %24 = vector.broadcast %cst_23 : f32 to vector<8x32xf32>
    %cst_24 = arith.constant 0.000000e+00 : f32
    %25 = vector.broadcast %cst_24 : f32 to vector<8x32xf32>
    %c0_25 = arith.constant 0 : index
    %c0_26 = arith.constant 0 : index
    %26 = vector.load %arg13[%c0_25, %c0_26] : memref<64x384xf32, #tpu.memory_space<vmem>>, vector<8x384xf32>
    %cst_27 = arith.constant dense<0.000000e+00> : vector<8x384xf32>
    %27 = tpu.matmul %24, %14, %cst_27 {dimension_numbers = #tpu.dot_dimension_numbers<[1], [0], [0], [1], [0, 0, 1, 1], [], []>} : vector<8x32xf32>, vector<32x384xf32>, vector<8x384xf32> -> vector<8x384xf32>
    %28 = arith.addf %27, %17 : vector<8x384xf32>
    %29 = vector.extract_strided_slice %26 {offsets = [0, 0], sizes = [8, 32], strides = [1, 1]} : vector<8x384xf32> to vector<8x32xf32>
    %30 = vector.extract_strided_slice %26 {offsets = [0, 128], sizes = [8, 32], strides = [1, 1]} : vector<8x384xf32> to vector<8x32xf32>
    %31 = vector.extract_strided_slice %26 {offsets = [0, 256], sizes = [8, 32], strides = [1, 1]} : vector<8x384xf32> to vector<8x32xf32>
    %32 = vector.extract_strided_slice %28 {offsets = [0, 0], sizes = [8, 32], strides = [1, 1]} : vector<8x384xf32> to vector<8x32xf32>
    %33 = vector.extract_strided_slice %28 {offsets = [0, 128], sizes = [8, 32], strides = [1, 1]} : vector<8x384xf32> to vector<8x32xf32>
    %34 = vector.extract_strided_slice %28 {offsets = [0, 256], sizes = [8, 32], strides = [1, 1]} : vector<8x384xf32> to vector<8x32xf32>
    %35 = arith.addf %29, %32 : vector<8x32xf32>
    %36 = arith.negf %35 : vector<8x32xf32>
    %37 = math.exp %36 : vector<8x32xf32>
    %cst_28 = arith.constant 1.000000e+00 : f32
    %38 = vector.broadcast %cst_28 : f32 to vector<8x32xf32>
    %39 = arith.addf %38, %37 : vector<8x32xf32>
    %40 = arith.divf %38, %39 : vector<8x32xf32>
    %41 = arith.addf %30, %33 : vector<8x32xf32>
    %42 = arith.negf %41 : vector<8x32xf32>
    %43 = math.exp %42 : vector<8x32xf32>
    %cst_29 = arith.constant 1.000000e+00 : f32
    %44 = vector.broadcast %cst_29 : f32 to vector<8x32xf32>
    %45 = arith.addf %44, %43 : vector<8x32xf32>
    %46 = arith.divf %44, %45 : vector<8x32xf32>
    %47 = arith.mulf %40, %34 : vector<8x32xf32>
    %48 = arith.addf %31, %47 : vector<8x32xf32>
    %49 = math.tanh %48 : vector<8x32xf32>
    %cst_30 = arith.constant 1.000000e+00 : f32
    %50 = vector.broadcast %cst_30 : f32 to vector<8x32xf32>
    %51 = arith.subf %50, %46 : vector<8x32xf32>
    %52 = arith.mulf %51, %49 : vector<8x32xf32>
    %53 = arith.mulf %46, %24 : vector<8x32xf32>
    %54 = arith.addf %52, %53 : vector<8x32xf32>
    %55 = tpu.concatenate %54, %25 in 1 : vector<8x32xf32>, vector<8x32xf32> -> vector<8x64xf32>
    %cst_31 = arith.constant dense<0.000000e+00> : vector<8x768xf32>
    %56 = tpu.matmul %55, %19, %cst_31 {dimension_numbers = #tpu.dot_dimension_numbers<[1], [0], [0], [1], [0, 0, 1, 1], [], []>} : vector<8x64xf32>, vector<64x768xf32>, vector<8x768xf32> -> vector<8x768xf32>
    %57 = arith.addf %56, %23 : vector<8x768xf32>
    %58 = vector.extract_strided_slice %57 {offsets = [0, 0], sizes = [8, 384], strides = [1, 1]} : vector<8x768xf32> to vector<8x384xf32>
    %59 = vector.extract_strided_slice %57 {offsets = [0, 384], sizes = [8, 384], strides = [1, 1]} : vector<8x768xf32> to vector<8x384xf32>
    %60 = vector.extract_strided_slice %58 {offsets = [0, 0], sizes = [8, 32], strides = [1, 1]} : vector<8x384xf32> to vector<8x32xf32>
    %61 = vector.extract_strided_slice %58 {offsets = [0, 128], sizes = [8, 32], strides = [1, 1]} : vector<8x384xf32> to vector<8x32xf32>
    %62 = vector.extract_strided_slice %58 {offsets = [0, 256], sizes = [8, 32], strides = [1, 1]} : vector<8x384xf32> to vector<8x32xf32>
    %63 = vector.extract_strided_slice %59 {offsets = [0, 0], sizes = [8, 32], strides = [1, 1]} : vector<8x384xf32> to vector<8x32xf32>
    %64 = vector.extract_strided_slice %59 {offsets = [0, 128], sizes = [8, 32], strides = [1, 1]} : vector<8x384xf32> to vector<8x32xf32>
    %65 = vector.extract_strided_slice %59 {offsets = [0, 256], sizes = [8, 32], strides = [1, 1]} : vector<8x384xf32> to vector<8x32xf32>
    %66 = arith.addf %60, %63 : vector<8x32xf32>
    %67 = arith.negf %66 : vector<8x32xf32>
    %68 = math.exp %67 : vector<8x32xf32>
    %cst_32 = arith.constant 1.000000e+00 : f32
    %69 = vector.broadcast %cst_32 : f32 to vector<8x32xf32>
    %70 = arith.addf %69, %68 : vector<8x32xf32>
    %71 = arith.divf %69, %70 : vector<8x32xf32>
    %72 = arith.addf %61, %64 : vector<8x32xf32>
    %73 = arith.negf %72 : vector<8x32xf32>
    %74 = math.exp %73 : vector<8x32xf32>
    %cst_33 = arith.constant 1.000000e+00 : f32
    %75 = vector.broadcast %cst_33 : f32 to vector<8x32xf32>
    %76 = arith.addf %75, %74 : vector<8x32xf32>
    %77 = arith.divf %75, %76 : vector<8x32xf32>
    %78 = arith.mulf %71, %65 : vector<8x32xf32>
    %79 = arith.addf %62, %78 : vector<8x32xf32>
    %80 = math.tanh %79 : vector<8x32xf32>
    %cst_34 = arith.constant 1.000000e+00 : f32
    %81 = vector.broadcast %cst_34 : f32 to vector<8x32xf32>
    %82 = arith.subf %81, %77 : vector<8x32xf32>
    %83 = arith.mulf %82, %80 : vector<8x32xf32>
    %84 = arith.mulf %77, %25 : vector<8x32xf32>
    %85 = arith.addf %83, %84 : vector<8x32xf32>
    %c0_35 = arith.constant 0 : index
    %c0_36 = arith.constant 0 : index
    %86 = vector.load %arg14[%c0_35, %c0_36] : memref<64x32xf32, #tpu.memory_space<vmem>>, vector<8x32xf32>
    tpu.vector_store %arg14[%c0_35, %c0_36], %85 {strides = array<i32>} : memref<64x32xf32, #tpu.memory_space<vmem>>, vector<8x32xf32>,
    %c8 = arith.constant 8 : index
    %c0_37 = arith.constant 0 : index
    %87 = vector.load %arg13[%c8, %c0_37] : memref<64x384xf32, #tpu.memory_space<vmem>>, vector<8x384xf32>
    %cst_38 = arith.constant dense<0.000000e+00> : vector<8x384xf32>
    %88 = tpu.matmul %54, %14, %cst_38 {dimension_numbers = #tpu.dot_dimension_numbers<[1], [0], [0], [1], [0, 0, 1, 1], [], []>} : vector<8x32xf32>, vector<32x384xf32>, vector<8x384xf32> -> vector<8x384xf32>
    %89 = arith.addf %88, %17 : vector<8x384xf32>
    %90 = vector.extract_strided_slice %87 {offsets = [0, 0], sizes = [8, 32], strides = [1, 1]} : vector<8x384xf32> to vector<8x32xf32>
    %91 = vector.extract_strided_slice %87 {offsets = [0, 128], sizes = [8, 32], strides = [1, 1]} : vector<8x384xf32> to vector<8x32xf32>
    %92 = vector.extract_strided_slice %87 {offsets = [0, 256], sizes = [8, 32], strides = [1, 1]} : vector<8x384xf32> to vector<8x32xf32>
    %93 = vector.extract_strided_slice %89 {offsets = [0, 0], sizes = [8, 32], strides = [1, 1]} : vector<8x384xf32> to vector<8x32xf32>
    %94 = vector.extract_strided_slice %89 {offsets = [0, 128], sizes = [8, 32], strides = [1, 1]} : vector<8x384xf32> to vector<8x32xf32>
    %95 = vector.extract_strided_slice %89 {offsets = [0, 256], sizes = [8, 32], strides = [1, 1]} : vector<8x384xf32> to vector<8x32xf32>
    %96 = arith.addf %90, %93 : vector<8x32xf32>
    %97 = arith.negf %96 : vector<8x32xf32>
    %98 = math.exp %97 : vector<8x32xf32>
    %cst_39 = arith.constant 1.000000e+00 : f32
    %99 = vector.broadcast %cst_39 : f32 to vector<8x32xf32>
    %100 = arith.addf %99, %98 : vector<8x32xf32>
    %101 = arith.divf %99, %100 : vector<8x32xf32>
    %102 = arith.addf %91, %94 : vector<8x32xf32>
    %103 = arith.negf %102 : vector<8x32xf32>
    %104 = math.exp %103 : vector<8x32xf32>
    %cst_40 = arith.constant 1.000000e+00 : f32
    %105 = vector.broadcast %cst_40 : f32 to vector<8x32xf32>
    %106 = arith.addf %105, %104 : vector<8x32xf32>
    %107 = arith.divf %105, %106 : vector<8x32xf32>
    %108 = arith.mulf %101, %95 : vector<8x32xf32>
    %109 = arith.addf %92, %108 : vector<8x32xf32>
    %110 = math.tanh %109 : vector<8x32xf32>
    %cst_41 = arith.constant 1.000000e+00 : f32
    %111 = vector.broadcast %cst_41 : f32 to vector<8x32xf32>
    %112 = arith.subf %111, %107 : vector<8x32xf32>
    %113 = arith.mulf %112, %110 : vector<8x32xf32>
    %114 = arith.mulf %107, %54 : vector<8x32xf32>
    %115 = arith.addf %113, %114 : vector<8x32xf32>
    %116 = tpu.concatenate %115, %85 in 1 : vector<8x32xf32>, vector<8x32xf32> -> vector<8x64xf32>
    %cst_42 = arith.constant dense<0.000000e+00> : vector<8x768xf32>
    %117 = tpu.matmul %116, %19, %cst_42 {dimension_numbers = #tpu.dot_dimension_numbers<[1], [0], [0], [1], [0, 0, 1, 1], [], []>} : vector<8x64xf32>, vector<64x768xf32>, vector<8x768xf32> -> vector<8x768xf32>
    %118 = arith.addf %117, %23 : vector<8x768xf32>
    %119 = vector.extract_strided_slice %118 {offsets = [0, 0], sizes = [8, 384], strides = [1, 1]} : vector<8x768xf32> to vector<8x384xf32>
    %120 = vector.extract_strided_slice %118 {offsets = [0, 384], sizes = [8, 384], strides = [1, 1]} : vector<8x768xf32> to vector<8x384xf32>
    %121 = vector.extract_strided_slice %119 {offsets = [0, 0], sizes = [8, 32], strides = [1, 1]} : vector<8x384xf32> to vector<8x32xf32>
    %122 = vector.extract_strided_slice %119 {offsets = [0, 128], sizes = [8, 32], strides = [1, 1]} : vector<8x384xf32> to vector<8x32xf32>
    %123 = vector.extract_strided_slice %119 {offsets = [0, 256], sizes = [8, 32], strides = [1, 1]} : vector<8x384xf32> to vector<8x32xf32>
    %124 = vector.extract_strided_slice %120 {offsets = [0, 0], sizes = [8, 32], strides = [1, 1]} : vector<8x384xf32> to vector<8x32xf32>
    %125 = vector.extract_strided_slice %120 {offsets = [0, 128], sizes = [8, 32], strides = [1, 1]} : vector<8x384xf32> to vector<8x32xf32>
    %126 = vector.extract_strided_slice %120 {offsets = [0, 256], sizes = [8, 32], strides = [1, 1]} : vector<8x384xf32> to vector<8x32xf32>
    %127 = arith.addf %121, %124 : vector<8x32xf32>
    %128 = arith.negf %127 : vector<8x32xf32>
    %129 = math.exp %128 : vector<8x32xf32>
    %cst_43 = arith.constant 1.000000e+00 : f32
    %130 = vector.broadcast %cst_43 : f32 to vector<8x32xf32>
    %131 = arith.addf %130, %129 : vector<8x32xf32>
    %132 = arith.divf %130, %131 : vector<8x32xf32>
    %133 = arith.addf %122, %125 : vector<8x32xf32>
    %134 = arith.negf %133 : vector<8x32xf32>
    %135 = math.exp %134 : vector<8x32xf32>
    %cst_44 = arith.constant 1.000000e+00 : f32
    %136 = vector.broadcast %cst_44 : f32 to vector<8x32xf32>
    %137 = arith.addf %136, %135 : vector<8x32xf32>
    %138 = arith.divf %136, %137 : vector<8x32xf32>
    %139 = arith.mulf %132, %126 : vector<8x32xf32>
    %140 = arith.addf %123, %139 : vector<8x32xf32>
    %141 = math.tanh %140 : vector<8x32xf32>
    %cst_45 = arith.constant 1.000000e+00 : f32
    %142 = vector.broadcast %cst_45 : f32 to vector<8x32xf32>
    %143 = arith.subf %142, %138 : vector<8x32xf32>
    %144 = arith.mulf %143, %141 : vector<8x32xf32>
    %145 = arith.mulf %138, %85 : vector<8x32xf32>
    %146 = arith.addf %144, %145 : vector<8x32xf32>
    %c8_46 = arith.constant 8 : index
    %c0_47 = arith.constant 0 : index
    %147 = vector.load %arg14[%c8_46, %c0_47] : memref<64x32xf32, #tpu.memory_space<vmem>>, vector<8x32xf32>
    tpu.vector_store %arg14[%c8_46, %c0_47], %146 {strides = array<i32>} : memref<64x32xf32, #tpu.memory_space<vmem>>, vector<8x32xf32>,
    %c16 = arith.constant 16 : index
    %c0_48 = arith.constant 0 : index
    %148 = vector.load %arg13[%c16, %c0_48] : memref<64x384xf32, #tpu.memory_space<vmem>>, vector<8x384xf32>
    %cst_49 = arith.constant dense<0.000000e+00> : vector<8x384xf32>
    %149 = tpu.matmul %115, %14, %cst_49 {dimension_numbers = #tpu.dot_dimension_numbers<[1], [0], [0], [1], [0, 0, 1, 1], [], []>} : vector<8x32xf32>, vector<32x384xf32>, vector<8x384xf32> -> vector<8x384xf32>
    %150 = arith.addf %149, %17 : vector<8x384xf32>
    %151 = vector.extract_strided_slice %148 {offsets = [0, 0], sizes = [8, 32], strides = [1, 1]} : vector<8x384xf32> to vector<8x32xf32>
    %152 = vector.extract_strided_slice %148 {offsets = [0, 128], sizes = [8, 32], strides = [1, 1]} : vector<8x384xf32> to vector<8x32xf32>
    %153 = vector.extract_strided_slice %148 {offsets = [0, 256], sizes = [8, 32], strides = [1, 1]} : vector<8x384xf32> to vector<8x32xf32>
    %154 = vector.extract_strided_slice %150 {offsets = [0, 0], sizes = [8, 32], strides = [1, 1]} : vector<8x384xf32> to vector<8x32xf32>
    %155 = vector.extract_strided_slice %150 {offsets = [0, 128], sizes = [8, 32], strides = [1, 1]} : vector<8x384xf32> to vector<8x32xf32>
    %156 = vector.extract_strided_slice %150 {offsets = [0, 256], sizes = [8, 32], strides = [1, 1]} : vector<8x384xf32> to vector<8x32xf32>
    %157 = arith.addf %151, %154 : vector<8x32xf32>
    %158 = arith.negf %157 : vector<8x32xf32>
    %159 = math.exp %158 : vector<8x32xf32>
    %cst_50 = arith.constant 1.000000e+00 : f32
    %160 = vector.broadcast %cst_50 : f32 to vector<8x32xf32>
    %161 = arith.addf %160, %159 : vector<8x32xf32>
    %162 = arith.divf %160, %161 : vector<8x32xf32>
    %163 = arith.addf %152, %155 : vector<8x32xf32>
    %164 = arith.negf %163 : vector<8x32xf32>
    %165 = math.exp %164 : vector<8x32xf32>
    %cst_51 = arith.constant 1.000000e+00 : f32
    %166 = vector.broadcast %cst_51 : f32 to vector<8x32xf32>
    %167 = arith.addf %166, %165 : vector<8x32xf32>
    %168 = arith.divf %166, %167 : vector<8x32xf32>
    %169 = arith.mulf %162, %156 : vector<8x32xf32>
    %170 = arith.addf %153, %169 : vector<8x32xf32>
    %171 = math.tanh %170 : vector<8x32xf32>
    %cst_52 = arith.constant 1.000000e+00 : f32
    %172 = vector.broadcast %cst_52 : f32 to vector<8x32xf32>
    %173 = arith.subf %172, %168 : vector<8x32xf32>
    %174 = arith.mulf %173, %171 : vector<8x32xf32>
    %175 = arith.mulf %168, %115 : vector<8x32xf32>
    %176 = arith.addf %174, %175 : vector<8x32xf32>
    %177 = tpu.concatenate %176, %146 in 1 : vector<8x32xf32>, vector<8x32xf32> -> vector<8x64xf32>
    %cst_53 = arith.constant dense<0.000000e+00> : vector<8x768xf32>
    %178 = tpu.matmul %177, %19, %cst_53 {dimension_numbers = #tpu.dot_dimension_numbers<[1], [0], [0], [1], [0, 0, 1, 1], [], []>} : vector<8x64xf32>, vector<64x768xf32>, vector<8x768xf32> -> vector<8x768xf32>
    %179 = arith.addf %178, %23 : vector<8x768xf32>
    %180 = vector.extract_strided_slice %179 {offsets = [0, 0], sizes = [8, 384], strides = [1, 1]} : vector<8x768xf32> to vector<8x384xf32>
    %181 = vector.extract_strided_slice %179 {offsets = [0, 384], sizes = [8, 384], strides = [1, 1]} : vector<8x768xf32> to vector<8x384xf32>
    %182 = vector.extract_strided_slice %180 {offsets = [0, 0], sizes = [8, 32], strides = [1, 1]} : vector<8x384xf32> to vector<8x32xf32>
    %183 = vector.extract_strided_slice %180 {offsets = [0, 128], sizes = [8, 32], strides = [1, 1]} : vector<8x384xf32> to vector<8x32xf32>
    %184 = vector.extract_strided_slice %180 {offsets = [0, 256], sizes = [8, 32], strides = [1, 1]} : vector<8x384xf32> to vector<8x32xf32>
    %185 = vector.extract_strided_slice %181 {offsets = [0, 0], sizes = [8, 32], strides = [1, 1]} : vector<8x384xf32> to vector<8x32xf32>
    %186 = vector.extract_strided_slice %181 {offsets = [0, 128], sizes = [8, 32], strides = [1, 1]} : vector<8x384xf32> to vector<8x32xf32>
    %187 = vector.extract_strided_slice %181 {offsets = [0, 256], sizes = [8, 32], strides = [1, 1]} : vector<8x384xf32> to vector<8x32xf32>
    %188 = arith.addf %182, %185 : vector<8x32xf32>
    %189 = arith.negf %188 : vector<8x32xf32>
    %190 = math.exp %189 : vector<8x32xf32>
    %cst_54 = arith.constant 1.000000e+00 : f32
    %191 = vector.broadcast %cst_54 : f32 to vector<8x32xf32>
    %192 = arith.addf %191, %190 : vector<8x32xf32>
    %193 = arith.divf %191, %192 : vector<8x32xf32>
    %194 = arith.addf %183, %186 : vector<8x32xf32>
    %195 = arith.negf %194 : vector<8x32xf32>
    %196 = math.exp %195 : vector<8x32xf32>
    %cst_55 = arith.constant 1.000000e+00 : f32
    %197 = vector.broadcast %cst_55 : f32 to vector<8x32xf32>
    %198 = arith.addf %197, %196 : vector<8x32xf32>
    %199 = arith.divf %197, %198 : vector<8x32xf32>
    %200 = arith.mulf %193, %187 : vector<8x32xf32>
    %201 = arith.addf %184, %200 : vector<8x32xf32>
    %202 = math.tanh %201 : vector<8x32xf32>
    %cst_56 = arith.constant 1.000000e+00 : f32
    %203 = vector.broadcast %cst_56 : f32 to vector<8x32xf32>
    %204 = arith.subf %203, %199 : vector<8x32xf32>
    %205 = arith.mulf %204, %202 : vector<8x32xf32>
    %206 = arith.mulf %199, %146 : vector<8x32xf32>
    %207 = arith.addf %205, %206 : vector<8x32xf32>
    %c16_57 = arith.constant 16 : index
    %c0_58 = arith.constant 0 : index
    %208 = vector.load %arg14[%c16_57, %c0_58] : memref<64x32xf32, #tpu.memory_space<vmem>>, vector<8x32xf32>
    tpu.vector_store %arg14[%c16_57, %c0_58], %207 {strides = array<i32>} : memref<64x32xf32, #tpu.memory_space<vmem>>, vector<8x32xf32>,
    %c24 = arith.constant 24 : index
    %c0_59 = arith.constant 0 : index
    %209 = vector.load %arg13[%c24, %c0_59] : memref<64x384xf32, #tpu.memory_space<vmem>>, vector<8x384xf32>
    %cst_60 = arith.constant dense<0.000000e+00> : vector<8x384xf32>
    %210 = tpu.matmul %176, %14, %cst_60 {dimension_numbers = #tpu.dot_dimension_numbers<[1], [0], [0], [1], [0, 0, 1, 1], [], []>} : vector<8x32xf32>, vector<32x384xf32>, vector<8x384xf32> -> vector<8x384xf32>
    %211 = arith.addf %210, %17 : vector<8x384xf32>
    %212 = vector.extract_strided_slice %209 {offsets = [0, 0], sizes = [8, 32], strides = [1, 1]} : vector<8x384xf32> to vector<8x32xf32>
    %213 = vector.extract_strided_slice %209 {offsets = [0, 128], sizes = [8, 32], strides = [1, 1]} : vector<8x384xf32> to vector<8x32xf32>
    %214 = vector.extract_strided_slice %209 {offsets = [0, 256], sizes = [8, 32], strides = [1, 1]} : vector<8x384xf32> to vector<8x32xf32>
    %215 = vector.extract_strided_slice %211 {offsets = [0, 0], sizes = [8, 32], strides = [1, 1]} : vector<8x384xf32> to vector<8x32xf32>
    %216 = vector.extract_strided_slice %211 {offsets = [0, 128], sizes = [8, 32], strides = [1, 1]} : vector<8x384xf32> to vector<8x32xf32>
    %217 = vector.extract_strided_slice %211 {offsets = [0, 256], sizes = [8, 32], strides = [1, 1]} : vector<8x384xf32> to vector<8x32xf32>
    %218 = arith.addf %212, %215 : vector<8x32xf32>
    %219 = arith.negf %218 : vector<8x32xf32>
    %220 = math.exp %219 : vector<8x32xf32>
    %cst_61 = arith.constant 1.000000e+00 : f32
    %221 = vector.broadcast %cst_61 : f32 to vector<8x32xf32>
    %222 = arith.addf %221, %220 : vector<8x32xf32>
    %223 = arith.divf %221, %222 : vector<8x32xf32>
    %224 = arith.addf %213, %216 : vector<8x32xf32>
    %225 = arith.negf %224 : vector<8x32xf32>
    %226 = math.exp %225 : vector<8x32xf32>
    %cst_62 = arith.constant 1.000000e+00 : f32
    %227 = vector.broadcast %cst_62 : f32 to vector<8x32xf32>
    %228 = arith.addf %227, %226 : vector<8x32xf32>
    %229 = arith.divf %227, %228 : vector<8x32xf32>
    %230 = arith.mulf %223, %217 : vector<8x32xf32>
    %231 = arith.addf %214, %230 : vector<8x32xf32>
    %232 = math.tanh %231 : vector<8x32xf32>
    %cst_63 = arith.constant 1.000000e+00 : f32
    %233 = vector.broadcast %cst_63 : f32 to vector<8x32xf32>
    %234 = arith.subf %233, %229 : vector<8x32xf32>
    %235 = arith.mulf %234, %232 : vector<8x32xf32>
    %236 = arith.mulf %229, %176 : vector<8x32xf32>
    %237 = arith.addf %235, %236 : vector<8x32xf32>
    %238 = tpu.concatenate %237, %207 in 1 : vector<8x32xf32>, vector<8x32xf32> -> vector<8x64xf32>
    %cst_64 = arith.constant dense<0.000000e+00> : vector<8x768xf32>
    %239 = tpu.matmul %238, %19, %cst_64 {dimension_numbers = #tpu.dot_dimension_numbers<[1], [0], [0], [1], [0, 0, 1, 1], [], []>} : vector<8x64xf32>, vector<64x768xf32>, vector<8x768xf32> -> vector<8x768xf32>
    %240 = arith.addf %239, %23 : vector<8x768xf32>
    %241 = vector.extract_strided_slice %240 {offsets = [0, 0], sizes = [8, 384], strides = [1, 1]} : vector<8x768xf32> to vector<8x384xf32>
    %242 = vector.extract_strided_slice %240 {offsets = [0, 384], sizes = [8, 384], strides = [1, 1]} : vector<8x768xf32> to vector<8x384xf32>
    %243 = vector.extract_strided_slice %241 {offsets = [0, 0], sizes = [8, 32], strides = [1, 1]} : vector<8x384xf32> to vector<8x32xf32>
    %244 = vector.extract_strided_slice %241 {offsets = [0, 128], sizes = [8, 32], strides = [1, 1]} : vector<8x384xf32> to vector<8x32xf32>
    %245 = vector.extract_strided_slice %241 {offsets = [0, 256], sizes = [8, 32], strides = [1, 1]} : vector<8x384xf32> to vector<8x32xf32>
    %246 = vector.extract_strided_slice %242 {offsets = [0, 0], sizes = [8, 32], strides = [1, 1]} : vector<8x384xf32> to vector<8x32xf32>
    %247 = vector.extract_strided_slice %242 {offsets = [0, 128], sizes = [8, 32], strides = [1, 1]} : vector<8x384xf32> to vector<8x32xf32>
    %248 = vector.extract_strided_slice %242 {offsets = [0, 256], sizes = [8, 32], strides = [1, 1]} : vector<8x384xf32> to vector<8x32xf32>
    %249 = arith.addf %243, %246 : vector<8x32xf32>
    %250 = arith.negf %249 : vector<8x32xf32>
    %251 = math.exp %250 : vector<8x32xf32>
    %cst_65 = arith.constant 1.000000e+00 : f32
    %252 = vector.broadcast %cst_65 : f32 to vector<8x32xf32>
    %253 = arith.addf %252, %251 : vector<8x32xf32>
    %254 = arith.divf %252, %253 : vector<8x32xf32>
    %255 = arith.addf %244, %247 : vector<8x32xf32>
    %256 = arith.negf %255 : vector<8x32xf32>
    %257 = math.exp %256 : vector<8x32xf32>
    %cst_66 = arith.constant 1.000000e+00 : f32
    %258 = vector.broadcast %cst_66 : f32 to vector<8x32xf32>
    %259 = arith.addf %258, %257 : vector<8x32xf32>
    %260 = arith.divf %258, %259 : vector<8x32xf32>
    %261 = arith.mulf %254, %248 : vector<8x32xf32>
    %262 = arith.addf %245, %261 : vector<8x32xf32>
    %263 = math.tanh %262 : vector<8x32xf32>
    %cst_67 = arith.constant 1.000000e+00 : f32
    %264 = vector.broadcast %cst_67 : f32 to vector<8x32xf32>
    %265 = arith.subf %264, %260 : vector<8x32xf32>
    %266 = arith.mulf %265, %263 : vector<8x32xf32>
    %267 = arith.mulf %260, %207 : vector<8x32xf32>
    %268 = arith.addf %266, %267 : vector<8x32xf32>
    %c24_68 = arith.constant 24 : index
    %c0_69 = arith.constant 0 : index
    %269 = vector.load %arg14[%c24_68, %c0_69] : memref<64x32xf32, #tpu.memory_space<vmem>>, vector<8x32xf32>
    tpu.vector_store %arg14[%c24_68, %c0_69], %268 {strides = array<i32>} : memref<64x32xf32, #tpu.memory_space<vmem>>, vector<8x32xf32>,
    %c32 = arith.constant 32 : index
    %c0_70 = arith.constant 0 : index
    %270 = vector.load %arg13[%c32, %c0_70] : memref<64x384xf32, #tpu.memory_space<vmem>>, vector<8x384xf32>
    %cst_71 = arith.constant dense<0.000000e+00> : vector<8x384xf32>
    %271 = tpu.matmul %237, %14, %cst_71 {dimension_numbers = #tpu.dot_dimension_numbers<[1], [0], [0], [1], [0, 0, 1, 1], [], []>} : vector<8x32xf32>, vector<32x384xf32>, vector<8x384xf32> -> vector<8x384xf32>
    %272 = arith.addf %271, %17 : vector<8x384xf32>
    %273 = vector.extract_strided_slice %270 {offsets = [0, 0], sizes = [8, 32], strides = [1, 1]} : vector<8x384xf32> to vector<8x32xf32>
    %274 = vector.extract_strided_slice %270 {offsets = [0, 128], sizes = [8, 32], strides = [1, 1]} : vector<8x384xf32> to vector<8x32xf32>
    %275 = vector.extract_strided_slice %270 {offsets = [0, 256], sizes = [8, 32], strides = [1, 1]} : vector<8x384xf32> to vector<8x32xf32>
    %276 = vector.extract_strided_slice %272 {offsets = [0, 0], sizes = [8, 32], strides = [1, 1]} : vector<8x384xf32> to vector<8x32xf32>
    %277 = vector.extract_strided_slice %272 {offsets = [0, 128], sizes = [8, 32], strides = [1, 1]} : vector<8x384xf32> to vector<8x32xf32>
    %278 = vector.extract_strided_slice %272 {offsets = [0, 256], sizes = [8, 32], strides = [1, 1]} : vector<8x384xf32> to vector<8x32xf32>
    %279 = arith.addf %273, %276 : vector<8x32xf32>
    %280 = arith.negf %279 : vector<8x32xf32>
    %281 = math.exp %280 : vector<8x32xf32>
    %cst_72 = arith.constant 1.000000e+00 : f32
    %282 = vector.broadcast %cst_72 : f32 to vector<8x32xf32>
    %283 = arith.addf %282, %281 : vector<8x32xf32>
    %284 = arith.divf %282, %283 : vector<8x32xf32>
    %285 = arith.addf %274, %277 : vector<8x32xf32>
    %286 = arith.negf %285 : vector<8x32xf32>
    %287 = math.exp %286 : vector<8x32xf32>
    %cst_73 = arith.constant 1.000000e+00 : f32
    %288 = vector.broadcast %cst_73 : f32 to vector<8x32xf32>
    %289 = arith.addf %288, %287 : vector<8x32xf32>
    %290 = arith.divf %288, %289 : vector<8x32xf32>
    %291 = arith.mulf %284, %278 : vector<8x32xf32>
    %292 = arith.addf %275, %291 : vector<8x32xf32>
    %293 = math.tanh %292 : vector<8x32xf32>
    %cst_74 = arith.constant 1.000000e+00 : f32
    %294 = vector.broadcast %cst_74 : f32 to vector<8x32xf32>
    %295 = arith.subf %294, %290 : vector<8x32xf32>
    %296 = arith.mulf %295, %293 : vector<8x32xf32>
    %297 = arith.mulf %290, %237 : vector<8x32xf32>
    %298 = arith.addf %296, %297 : vector<8x32xf32>
    %299 = tpu.concatenate %298, %268 in 1 : vector<8x32xf32>, vector<8x32xf32> -> vector<8x64xf32>
    %cst_75 = arith.constant dense<0.000000e+00> : vector<8x768xf32>
    %300 = tpu.matmul %299, %19, %cst_75 {dimension_numbers = #tpu.dot_dimension_numbers<[1], [0], [0], [1], [0, 0, 1, 1], [], []>} : vector<8x64xf32>, vector<64x768xf32>, vector<8x768xf32> -> vector<8x768xf32>
    %301 = arith.addf %300, %23 : vector<8x768xf32>
    %302 = vector.extract_strided_slice %301 {offsets = [0, 0], sizes = [8, 384], strides = [1, 1]} : vector<8x768xf32> to vector<8x384xf32>
    %303 = vector.extract_strided_slice %301 {offsets = [0, 384], sizes = [8, 384], strides = [1, 1]} : vector<8x768xf32> to vector<8x384xf32>
    %304 = vector.extract_strided_slice %302 {offsets = [0, 0], sizes = [8, 32], strides = [1, 1]} : vector<8x384xf32> to vector<8x32xf32>
    %305 = vector.extract_strided_slice %302 {offsets = [0, 128], sizes = [8, 32], strides = [1, 1]} : vector<8x384xf32> to vector<8x32xf32>
    %306 = vector.extract_strided_slice %302 {offsets = [0, 256], sizes = [8, 32], strides = [1, 1]} : vector<8x384xf32> to vector<8x32xf32>
    %307 = vector.extract_strided_slice %303 {offsets = [0, 0], sizes = [8, 32], strides = [1, 1]} : vector<8x384xf32> to vector<8x32xf32>
    %308 = vector.extract_strided_slice %303 {offsets = [0, 128], sizes = [8, 32], strides = [1, 1]} : vector<8x384xf32> to vector<8x32xf32>
    %309 = vector.extract_strided_slice %303 {offsets = [0, 256], sizes = [8, 32], strides = [1, 1]} : vector<8x384xf32> to vector<8x32xf32>
    %310 = arith.addf %304, %307 : vector<8x32xf32>
    %311 = arith.negf %310 : vector<8x32xf32>
    %312 = math.exp %311 : vector<8x32xf32>
    %cst_76 = arith.constant 1.000000e+00 : f32
    %313 = vector.broadcast %cst_76 : f32 to vector<8x32xf32>
    %314 = arith.addf %313, %312 : vector<8x32xf32>
    %315 = arith.divf %313, %314 : vector<8x32xf32>
    %316 = arith.addf %305, %308 : vector<8x32xf32>
    %317 = arith.negf %316 : vector<8x32xf32>
    %318 = math.exp %317 : vector<8x32xf32>
    %cst_77 = arith.constant 1.000000e+00 : f32
    %319 = vector.broadcast %cst_77 : f32 to vector<8x32xf32>
    %320 = arith.addf %319, %318 : vector<8x32xf32>
    %321 = arith.divf %319, %320 : vector<8x32xf32>
    %322 = arith.mulf %315, %309 : vector<8x32xf32>
    %323 = arith.addf %306, %322 : vector<8x32xf32>
    %324 = math.tanh %323 : vector<8x32xf32>
    %cst_78 = arith.constant 1.000000e+00 : f32
    %325 = vector.broadcast %cst_78 : f32 to vector<8x32xf32>
    %326 = arith.subf %325, %321 : vector<8x32xf32>
    %327 = arith.mulf %326, %324 : vector<8x32xf32>
    %328 = arith.mulf %321, %268 : vector<8x32xf32>
    %329 = arith.addf %327, %328 : vector<8x32xf32>
    %c32_79 = arith.constant 32 : index
    %c0_80 = arith.constant 0 : index
    %330 = vector.load %arg14[%c32_79, %c0_80] : memref<64x32xf32, #tpu.memory_space<vmem>>, vector<8x32xf32>
    tpu.vector_store %arg14[%c32_79, %c0_80], %329 {strides = array<i32>} : memref<64x32xf32, #tpu.memory_space<vmem>>, vector<8x32xf32>,
    %c40 = arith.constant 40 : index
    %c0_81 = arith.constant 0 : index
    %331 = vector.load %arg13[%c40, %c0_81] : memref<64x384xf32, #tpu.memory_space<vmem>>, vector<8x384xf32>
    %cst_82 = arith.constant dense<0.000000e+00> : vector<8x384xf32>
    %332 = tpu.matmul %298, %14, %cst_82 {dimension_numbers = #tpu.dot_dimension_numbers<[1], [0], [0], [1], [0, 0, 1, 1], [], []>} : vector<8x32xf32>, vector<32x384xf32>, vector<8x384xf32> -> vector<8x384xf32>
    %333 = arith.addf %332, %17 : vector<8x384xf32>
    %334 = vector.extract_strided_slice %331 {offsets = [0, 0], sizes = [8, 32], strides = [1, 1]} : vector<8x384xf32> to vector<8x32xf32>
    %335 = vector.extract_strided_slice %331 {offsets = [0, 128], sizes = [8, 32], strides = [1, 1]} : vector<8x384xf32> to vector<8x32xf32>
    %336 = vector.extract_strided_slice %331 {offsets = [0, 256], sizes = [8, 32], strides = [1, 1]} : vector<8x384xf32> to vector<8x32xf32>
    %337 = vector.extract_strided_slice %333 {offsets = [0, 0], sizes = [8, 32], strides = [1, 1]} : vector<8x384xf32> to vector<8x32xf32>
    %338 = vector.extract_strided_slice %333 {offsets = [0, 128], sizes = [8, 32], strides = [1, 1]} : vector<8x384xf32> to vector<8x32xf32>
    %339 = vector.extract_strided_slice %333 {offsets = [0, 256], sizes = [8, 32], strides = [1, 1]} : vector<8x384xf32> to vector<8x32xf32>
    %340 = arith.addf %334, %337 : vector<8x32xf32>
    %341 = arith.negf %340 : vector<8x32xf32>
    %342 = math.exp %341 : vector<8x32xf32>
    %cst_83 = arith.constant 1.000000e+00 : f32
    %343 = vector.broadcast %cst_83 : f32 to vector<8x32xf32>
    %344 = arith.addf %343, %342 : vector<8x32xf32>
    %345 = arith.divf %343, %344 : vector<8x32xf32>
    %346 = arith.addf %335, %338 : vector<8x32xf32>
    %347 = arith.negf %346 : vector<8x32xf32>
    %348 = math.exp %347 : vector<8x32xf32>
    %cst_84 = arith.constant 1.000000e+00 : f32
    %349 = vector.broadcast %cst_84 : f32 to vector<8x32xf32>
    %350 = arith.addf %349, %348 : vector<8x32xf32>
    %351 = arith.divf %349, %350 : vector<8x32xf32>
    %352 = arith.mulf %345, %339 : vector<8x32xf32>
    %353 = arith.addf %336, %352 : vector<8x32xf32>
    %354 = math.tanh %353 : vector<8x32xf32>
    %cst_85 = arith.constant 1.000000e+00 : f32
    %355 = vector.broadcast %cst_85 : f32 to vector<8x32xf32>
    %356 = arith.subf %355, %351 : vector<8x32xf32>
    %357 = arith.mulf %356, %354 : vector<8x32xf32>
    %358 = arith.mulf %351, %298 : vector<8x32xf32>
    %359 = arith.addf %357, %358 : vector<8x32xf32>
    %360 = tpu.concatenate %359, %329 in 1 : vector<8x32xf32>, vector<8x32xf32> -> vector<8x64xf32>
    %cst_86 = arith.constant dense<0.000000e+00> : vector<8x768xf32>
    %361 = tpu.matmul %360, %19, %cst_86 {dimension_numbers = #tpu.dot_dimension_numbers<[1], [0], [0], [1], [0, 0, 1, 1], [], []>} : vector<8x64xf32>, vector<64x768xf32>, vector<8x768xf32> -> vector<8x768xf32>
    %362 = arith.addf %361, %23 : vector<8x768xf32>
    %363 = vector.extract_strided_slice %362 {offsets = [0, 0], sizes = [8, 384], strides = [1, 1]} : vector<8x768xf32> to vector<8x384xf32>
    %364 = vector.extract_strided_slice %362 {offsets = [0, 384], sizes = [8, 384], strides = [1, 1]} : vector<8x768xf32> to vector<8x384xf32>
    %365 = vector.extract_strided_slice %363 {offsets = [0, 0], sizes = [8, 32], strides = [1, 1]} : vector<8x384xf32> to vector<8x32xf32>
    %366 = vector.extract_strided_slice %363 {offsets = [0, 128], sizes = [8, 32], strides = [1, 1]} : vector<8x384xf32> to vector<8x32xf32>
    %367 = vector.extract_strided_slice %363 {offsets = [0, 256], sizes = [8, 32], strides = [1, 1]} : vector<8x384xf32> to vector<8x32xf32>
    %368 = vector.extract_strided_slice %364 {offsets = [0, 0], sizes = [8, 32], strides = [1, 1]} : vector<8x384xf32> to vector<8x32xf32>
    %369 = vector.extract_strided_slice %364 {offsets = [0, 128], sizes = [8, 32], strides = [1, 1]} : vector<8x384xf32> to vector<8x32xf32>
    %370 = vector.extract_strided_slice %364 {offsets = [0, 256], sizes = [8, 32], strides = [1, 1]} : vector<8x384xf32> to vector<8x32xf32>
    %371 = arith.addf %365, %368 : vector<8x32xf32>
    %372 = arith.negf %371 : vector<8x32xf32>
    %373 = math.exp %372 : vector<8x32xf32>
    %cst_87 = arith.constant 1.000000e+00 : f32
    %374 = vector.broadcast %cst_87 : f32 to vector<8x32xf32>
    %375 = arith.addf %374, %373 : vector<8x32xf32>
    %376 = arith.divf %374, %375 : vector<8x32xf32>
    %377 = arith.addf %366, %369 : vector<8x32xf32>
    %378 = arith.negf %377 : vector<8x32xf32>
    %379 = math.exp %378 : vector<8x32xf32>
    %cst_88 = arith.constant 1.000000e+00 : f32
    %380 = vector.broadcast %cst_88 : f32 to vector<8x32xf32>
    %381 = arith.addf %380, %379 : vector<8x32xf32>
    %382 = arith.divf %380, %381 : vector<8x32xf32>
    %383 = arith.mulf %376, %370 : vector<8x32xf32>
    %384 = arith.addf %367, %383 : vector<8x32xf32>
    %385 = math.tanh %384 : vector<8x32xf32>
    %cst_89 = arith.constant 1.000000e+00 : f32
    %386 = vector.broadcast %cst_89 : f32 to vector<8x32xf32>
    %387 = arith.subf %386, %382 : vector<8x32xf32>
    %388 = arith.mulf %387, %385 : vector<8x32xf32>
    %389 = arith.mulf %382, %329 : vector<8x32xf32>
    %390 = arith.addf %388, %389 : vector<8x32xf32>
    %c40_90 = arith.constant 40 : index
    %c0_91 = arith.constant 0 : index
    %391 = vector.load %arg14[%c40_90, %c0_91] : memref<64x32xf32, #tpu.memory_space<vmem>>, vector<8x32xf32>
    tpu.vector_store %arg14[%c40_90, %c0_91], %390 {strides = array<i32>} : memref<64x32xf32, #tpu.memory_space<vmem>>, vector<8x32xf32>,
    %c48 = arith.constant 48 : index
    %c0_92 = arith.constant 0 : index
    %392 = vector.load %arg13[%c48, %c0_92] : memref<64x384xf32, #tpu.memory_space<vmem>>, vector<8x384xf32>
    %cst_93 = arith.constant dense<0.000000e+00> : vector<8x384xf32>
    %393 = tpu.matmul %359, %14, %cst_93 {dimension_numbers = #tpu.dot_dimension_numbers<[1], [0], [0], [1], [0, 0, 1, 1], [], []>} : vector<8x32xf32>, vector<32x384xf32>, vector<8x384xf32> -> vector<8x384xf32>
    %394 = arith.addf %393, %17 : vector<8x384xf32>
    %395 = vector.extract_strided_slice %392 {offsets = [0, 0], sizes = [8, 32], strides = [1, 1]} : vector<8x384xf32> to vector<8x32xf32>
    %396 = vector.extract_strided_slice %392 {offsets = [0, 128], sizes = [8, 32], strides = [1, 1]} : vector<8x384xf32> to vector<8x32xf32>
    %397 = vector.extract_strided_slice %392 {offsets = [0, 256], sizes = [8, 32], strides = [1, 1]} : vector<8x384xf32> to vector<8x32xf32>
    %398 = vector.extract_strided_slice %394 {offsets = [0, 0], sizes = [8, 32], strides = [1, 1]} : vector<8x384xf32> to vector<8x32xf32>
    %399 = vector.extract_strided_slice %394 {offsets = [0, 128], sizes = [8, 32], strides = [1, 1]} : vector<8x384xf32> to vector<8x32xf32>
    %400 = vector.extract_strided_slice %394 {offsets = [0, 256], sizes = [8, 32], strides = [1, 1]} : vector<8x384xf32> to vector<8x32xf32>
    %401 = arith.addf %395, %398 : vector<8x32xf32>
    %402 = arith.negf %401 : vector<8x32xf32>
    %403 = math.exp %402 : vector<8x32xf32>
    %cst_94 = arith.constant 1.000000e+00 : f32
    %404 = vector.broadcast %cst_94 : f32 to vector<8x32xf32>
    %405 = arith.addf %404, %403 : vector<8x32xf32>
    %406 = arith.divf %404, %405 : vector<8x32xf32>
    %407 = arith.addf %396, %399 : vector<8x32xf32>
    %408 = arith.negf %407 : vector<8x32xf32>
    %409 = math.exp %408 : vector<8x32xf32>
    %cst_95 = arith.constant 1.000000e+00 : f32
    %410 = vector.broadcast %cst_95 : f32 to vector<8x32xf32>
    %411 = arith.addf %410, %409 : vector<8x32xf32>
    %412 = arith.divf %410, %411 : vector<8x32xf32>
    %413 = arith.mulf %406, %400 : vector<8x32xf32>
    %414 = arith.addf %397, %413 : vector<8x32xf32>
    %415 = math.tanh %414 : vector<8x32xf32>
    %cst_96 = arith.constant 1.000000e+00 : f32
    %416 = vector.broadcast %cst_96 : f32 to vector<8x32xf32>
    %417 = arith.subf %416, %412 : vector<8x32xf32>
    %418 = arith.mulf %417, %415 : vector<8x32xf32>
    %419 = arith.mulf %412, %359 : vector<8x32xf32>
    %420 = arith.addf %418, %419 : vector<8x32xf32>
    %421 = tpu.concatenate %420, %390 in 1 : vector<8x32xf32>, vector<8x32xf32> -> vector<8x64xf32>
    %cst_97 = arith.constant dense<0.000000e+00> : vector<8x768xf32>
    %422 = tpu.matmul %421, %19, %cst_97 {dimension_numbers = #tpu.dot_dimension_numbers<[1], [0], [0], [1], [0, 0, 1, 1], [], []>} : vector<8x64xf32>, vector<64x768xf32>, vector<8x768xf32> -> vector<8x768xf32>
    %423 = arith.addf %422, %23 : vector<8x768xf32>
    %424 = vector.extract_strided_slice %423 {offsets = [0, 0], sizes = [8, 384], strides = [1, 1]} : vector<8x768xf32> to vector<8x384xf32>
    %425 = vector.extract_strided_slice %423 {offsets = [0, 384], sizes = [8, 384], strides = [1, 1]} : vector<8x768xf32> to vector<8x384xf32>
    %426 = vector.extract_strided_slice %424 {offsets = [0, 0], sizes = [8, 32], strides = [1, 1]} : vector<8x384xf32> to vector<8x32xf32>
    %427 = vector.extract_strided_slice %424 {offsets = [0, 128], sizes = [8, 32], strides = [1, 1]} : vector<8x384xf32> to vector<8x32xf32>
    %428 = vector.extract_strided_slice %424 {offsets = [0, 256], sizes = [8, 32], strides = [1, 1]} : vector<8x384xf32> to vector<8x32xf32>
    %429 = vector.extract_strided_slice %425 {offsets = [0, 0], sizes = [8, 32], strides = [1, 1]} : vector<8x384xf32> to vector<8x32xf32>
    %430 = vector.extract_strided_slice %425 {offsets = [0, 128], sizes = [8, 32], strides = [1, 1]} : vector<8x384xf32> to vector<8x32xf32>
    %431 = vector.extract_strided_slice %425 {offsets = [0, 256], sizes = [8, 32], strides = [1, 1]} : vector<8x384xf32> to vector<8x32xf32>
    %432 = arith.addf %426, %429 : vector<8x32xf32>
    %433 = arith.negf %432 : vector<8x32xf32>
    %434 = math.exp %433 : vector<8x32xf32>
    %cst_98 = arith.constant 1.000000e+00 : f32
    %435 = vector.broadcast %cst_98 : f32 to vector<8x32xf32>
    %436 = arith.addf %435, %434 : vector<8x32xf32>
    %437 = arith.divf %435, %436 : vector<8x32xf32>
    %438 = arith.addf %427, %430 : vector<8x32xf32>
    %439 = arith.negf %438 : vector<8x32xf32>
    %440 = math.exp %439 : vector<8x32xf32>
    %cst_99 = arith.constant 1.000000e+00 : f32
    %441 = vector.broadcast %cst_99 : f32 to vector<8x32xf32>
    %442 = arith.addf %441, %440 : vector<8x32xf32>
    %443 = arith.divf %441, %442 : vector<8x32xf32>
    %444 = arith.mulf %437, %431 : vector<8x32xf32>
    %445 = arith.addf %428, %444 : vector<8x32xf32>
    %446 = math.tanh %445 : vector<8x32xf32>
    %cst_100 = arith.constant 1.000000e+00 : f32
    %447 = vector.broadcast %cst_100 : f32 to vector<8x32xf32>
    %448 = arith.subf %447, %443 : vector<8x32xf32>
    %449 = arith.mulf %448, %446 : vector<8x32xf32>
    %450 = arith.mulf %443, %390 : vector<8x32xf32>
    %451 = arith.addf %449, %450 : vector<8x32xf32>
    %c48_101 = arith.constant 48 : index
    %c0_102 = arith.constant 0 : index
    %452 = vector.load %arg14[%c48_101, %c0_102] : memref<64x32xf32, #tpu.memory_space<vmem>>, vector<8x32xf32>
    tpu.vector_store %arg14[%c48_101, %c0_102], %451 {strides = array<i32>} : memref<64x32xf32, #tpu.memory_space<vmem>>, vector<8x32xf32>,
    %c56 = arith.constant 56 : index
    %c0_103 = arith.constant 0 : index
    %453 = vector.load %arg13[%c56, %c0_103] : memref<64x384xf32, #tpu.memory_space<vmem>>, vector<8x384xf32>
    %cst_104 = arith.constant dense<0.000000e+00> : vector<8x384xf32>
    %454 = tpu.matmul %420, %14, %cst_104 {dimension_numbers = #tpu.dot_dimension_numbers<[1], [0], [0], [1], [0, 0, 1, 1], [], []>} : vector<8x32xf32>, vector<32x384xf32>, vector<8x384xf32> -> vector<8x384xf32>
    %455 = arith.addf %454, %17 : vector<8x384xf32>
    %456 = vector.extract_strided_slice %453 {offsets = [0, 0], sizes = [8, 32], strides = [1, 1]} : vector<8x384xf32> to vector<8x32xf32>
    %457 = vector.extract_strided_slice %453 {offsets = [0, 128], sizes = [8, 32], strides = [1, 1]} : vector<8x384xf32> to vector<8x32xf32>
    %458 = vector.extract_strided_slice %453 {offsets = [0, 256], sizes = [8, 32], strides = [1, 1]} : vector<8x384xf32> to vector<8x32xf32>
    %459 = vector.extract_strided_slice %455 {offsets = [0, 0], sizes = [8, 32], strides = [1, 1]} : vector<8x384xf32> to vector<8x32xf32>
    %460 = vector.extract_strided_slice %455 {offsets = [0, 128], sizes = [8, 32], strides = [1, 1]} : vector<8x384xf32> to vector<8x32xf32>
    %461 = vector.extract_strided_slice %455 {offsets = [0, 256], sizes = [8, 32], strides = [1, 1]} : vector<8x384xf32> to vector<8x32xf32>
    %462 = arith.addf %456, %459 : vector<8x32xf32>
    %463 = arith.negf %462 : vector<8x32xf32>
    %464 = math.exp %463 : vector<8x32xf32>
    %cst_105 = arith.constant 1.000000e+00 : f32
    %465 = vector.broadcast %cst_105 : f32 to vector<8x32xf32>
    %466 = arith.addf %465, %464 : vector<8x32xf32>
    %467 = arith.divf %465, %466 : vector<8x32xf32>
    %468 = arith.addf %457, %460 : vector<8x32xf32>
    %469 = arith.negf %468 : vector<8x32xf32>
    %470 = math.exp %469 : vector<8x32xf32>
    %cst_106 = arith.constant 1.000000e+00 : f32
    %471 = vector.broadcast %cst_106 : f32 to vector<8x32xf32>
    %472 = arith.addf %471, %470 : vector<8x32xf32>
    %473 = arith.divf %471, %472 : vector<8x32xf32>
    %474 = arith.mulf %467, %461 : vector<8x32xf32>
    %475 = arith.addf %458, %474 : vector<8x32xf32>
    %476 = math.tanh %475 : vector<8x32xf32>
    %cst_107 = arith.constant 1.000000e+00 : f32
    %477 = vector.broadcast %cst_107 : f32 to vector<8x32xf32>
    %478 = arith.subf %477, %473 : vector<8x32xf32>
    %479 = arith.mulf %478, %476 : vector<8x32xf32>
    %480 = arith.mulf %473, %420 : vector<8x32xf32>
    %481 = arith.addf %479, %480 : vector<8x32xf32>
    %482 = tpu.concatenate %481, %451 in 1 : vector<8x32xf32>, vector<8x32xf32> -> vector<8x64xf32>
    %cst_108 = arith.constant dense<0.000000e+00> : vector<8x768xf32>
    %483 = tpu.matmul %482, %19, %cst_108 {dimension_numbers = #tpu.dot_dimension_numbers<[1], [0], [0], [1], [0, 0, 1, 1], [], []>} : vector<8x64xf32>, vector<64x768xf32>, vector<8x768xf32> -> vector<8x768xf32>
    %484 = arith.addf %483, %23 : vector<8x768xf32>
    %485 = vector.extract_strided_slice %484 {offsets = [0, 0], sizes = [8, 384], strides = [1, 1]} : vector<8x768xf32> to vector<8x384xf32>
    %486 = vector.extract_strided_slice %484 {offsets = [0, 384], sizes = [8, 384], strides = [1, 1]} : vector<8x768xf32> to vector<8x384xf32>
    %487 = vector.extract_strided_slice %485 {offsets = [0, 0], sizes = [8, 32], strides = [1, 1]} : vector<8x384xf32> to vector<8x32xf32>
    %488 = vector.extract_strided_slice %485 {offsets = [0, 128], sizes = [8, 32], strides = [1, 1]} : vector<8x384xf32> to vector<8x32xf32>
    %489 = vector.extract_strided_slice %485 {offsets = [0, 256], sizes = [8, 32], strides = [1, 1]} : vector<8x384xf32> to vector<8x32xf32>
    %490 = vector.extract_strided_slice %486 {offsets = [0, 0], sizes = [8, 32], strides = [1, 1]} : vector<8x384xf32> to vector<8x32xf32>
    %491 = vector.extract_strided_slice %486 {offsets = [0, 128], sizes = [8, 32], strides = [1, 1]} : vector<8x384xf32> to vector<8x32xf32>
    %492 = vector.extract_strided_slice %486 {offsets = [0, 256], sizes = [8, 32], strides = [1, 1]} : vector<8x384xf32> to vector<8x32xf32>
    %493 = arith.addf %487, %490 : vector<8x32xf32>
    %494 = arith.negf %493 : vector<8x32xf32>
    %495 = math.exp %494 : vector<8x32xf32>
    %cst_109 = arith.constant 1.000000e+00 : f32
    %496 = vector.broadcast %cst_109 : f32 to vector<8x32xf32>
    %497 = arith.addf %496, %495 : vector<8x32xf32>
    %498 = arith.divf %496, %497 : vector<8x32xf32>
    %499 = arith.addf %488, %491 : vector<8x32xf32>
    %500 = arith.negf %499 : vector<8x32xf32>
    %501 = math.exp %500 : vector<8x32xf32>
    %cst_110 = arith.constant 1.000000e+00 : f32
    %502 = vector.broadcast %cst_110 : f32 to vector<8x32xf32>
    %503 = arith.addf %502, %501 : vector<8x32xf32>
    %504 = arith.divf %502, %503 : vector<8x32xf32>
    %505 = arith.mulf %498, %492 : vector<8x32xf32>
    %506 = arith.addf %489, %505 : vector<8x32xf32>
    %507 = math.tanh %506 : vector<8x32xf32>
    %cst_111 = arith.constant 1.000000e+00 : f32
    %508 = vector.broadcast %cst_111 : f32 to vector<8x32xf32>
    %509 = arith.subf %508, %504 : vector<8x32xf32>
    %510 = arith.mulf %509, %507 : vector<8x32xf32>
    %511 = arith.mulf %504, %451 : vector<8x32xf32>
    %512 = arith.addf %510, %511 : vector<8x32xf32>
    %c56_112 = arith.constant 56 : index
    %c0_113 = arith.constant 0 : index
    %513 = vector.load %arg14[%c56_112, %c0_113] : memref<64x32xf32, #tpu.memory_space<vmem>>, vector<8x32xf32>
    tpu.vector_store %arg14[%c56_112, %c0_113], %512 {strides = array<i32>} : memref<64x32xf32, #tpu.memory_space<vmem>>, vector<8x32xf32>,
    %c0_114 = arith.constant 0 : index
    %c0_115 = arith.constant 0 : index
    %514 = vector.load %arg14[%c0_114, %c0_115] : memref<64x32xf32, #tpu.memory_space<vmem>>, vector<64x32xf32>
    %c0_116 = arith.constant 0 : index
    %c0_117 = arith.constant 0 : index
    %515 = vector.load %arg10[%c0_116, %c0_117] : memref<32x32xf32, #tpu.memory_space<vmem>>, vector<32x32xf32>
    %cst_118 = arith.constant dense<0.000000e+00> : vector<64x32xf32>
    %516 = tpu.matmul %514, %515, %cst_118 {dimension_numbers = #tpu.dot_dimension_numbers<[1], [0], [0], [1], [0, 0, 1, 1], [], []>} : vector<64x32xf32>, vector<32x32xf32>, vector<64x32xf32> -> vector<64x32xf32>
    %c0_119 = arith.constant 0 : index
    %c0_120 = arith.constant 0 : index
    %517 = vector.load %arg11[%c0_119, %c0_120] : memref<1x32xf32, #tpu.memory_space<vmem>>, vector<1x32xf32>
    %518 = vector.broadcast %517 : vector<1x32xf32> to vector<64x32xf32>
    %519 = arith.addf %516, %518 : vector<64x32xf32>
    %c0_121 = arith.constant 0 : index
    %c0_122 = arith.constant 0 : index
    %520 = vector.load %arg12[%c0_121, %c0_122] : memref<64x32xf32, #tpu.memory_space<vmem>>, vector<64x32xf32>
    tpu.vector_store %arg12[%c0_121, %c0_122], %519 {strides = array<i32>} : memref<64x32xf32, #tpu.memory_space<vmem>>, vector<64x32xf32>,
    return
  }
  func.func @transform_0(%arg0: i32) -> (i32, i32) {
    %c0_i32 = arith.constant 0 : i32
    %c0_i32_0 = arith.constant 0 : i32
    %c0_i32_1 = arith.constant 0 : i32
    return %c0_i32, %c0_i32_0 : i32, i32
  }
  func.func @transform_1(%arg0: i32) -> (i32, i32) {
    %c0_i32 = arith.constant 0 : i32
    %c0_i32_0 = arith.constant 0 : i32
    %c0_i32_1 = arith.constant 0 : i32
    return %c0_i32, %c0_i32_0 : i32, i32
  }
  func.func @transform_2(%arg0: i32) -> (i32, i32) {
    %c0_i32 = arith.constant 0 : i32
    %c0_i32_0 = arith.constant 0 : i32
    %c0_i32_1 = arith.constant 0 : i32
    return %c0_i32, %c0_i32_0 : i32, i32
  }
  func.func @transform_3(%arg0: i32) -> (i32, i32) {
    %c0_i32 = arith.constant 0 : i32
    %c0_i32_0 = arith.constant 0 : i32
    %c0_i32_1 = arith.constant 0 : i32
    return %c0_i32, %c0_i32_0 : i32, i32
  }
  func.func @transform_4(%arg0: i32) -> (i32, i32) {
    %c0_i32 = arith.constant 0 : i32
    %c0_i32_0 = arith.constant 0 : i32
    %c0_i32_1 = arith.constant 0 : i32
    return %c0_i32, %c0_i32_0 : i32, i32
  }
  func.func @transform_5(%arg0: i32) -> (i32, i32) {
    %c0_i32 = arith.constant 0 : i32
    %c0_i32_0 = arith.constant 0 : i32
    %c0_i32_1 = arith.constant 0 : i32
    return %c0_i32, %c0_i32_0 : i32, i32
  }
  func.func @transform_6(%arg0: i32) -> (i32, i32) {
    %c0_i32 = arith.constant 0 : i32
    %c0_i32_0 = arith.constant 0 : i32
    %c0_i32_1 = arith.constant 0 : i32
    return %c0_i32, %c0_i32_0 : i32, i32
  }
  func.func @transform_7(%arg0: i32) -> (i32, i32, i32) {
    %c0_i32 = arith.constant 0 : i32
    %c0_i32_0 = arith.constant 0 : i32
    %c0_i32_1 = arith.constant 0 : i32
    %c0_i32_2 = arith.constant 0 : i32
    return %c0_i32, %c0_i32_0, %c0_i32_1 : i32, i32, i32
  }
  func.func @transform_8(%arg0: i32) -> (i32, i32, i32) {
    %c0_i32 = arith.constant 0 : i32
    %c0_i32_0 = arith.constant 0 : i32
    %c0_i32_1 = arith.constant 0 : i32
    %c0_i32_2 = arith.constant 0 : i32
    return %c0_i32, %c0_i32_0, %c0_i32_1 : i32, i32, i32
  }
  func.func @transform_9(%arg0: i32) -> (i32, i32) {
    %c0_i32 = arith.constant 0 : i32
    %c0_i32_0 = arith.constant 0 : i32
    %c0_i32_1 = arith.constant 0 : i32
    return %c0_i32, %c0_i32_0 : i32, i32
  }
  func.func @transform_10(%arg0: i32) -> (i32, i32) {
    %c0_i32 = arith.constant 0 : i32
    %c0_i32_0 = arith.constant 0 : i32
    %c0_i32_1 = arith.constant 0 : i32
    return %c0_i32, %c0_i32_0 : i32, i32
  }
  func.func @transform_11(%arg0: i32) -> (i32, i32) {
    %c0_i32 = arith.constant 0 : i32
    %c0_i32_0 = arith.constant 0 : i32
    %c0_i32_1 = arith.constant 0 : i32
    return %c0_i32, %c0_i32_0 : i32, i32
  }
}

</mosaic_0001>

<bundles_post_ra>
// kernel: smiles_decoder_forward.1
= control target key start
LH: loop header
LB: loop body
LE: loop exit
PB: predicated region body
PF: predicated region fallthrough
CT: control target
= control target key end

     0   :  { %vm56_vm0 = vcmask 392192   ;;  %vm150_vm1 = vcmask 261120   ;;  %v3239_v54 = vmov 0.0   ;;  %vm518_vm10 = vcmask 523264   ;;  %s5372_s1 = inlined_call_operand.vmem [shape: f32[48,32], index: 1, kind: input, shape index: {}]   ;;  %s5373_s2 = inlined_call_operand.vmem [shape: f32[1,32], index: 2, kind: input, shape index: {}]   ;;  %s5374_s0 = inlined_call_operand.vmem [shape: f32[64,48], index: 0, kind: input, shape index: {}]   ;;  %s5375_s3 = inlined_call_operand.vmem [shape: f32[32,384], index: 3, kind: input, shape index: {}]   ;;  %s5376_s5 = inlined_call_operand.vmem [shape: f32[32,384], index: 5, kind: input, shape index: {}]   ;;  %s5377_s4 = inlined_call_operand.vmem [shape: f32[1,384], index: 4, kind: input, shape index: {}]   ;;  %s5378_s6 = inlined_call_operand.vmem [shape: f32[1,384], index: 6, kind: input, shape index: {}]   ;;  %s5379_s7 = inlined_call_operand.vmem [shape: f32[1,64,768], index: 7, kind: input, shape index: {}]   ;;  %s5380_s8 = inlined_call_operand.vmem [shape: f32[1,1,768], index: 8, kind: input, shape index: {}]   ;;  %s5381_s9 = inlined_call_operand.vmem [shape: f32[32,32], index: 9, kind: input, shape index: {}]   ;;  %s5382_s10 = inlined_call_operand.vmem [shape: f32[1,32], index: 10, kind: input, shape index: {}]   ;;  %s5383_s11 = inlined_call_operand.vmem [shape: f32[64,32], index: 11, kind: output, shape index: {}]  }
   0x1   :  { %v51_v0 = vld [vmem:[%s5372_s1 + $0x28] sm:$0xff]  ;;  %v50_v1 = vld [vmem:[%s5372_s1 + $0x20] sm:$0xff]  ;;  %v49_v2 = vld [vmem:[%s5372_s1 + $0x18] sm:$0xff] }
   0x2   :  { %91 = vmatpush.msra.mxu0 %v51_v0  ;;  %v48_v3 = vld [vmem:[%s5372_s1 + $0x10] sm:$0xff]  ;;  %v47_v4 = vld [vmem:[%s5372_s1 + $0x8] sm:$0xff]  ;;  %v46_v5 = vld [vmem:[%s5372_s1] sm:$0xff] }
   0x3   :  { %v38_v6 = vld [vmem:[%s5374_s0] sm:$0xff]  ;;  %v39_v7 = vld [vmem:[%s5374_s0 + $0x8] sm:$0xff]  ;;  %v40_v8 = vld [vmem:[%s5374_s0 + $0x10] sm:$0xff] }
   0x4   :  { %92 = vmatpush.msra.mxu0 %v50_v1  ;;  %v41_v9 = vld [vmem:[%s5374_s0 + $0x18] sm:$0xff]  ;;  %v139_v10 = vld [vmem:[%s5375_s3 + $0x48] sm:$0xff]  ;;  %v140_v11 = vld [vmem:[%s5375_s3 + $0x50] sm:$0xff] }
   0x5   :  { %187 = vmatpush.msra.mxu1 %v139_v10  ;;  %2947 = vmatpush.msra.mxu2 %v140_v11  ;;  %v42_v12 = vld [vmem:[%s5374_s0 + $0x20] sm:$0xff]  ;;  %v43_v13 = vld [vmem:[%s5374_s0 + $0x28] sm:$0xff]  ;;  %v44_v14 = vld [vmem:[%s5374_s0 + $0x30] sm:$0xff] }
   0x6   :  { %93 = vmatpush.msra.mxu0 %v49_v2  ;;  %2948 = vmatpush.msra.mxu3 %v140_v11  ;;  %v45_v15 = vld [vmem:[%s5374_s0 + $0x38] sm:$0xff]  ;;  %v136_v16 = vld [vmem:[%s5375_s3 + $0x30] sm:$0xff]  ;;  %v134_v19 = vld [vmem:[%s5375_s3 + $0x20] sm:$0xff] }
   0x7   :  { %v137_v17 = vld [vmem:[%s5375_s3 + $0x38] sm:$0xff]  ;;  %188 = vmatpush.msra.mxu1 %v136_v16  ;;  %v130_v20 = vld [vmem:[%s5375_s3] sm:$0xff]  ;;  %v131_v21 = vld [vmem:[%s5375_s3 + $0x8] sm:$0xff] }
   0x8   :  { %94 = vmatpush.msra.mxu0 %v48_v3  ;;  %v133_v18 = vld [vmem:[%s5375_s3 + $0x18] sm:$0xff]  ;;  %2949 = vmatpush.msra.mxu2 %v137_v17  ;;  %v3378_v22 = vld [vmem:[%s5373_s2] ss:$0 sm:$0xff]  ;;  %v3390_v26 = vld [vmem:[%s5376_s5 + $0x50] sm:$0xff] }
   0x9   :  { %2950 = vmatpush.msra.mxu3 %v137_v17  ;;  %189 = vmatpush.msra.mxu1 %v133_v18  ;;  %5514 = vst [vmem:[#allocation4_spill] sm:$0xff] %v3390_v26  ;;  %v3396_v27 = vld [vmem:[%s5376_s5 + $0x38] sm:$0xff]  ;;  %v3403_v30 = vld [vmem:[%s5376_s5 + $0x20] sm:$0xff]  ;;  %v3409_v32 = vld [vmem:[%s5376_s5 + $0x8] sm:$0xff] }
   0xa   :  { %95 = vmatpush.msra.mxu0 %v47_v4  ;;  %2951 = vmatpush.msra.mxu2 %v134_v19  ;;  %5515 = vst [vmem:[#allocation5_spill] sm:$0xff] %v3396_v27  ;;  %v141_v33 = vld [vmem:[%s5375_s3 + $0x58] sm:$0xff]  ;;  %v3420_v34 = vld [vmem:[%s5376_s5 + $0x48] sm:$0xff]  ;;  %v138_v38 = vld [vmem:[%s5375_s3 + $0x40] sm:$0xff] }
   0xb   :  { %2952 = vmatpush.msra.mxu3 %v134_v19  ;;  %190 = vmatpush.msra.mxu1 %v130_v20  ;;  %5516 = vst [vmem:[#allocation6_spill] sm:$0xff] %v3403_v30  ;;  %v135_v42 = vld [vmem:[%s5375_s3 + $0x28] sm:$0xff]  ;;  %v3438_v43 = vld [vmem:[%s5376_s5 + $0x30] sm:$0xff]  ;;  %v3446_v45 = vld [vmem:[%s5376_s5 + $0x18] sm:$0xff] }
   0xc   :  { %96 = vmatpush.msra.mxu0 %v46_v5  ;;  %2953 = vmatpush.msra.mxu2 %v131_v21  ;;  %5517 = vst [vmem:[#allocation7_spill] sm:$0xff] %v3409_v32  ;;  %v132_v44 = vld [vmem:[%s5375_s3 + $0x10] sm:$0xff]  ;;  %v3452_v46 = vld [vmem:[%s5376_s5] sm:$0xff]  ;;  %v3463_v53 = vld [vmem:[%s5376_s5 + $0x58] sm:$0xff] }
   0xd   :  { %2806 = vmatmul.msk.f32.vlgmr.msra.gmra.mxu0 %vm56_vm0, %v38_v6  ;;  %2954 = vmatpush.msra.mxu3 %v131_v21  ;;  %5518 = vst [vmem:[#allocation8_spill] sm:$0xff] %v3420_v34  ;;  %v3474_v58 = vld [vmem:[%s5376_s5 + $0x40] sm:$0xff]  ;;  %v3485_v62 = vld [vmem:[%s5376_s5 + $0x28] sm:$0xff]  ;;  %v3493_v63 = vld [vmem:[%s5376_s5 + $0x10] sm:$0xff] }
   0xe   :  { %228 = vmatpush.msrb.mxu0 %v140_v11  ;;  %442 = vmatpush.msrb.mxu2 %v3390_v26  ;;  %5519 = vst [vmem:[#allocation9_spill] sm:$0xff] %v3452_v46  ;;  %v142_v3 = vld [vmem:[%s5377_s4] sm:$0x7] }
   0xf   :  { %269 = vmatpush.msrb.mxu3 %v141_v33  ;;  %422 = vmatpush.msrb.mxu1 %v3420_v34  ;;  %v3508_v4 = vperm.slane %v142_v3, 0 }
  0x10   :  { %229 = vmatpush.msrb.mxu0 %v137_v17  ;;  %443 = vmatpush.msrb.mxu2 %v3396_v27 }
  0x11   :  { %270 = vmatpush.msrb.mxu3 %v138_v38  ;;  %423 = vmatpush.msrb.mxu1 %v3438_v43  ;;  %5522 = vst [vmem:[#allocation12_spill] sm:$0xff] %v3508_v4 }
  0x12   :  { %230 = vmatpush.msrb.mxu0 %v134_v19  ;;  %444 = vmatpush.msrb.mxu2 %v3403_v30 }
  0x13   :  { %271 = vmatpush.msrb.mxu3 %v135_v42  ;;  %424 = vmatpush.msrb.mxu1 %v3446_v45 }
  0x14   :  { %231 = vmatpush.msrb.mxu0 %v131_v21  ;;  %445 = vmatpush.msrb.mxu2 %v3409_v32 }
  0x15   :  { %2807 = vmatmul.msk.f32.gmra.mxu0 %vm56_vm0, %v39_v7  ;;  %272 = vmatpush.msrb.mxu3 %v132_v44 }
  0x16   :  { %425 = vmatpush.msrb.mxu1 %v3452_v46 }
  0x1d   :  { %2808 = vmatmul.msk.f32.gmra.mxu0 %vm56_vm0, %v40_v8 }
  0x25   :  { %2809 = vmatmul.msk.f32.gmra.mxu0 %vm56_vm0, %v41_v9 }
  0x2d   :  { %2810 = vmatmul.msk.f32.gmra.mxu0 %vm56_vm0, %v42_v12 }
  0x35   :  { %2811 = vmatmul.msk.f32.gmra.mxu0 %vm56_vm0, %v43_v13 }
  0x3d   :  { %2812 = vmatmul.msk.f32.gmra.mxu0 %vm56_vm0, %v44_v14 }
  0x45   :  { %2813 = vmatmul.msk.f32.gmra.mxu0 %vm56_vm0, %v45_v15 }
  0x8a   :  { %v98_v23 = vpop.f32.mrf.mxu0 }
  0x8b   :  { %v99_v24 = vadd.f32 %v3378_v22, %v98_v23 }
  0x8d   :  { %v3381_v25 = vmax.f32 %v99_v24, 0.0 }
  0x8f   :  { %2814 = vmatmul.msk.f32.vlgmr.msra.gmra.mxu1 %vm150_vm1, %v3381_v25  ;;  %2822 = vmatmul.msk.f32.vlgmr.msrb.gmra.mxu0 %vm150_vm1, %v3381_v25 }
  0x92   :  { %v101_v28 = vpop.f32.mrf.mxu0 }
  0x93   :  { %v102_v29 = vadd.f32 %v3378_v22, %v101_v28 }
  0x95   :  { %v123_v31 = vmax.f32 %v102_v29, 0.0 }
  0x97   :  { %2815 = vmatmul.msk.f32.gmra.mxu1 %vm150_vm1, %v123_v31  ;;  %2823 = vmatmul.msk.f32.gmra.mxu0 %vm150_vm1, %v123_v31 }
  0x9a   :  { %v104_v35 = vpop.f32.mrf.mxu0 }
  0x9b   :  { %v105_v36 = vadd.f32 %v3378_v22, %v104_v35 }
  0x9d   :  { %v124_v37 = vmax.f32 %v105_v36, 0.0 }
  0x9f   :  { %2816 = vmatmul.msk.f32.gmra.mxu1 %vm150_vm1, %v124_v37  ;;  %2824 = vmatmul.msk.f32.vlgmr.msra.gmra.mxu2 %vm150_vm1, %v124_v37 }
  0xa2   :  { %v107_v39 = vpop.f32.mrf.mxu0 }
  0xa3   :  { %v108_v40 = vadd.f32 %v3378_v22, %v107_v39  ;;  %v3559_v39 = vperm.slane %v142_v3, 1 }
  0xa5   :  { %v125_v41 = vmax.f32 %v108_v40, 0.0  ;;  %5538 = vst [vmem:[#allocation28_spill] sm:$0xff] %v3559_v39 }
  0xa7   :  { %2817 = vmatmul.msk.f32.gmra.mxu1 %vm150_vm1, %v125_v41  ;;  %2825 = vmatmul.msk.f32.gmra.mxu2 %vm150_vm1, %v125_v41 }
  0xaa   :  { %v110_v47 = vpop.f32.mrf.mxu0 }
  0xab   :  { %v111_v48 = vadd.f32 %v3378_v22, %v110_v47 }
  0xad   :  { %v126_v49 = vmax.f32 %v111_v48, 0.0 }
  0xaf   :  { %2818 = vmatmul.msk.f32.gmra.mxu1 %vm150_vm1, %v126_v49  ;;  %2826 = vmatmul.msk.f32.gmra.mxu2 %vm150_vm1, %v126_v49 }
  0xb2   :  { %v113_v50 = vpop.f32.mrf.mxu0 }
  0xb3   :  { %v114_v51 = vadd.f32 %v3378_v22, %v113_v50  ;;  %v3569_v50 = vld [vmem:[%s5379_s7 + $0x150] sm:$0xff] }
  0xb4   :  { %530 = vmatpush.msra.mxu0 %v3569_v50 }
  0xb5   :  { %v127_v52 = vmax.f32 %v114_v51, 0.0  ;;  %v3574_v51 = vld [vmem:[%s5379_s7 + $0x158] sm:$0xff] }
  0xb6   :  { %550 = vmatpush.msra.mxu1 %v3574_v51 }
  0xb7   :  { %2819 = vmatmul.msk.f32.gmra.mxu1 %vm150_vm1, %v127_v52  ;;  %2827 = vmatmul.msk.f32.vlgmr.msra.gmra.mxu3 %vm150_vm1, %v127_v52 }
  0xb8   :  { %446 = vmatmul.f32.vlgmr.msrb.gmra.mxu2 %v3239_v54  ;;  %462 = vmatpush.msra.mxu3 %v3463_v53 }
  0xba   :  { %v116_v55 = vpop.f32.mrf.mxu0  ;;  %463 = vmatpush.msra.mxu3 %v3474_v58 }
  0xbb   :  { %v117_v56 = vadd.f32 %v3378_v22, %v116_v55 }
  0xbc   :  { %464 = vmatpush.msra.mxu3 %v3485_v62 }
  0xbd   :  { %v128_v57 = vmax.f32 %v117_v56, 0.0 }
  0xbe   :  { %465 = vmatpush.msra.mxu3 %v3493_v63 }
  0xbf   :  { %2820 = vmatmul.msk.f32.gmra.mxu1 %vm150_vm1, %v128_v57  ;;  %2828 = vmatmul.msk.f32.gmra.mxu3 %vm150_vm1, %v128_v57 }
  0xc2   :  { %v119_v59 = vpop.f32.mrf.mxu0 }
  0xc3   :  { %v120_v60 = vadd.f32 %v3378_v22, %v119_v59  ;;  %v3542_v22 = vld [vmem:[%s5378_s6] sm:$0x7] }
  0xc4   :  { %v3547_v24 = vperm.slane %v3542_v22, 0  ;;  %v3554_v33 = vperm.slane %v3542_v22, 1 }
  0xc5   :  { %v129_v61 = vmax.f32 %v120_v60, 0.0 }
  0xc6   :  { %5535 = vst [vmem:[#allocation25_spill] sm:$0xff] %v3547_v24 }
  0xc7   :  { %2821 = vmatmul.msk.f32.gmra.mxu1 %vm150_vm1, %v129_v61  ;;  %2829 = vmatmul.msk.f32.gmra.mxu3 %vm150_vm1, %v129_v61  ;;  %5536 = vst [vmem:[#allocation26_spill] sm:$0xff] %v3554_v33 }
  0xcf   :  { %2830 = vmatmul.msk.f32.vlgmr.msrb.gmra.mxu3 %vm150_vm1, %v3381_v25  ;;  %426 = vmatmul.f32.vlgmr.msrb.gmra.mxu1 %v3239_v54 }
  0xd7   :  { %2831 = vmatmul.msk.f32.gmra.mxu3 %vm150_vm1, %v123_v31  ;;  %v3551_v31 = vperm.slane %v142_v3, 2  ;;  %v3610_v3 = vld [vmem:[%s5379_s7 + $0xc0] sm:$0xff] }
  0xdf   :  { %2832 = vmatmul.msk.f32.gmra.mxu3 %vm150_vm1, %v124_v37 }
  0xe7   :  { %2833 = vmatmul.msk.f32.gmra.mxu3 %vm150_vm1, %v125_v41 }
  0xef   :  { %2834 = vmatmul.msk.f32.gmra.mxu3 %vm150_vm1, %v126_v49 }
  0xf7   :  { %2835 = vmatmul.msk.f32.gmra.mxu3 %vm150_vm1, %v127_v52  ;;  %v3579_v52 = vld [vmem:[%s5379_s7 + $0x120] sm:$0xff] }
  0xf8   :  { %531 = vmatpush.msra.mxu0 %v3579_v52 }
  0xff   :  { %2836 = vmatmul.msk.f32.gmra.mxu3 %vm150_vm1, %v128_v57 }
 0x107   :  { %2837 = vmatmul.msk.f32.gmra.mxu3 %vm150_vm1, %v129_v61  ;;  %v3598_v61 = vld [vmem:[%s5379_s7 + $0xf0] sm:$0xff] }
 0x108   :  { %532 = vmatpush.msra.mxu0 %v3598_v61 }
 0x10a   :  { %533 = vmatpush.msra.mxu0 %v3610_v3 }
 0x10c   :  { %v192_v0 = vpop.f32.mrf.mxu1  ;;  %v233_v40 = vpop.f32.mrf.mxu0 }
 0x10d   :  { %v193_v29 = vadd.f32 %v192_v0, %v3508_v4  ;;  %v234_v44 = vadd.f32 %v233_v40, %v3559_v39  ;;  %v3603_v0 = vld [vmem:[%s5379_s7 + $0xf8] sm:$0xff]  ;;  %v3828_v39 = vld [vmem:[%s5379_s7 + $0xb0] sm:$0xff] }
 0x10e   :  { %5553 = vst [vmem:[#allocation43_spill] sm:$0xff] %v3828_v39 }
 0x10f   :  { %466 = vmatmul.f32.vlgmr.msra.gmra.mxu3 %v3239_v54  ;;  %v3586_v54 = vld [vmem:[%s5379_s7 + $0x128] sm:$0xff] }
 0x110   :  { %551 = vmatpush.msra.mxu1 %v3586_v54 }
 0x112   :  { %552 = vmatpush.msra.mxu1 %v3603_v0 }
 0x114   :  { %v3501_v1 = vpop.f32.mrf.mxu1 }
 0x115   :  { %5520 = vst [vmem:[#allocation10_spill] sm:$0xff] %v3501_v1  ;;  %v3833_v1 = vld [vmem:[%s5379_s7 + $0xb8] sm:$0xff] }
 0x116   :  { %5554 = vst [vmem:[#allocation44_spill] sm:$0xff] %v3833_v1 }
 0x11c   :  { %v3503_v2 = vpop.f32.mrf.mxu1 }
 0x11d   :  { %5521 = vst [vmem:[#allocation11_spill] sm:$0xff] %v3503_v2  ;;  %v3800_v2 = vld [vmem:[%s5379_s7 + $0x10] sm:$0xff] }
 0x11e   :  { %5549 = vst [vmem:[#allocation39_spill] sm:$0xff] %v3800_v2 }
 0x122   :  { %v3526_v16 = vpop.f32.mrf.mxu2 }
 0x123   :  { %5529 = vst [vmem:[#allocation19_spill] sm:$0xff] %v3526_v16  ;;  %v3795_v16 = vld [vmem:[%s5379_s7 + $0x118] sm:$0xff] }
 0x124   :  { %v201_v5 = vpop.f32.mrf.mxu1  ;;  %5548 = vst [vmem:[#allocation38_spill] sm:$0xff] %v3795_v16 }
 0x125   :  { %v3511_v6 = vadd.f32 %v201_v5, %v3508_v4  ;;  %v3615_v5 = vld [vmem:[%s5379_s7 + $0xc8] sm:$0xff] }
 0x126   :  { %553 = vmatpush.msra.mxu1 %v3615_v5 }
 0x127   :  { %5523 = vst [vmem:[#allocation13_spill] sm:$0xff] %v3511_v6  ;;  %v3780_v6 = vld [vmem:[%s5379_s7 + $0x48] sm:$0xff] }
 0x128   :  { %5545 = vst [vmem:[#allocation35_spill] sm:$0xff] %v3780_v6 }
 0x12a   :  { %v3533_v19 = vpop.f32.mrf.mxu2 }
 0x12b   :  { %5532 = vst [vmem:[#allocation22_spill] sm:$0xff] %v3533_v19 }
 0x12c   :  { %v204_v7 = vpop.f32.mrf.mxu1 }
 0x12d   :  { %v3514_v8 = vadd.f32 %v204_v7, %v3508_v4  ;;  %v3622_v7 = vld [vmem:[%s5379_s7 + $0x160] sm:$0xff] }
 0x12e   :  { %570 = vmatpush.msra.mxu2 %v3622_v7 }
 0x12f   :  { %5524 = vst [vmem:[#allocation14_spill] sm:$0xff] %v3514_v8 }
 0x132   :  { %v3537_v21 = vpop.f32.mrf.mxu2 }
 0x133   :  { %5533 = vst [vmem:[#allocation23_spill] sm:$0xff] %v3537_v21  ;;  %v3770_v21 = vld [vmem:[%s5379_s7 + $0x148] sm:$0xff] }
 0x134   :  { %v207_v9 = vpop.f32.mrf.mxu1  ;;  %5543 = vst [vmem:[#allocation33_spill] sm:$0xff] %v3770_v21 }
 0x135   :  { %v3517_v10 = vadd.f32 %v207_v9, %v3508_v4  ;;  %v3627_v9 = vld [vmem:[%s5379_s7 + $0x168] sm:$0xff] }
 0x136   :  { %590 = vmatpush.msrb.mxu3 %v3627_v9 }
 0x137   :  { %5525 = vst [vmem:[#allocation15_spill] sm:$0xff] %v3517_v10  ;;  %v3758_v10 = vld [vmem:[%s5379_s7 + $0x78] sm:$0xff] }
 0x138   :  { %5542 = vst [vmem:[#allocation32_spill] sm:$0xff] %v3758_v10 }
 0x13a   :  { %v3519_v11 = vpop.f32.mrf.mxu3 }
 0x13b   :  { %5526 = vst [vmem:[#allocation16_spill] sm:$0xff] %v3519_v11  ;;  %v447_v36 = vpop.f32.mrf.mxu2  ;;  %v3753_v11 = vld [vmem:[%s5379_s7 + $0x70] sm:$0xff] }
 0x13c   :  { %v210_v12 = vpop.f32.mrf.mxu1  ;;  %v448_v41 = vadd.f32 %v447_v36, %v3554_v33  ;;  %v3659_v36 = vld [vmem:[%s5379_s7 + $0x60] sm:$0xff] }
 0x13d   :  { %v3522_v13 = vadd.f32 %v210_v12, %v3508_v4 }
 0x13e   :  { %v490_v47 = vadd.f32 %v448_v41, %v234_v44  ;;  %v3681_v44 = vld [vmem:[%s5379_s7 + $0x108] sm:$0xff] }
 0x13f   :  { %5527 = vst [vmem:[#allocation17_spill] sm:$0xff] %v3522_v13  ;;  %v3737_v13 = vld [vmem:[%s5379_s7 + $0x170] sm:$0xff] }
 0x140   :  { %v2839_v55 = vmul.f32 -1.442695, %v490_v47  ;;  %v3688_v47 = vld [vmem:[%s5379_s7 + $0x30] sm:$0xff] }
 0x142   :  { %v3524_v14 = vpop.f32.mrf.mxu3 }
 0x143   :  { %5528 = vst [vmem:[#allocation18_spill] sm:$0xff] %v3524_v14  ;;  %v3744_v14 = vld [vmem:[%s5379_s7 + $0x178] sm:$0xff] }
 0x144   :  { %v213_v15 = vpop.f32.mrf.mxu1 }
 0x145   :  { %v3529_v17 = vadd.f32 %v213_v15, %v3508_v4  ;;  %v3635_v15 = vld [vmem:[%s5379_s7 + $0x90] sm:$0xff]  ;;  %v3844_v4 = vld [vmem:[%s5379_s7 + $0x80] sm:$0xff] }
 0x146   :  { %534 = vmatpush.msra.mxu0 %v3635_v15  ;;  %5555 = vst [vmem:[#allocation45_spill] sm:$0xff] %v3844_v4 }
 0x147   :  { %5530 = vst [vmem:[#allocation20_spill] sm:$0xff] %v3529_v17  ;;  %v3727_v17 = vld [vmem:[%s5379_s7 + $0xa0] sm:$0xff] }
 0x148   :  { %535 = vmatpush.msra.mxu0 %v3659_v36 }
 0x14a   :  { %v3531_v18 = vpop.f32.mrf.mxu3  ;;  %536 = vmatpush.msra.mxu0 %v3688_v47 }
 0x14b   :  { %5531 = vst [vmem:[#allocation21_spill] sm:$0xff] %v3531_v18  ;;  %v3732_v18 = vld [vmem:[%s5379_s7 + $0xa8] sm:$0xff] }
 0x14c   :  { %v427_v25 = vpop.f32.mrf.mxu1 }
 0x14d   :  { %v428_v28 = vadd.f32 %v427_v25, %v3547_v24  ;;  %v3640_v25 = vld [vmem:[%s5379_s7 + $0x98] sm:$0xff] }
 0x14e   :  { %554 = vmatpush.msra.mxu1 %v3640_v25 }
 0x14f   :  { %v470_v37 = vadd.f32 %v428_v28, %v193_v29  ;;  %v3647_v28 = vld [vmem:[%s5379_s7 + $0x130] sm:$0xff]  ;;  %v3652_v29 = vld [vmem:[%s5379_s7 + $0x138] sm:$0xff] }
 0x150   :  { %571 = vmatpush.msra.mxu2 %v3647_v28  ;;  %591 = vmatpush.msrb.mxu3 %v3652_v29 }
 0x151   :  { %v2838_v42 = vmul.f32 -1.442695, %v470_v37  ;;  %v3664_v37 = vld [vmem:[%s5379_s7 + $0x68] sm:$0xff] }
 0x152   :  { %v3535_v20 = vpop.f32.mrf.mxu3  ;;  %555 = vmatpush.msra.mxu1 %v3664_v37  ;;  %592 = vmatpush.msrb.mxu3 %v3681_v44 }
 0x153   :  { %2959 = vpow2.f32 %v2838_v42  ;;  %v3676_v42 = vld [vmem:[%s5379_s7 + $0x100] sm:$0xff] }
 0x154   :  { %2961 = vpow2.f32 %v2839_v55  ;;  %572 = vmatpush.msra.mxu2 %v3676_v42  ;;  %v3700_v55 = vld [vmem:[%s5379_s7 + $0xd0] sm:$0xff] }
 0x156   :  { %573 = vmatpush.msra.mxu2 %v3700_v55 }
 0x158   :  { %574 = vmatpush.msra.mxu2 %v3727_v17 }
 0x159   :  { %v2960_v56 = vpop.eup %2959 }
 0x15a   :  { %v3544_v23 = vpop.f32.mrf.mxu3  ;;  %v3593_v60 = vadd.f32 1.0, %v2960_v56  ;;  %v2962_v12 = vpop.eup %2961  ;;  %v3705_v56 = vld [vmem:[%s5379_s7 + $0xd8] sm:$0xff]  ;;  %575 = vmatpush.msra.mxu2 %v3753_v11 }
 0x15b   :  { %5534 = vst [vmem:[#allocation24_spill] sm:$0xff] %v3544_v23  ;;  %v3666_v40 = vadd.f32 1.0, %v2962_v12  ;;  %593 = vmatpush.msrb.mxu3 %v3705_v56  ;;  %v3714_v12 = vld [vmem:[%s5379_s7] sm:$0xff]  ;;  %v3817_v23 = vld [vmem:[%s5379_s7 + $0xe8] sm:$0xff] }
 0x15c   :  { %2963 = vrcp.f32 %v3593_v60  ;;  %537 = vmatpush.msra.mxu0 %v3714_v12  ;;  %5552 = vst [vmem:[#allocation42_spill] sm:$0xff] %v3817_v23  ;;  %vm480_vm3 = vweird.f32 %v3593_v60 }
 0x15d   :  { %2965 = vrcp.f32 %v3666_v40  ;;  %594 = vmatpush.msrb.mxu3 %v3732_v18  ;;  %vm500_vm7 = vweird.f32 %v3666_v40 }
 0x15e   :  { %610 = vmatpush.msrb.mxu0 %v3737_v13 }
 0x15f   :  { %595 = vmatpush.msrb.mxu3 %v3758_v10 }
 0x161   :  { %596 = vmatpush.msrb.mxu3 %v3780_v6 }
 0x162   :  { %v280_v35 = vpop.f32.mrf.mxu3 }
 0x163   :  { %v3557_v38 = vadd.f32 %v280_v35, %v3551_v31 }
 0x165   :  { %5537 = vst [vmem:[#allocation27_spill] sm:$0xff] %v3557_v38  ;;  %v3790_v38 = vld [vmem:[%s5379_s7 + $0x110] sm:$0xff] }
 0x166   :  { %5547 = vst [vmem:[#allocation37_spill] sm:$0xff] %v3790_v38 }
 0x16a   :  { %v283_v48 = vpop.f32.mrf.mxu3 }
 0x16b   :  { %v3564_v49 = vadd.f32 %v283_v48, %v3551_v31  ;;  %v3693_v48 = vld [vmem:[%s5379_s7 + $0x38] sm:$0xff] }
 0x16c   :  { %556 = vmatpush.msra.mxu1 %v3693_v48 }
 0x16d   :  { %5539 = vst [vmem:[#allocation29_spill] sm:$0xff] %v3564_v49  ;;  %v3775_v49 = vld [vmem:[%s5379_s7 + $0x40] sm:$0xff] }
 0x16e   :  { %5544 = vst [vmem:[#allocation34_spill] sm:$0xff] %v3775_v49  ;;  %576 = vmatpush.msra.mxu2 %v3775_v49 }
 0x170   :  { %577 = vmatpush.msra.mxu2 %v3800_v2 }
 0x172   :  { %v286_v57 = vpop.f32.mrf.mxu3  ;;  %708 = vmatpush.msrb.mxu2 %v3420_v34  ;;  %v3864_v34 = vld [vmem:[%s5379_s7 + $0x58] sm:$0xff] }
 0x173   :  { %v3591_v59 = vadd.f32 %v286_v57, %v3551_v31  ;;  %v3707_v57 = vpop.eup %2963  ;;  %5558 = vst [vmem:[#allocation48_spill] sm:$0xff] %v3864_v34 }
 0x174   :  { %v3819_v33 = vpop.eup %2965  ;;  %709 = vmatpush.msrb.mxu2 %v3438_v43  ;;  %vm481_vm2 = vweird.f32 %v3707_v57 }
 0x175   :  { %5540 = vst [vmem:[#allocation30_spill] sm:$0xff] %v3591_v59  ;;  %v3763_v59 = vld [vmem:[%s5379_s7 + $0x140] sm:$0xff]  ;;  %vm482_vm4 = vmor %vm480_vm3, %vm481_vm2  ;;  %vm501_vm6 = vweird.f32 %v3819_v33 }
 0x176   :  { %611 = vmatpush.msrb.mxu0 %v3763_v59  ;;  %710 = vmatpush.msrb.mxu2 %v3446_v45  ;;  %vm502_vm8 = vmor %vm500_vm7, %vm501_vm6 }
 0x178   :  { %612 = vmatpush.msrb.mxu0 %v3790_v38  ;;  %711 = vmatpush.msrb.mxu2 %v3452_v46 }
 0x17a   :  { %v289_v35 = vpop.f32.mrf.mxu3 }
 0x17b   :  { %v3669_v41 = vadd.f32 %v289_v35, %v3551_v31  ;;  %v3719_v35 = vld [vmem:[%s5379_s7 + $0x8] sm:$0xff] }
 0x17c   :  { %557 = vmatpush.msra.mxu1 %v3719_v35 }
 0x17d   :  { %5541 = vst [vmem:[#allocation31_spill] sm:$0xff] %v3669_v41  ;;  %v476_v41 = vmul.f32 %v3707_v57, %v3593_v60 }
 0x17e   :  { %630 = vmatpush.msrb.mxu1 %v3744_v14 }
 0x17f   :  { %v477_v24 = vsub.f32 1.0, %v476_v41  ;;  %v496_v41 = vmul.f32 %v3819_v33, %v3666_v40 }
 0x180   :  { %631 = vmatpush.msrb.mxu1 %v3770_v21 }
 0x182   :  { %v292_v8 = vpop.f32.mrf.mxu3  ;;  %632 = vmatpush.msrb.mxu1 %v3795_v16 }
 0x183   :  { %v3783_v19 = vadd.f32 %v292_v8, %v3551_v31  ;;  %v3807_v8 = vld [vmem:[%s5379_s7 + $0x18] sm:$0xff] }
 0x184   :  { %5550 = vst [vmem:[#allocation40_spill] sm:$0xff] %v3807_v8  ;;  %597 = vmatpush.msrb.mxu3 %v3807_v8  ;;  %633 = vmatpush.msrb.mxu1 %v3817_v23  ;;  %v3849_v8 = vld [vmem:[%s5379_s7 + $0x88] sm:$0xff] }
 0x185   :  { %5546 = vst [vmem:[#allocation36_spill] sm:$0xff] %v3783_v19  ;;  %v3812_v19 = vld [vmem:[%s5379_s7 + $0xe0] sm:$0xff] }
 0x186   :  { %5551 = vst [vmem:[#allocation41_spill] sm:$0xff] %v3812_v19  ;;  %613 = vmatpush.msrb.mxu0 %v3812_v19  ;;  %728 = vmatpush.msra.mxu3 %v3390_v26  ;;  %v478_v19 = vmul.f32 %v3707_v57, %v477_v24  ;;  %v3859_v26 = vld [vmem:[%s5379_s7 + $0x50] sm:$0xff] }
 0x187   :  { %5556 = vst [vmem:[#allocation46_spill] sm:$0xff] %v3849_v8  ;;  %634 = vmatpush.msrb.mxu1 %v3833_v1  ;;  %v497_v1 = vsub.f32 1.0, %v496_v41  ;;  %v486_v41 = vand.u32 2147483648, %v3593_v60 }
 0x188   :  { %614 = vmatpush.msrb.mxu0 %v3828_v39  ;;  %729 = vmatpush.msra.mxu3 %v3396_v27  ;;  %5557 = vst [vmem:[#allocation47_spill] sm:$0xff] %v3859_v26  ;;  %v3876_v27 = vld [vmem:[%s5379_s7 + $0x20] sm:$0xff]  ;;  %v3881_v39 = vld [vmem:[%s5379_s7 + $0x28] sm:$0xff] }
 0x189   :  { %635 = vmatpush.msrb.mxu1 %v3849_v8  ;;  %5560 = vst [vmem:[#allocation50_spill] sm:$0xff] %v3876_v27  ;;  %v487_v46 = vor.u32 1.1754944e-38, %v486_v41 }
 0x18a   :  { %v295_v23 = vpop.f32.mrf.mxu3  ;;  %615 = vmatpush.msrb.mxu0 %v3844_v4  ;;  %730 = vmatpush.msra.mxu3 %v3403_v30  ;;  %5561 = vst [vmem:[#allocation51_spill] sm:$0xff] %v3881_v39  ;;  %v484_v30 = vand.u32 2147483647, %v3593_v60  ;;  %v506_v60 = vand.u32 2147483648, %v3666_v40 }
 0x18b   :  { %v3867_v24 = vadd.f32 %v295_v23, %v3551_v31  ;;  %v479_v23 = vadd.f32 %v3707_v57, %v478_v19  ;;  %636 = vmatpush.msrb.mxu1 %v3864_v34  ;;  %v498_v19 = vmul.f32 %v3819_v33, %v497_v1  ;;  %v504_v1 = vand.u32 2147483647, %v3666_v40  ;;  %v5567_v40 = vld [vmem:[#allocation4_spill] sm:$0xff] }
 0x18c   :  { %616 = vmatpush.msrb.mxu0 %v3859_v26  ;;  %731 = vmatpush.msra.mxu3 %v3409_v32  ;;  %vm485_vm5 = vcmp.eq.f32.partialorder %v484_v30, 8.507059e+37  ;;  %v507_v30 = vor.u32 1.1754944e-38, %v506_v60  ;;  %v5570_v60 = vld [vmem:[#allocation5_spill] sm:$0xff] }
 0x18d   :  { %5559 = vst [vmem:[#allocation49_spill] sm:$0xff] %v3867_v24  ;;  %v3891_v24 = vperm.slane %v3542_v22, 2  ;;  %637 = vmatpush.msrb.mxu1 %v3881_v39  ;;  %v483_v34 = vsel %vm482_vm4, %v3707_v57, %v479_v23  ;;  %v499_v8 = vadd.f32 %v3819_v33, %v498_v19  ;;  %v275_v39 = vadd.f32 %v3535_v20, %v3551_v31  ;;  %v5564_v20 = vld [vmem:[#allocation8_spill] sm:$0xff] }
 0x18e   :  { %617 = vmatpush.msrb.mxu0 %v3876_v27  ;;  %v488_v22 = vsel %vm485_vm5, %v487_v46, %v483_v34  ;;  %vm505_vm9 = vcmp.eq.f32.partialorder %v504_v1, 8.507059e+37  ;;  %v5571_v1 = vld [vmem:[#allocation46_spill] sm:$0xff] }
 0x18f   :  { %5562 = vst [vmem:[#allocation52_spill] sm:$0xff] %v3891_v24 }
 0x192   :  { %v467_v26 = vpop.f32.mrf.mxu3 }
 0x193   :  { %v468_v32 = vadd.f32 %v467_v26, %v3891_v24  ;;  %v503_v26 = vsel %vm502_vm8, %v3819_v33, %v499_v8  ;;  %v5565_v33 = vld [vmem:[#allocation41_spill] sm:$0xff]  ;;  %v5568_v8 = vld [vmem:[#allocation43_spill] sm:$0xff] }
 0x194   :  { %v508_v34 = vsel %vm505_vm9, %v507_v30, %v503_v26  ;;  %v5573_v26 = vld [vmem:[#allocation9_spill] sm:$0xff]  ;;  %v5574_v30 = vld [vmem:[#allocation47_spill] sm:$0xff] }
 0x195   :  { %v510_v27 = vmul.f32 %v488_v22, %v468_v32  ;;  %v513_v46 = vsub.f32 1.0, %v508_v34  ;;  %v515_v19 = vmul.f32 0.0, %v508_v34  ;;  %v5569_v22 = vld [vmem:[#allocation44_spill] sm:$0xff] }
 0x196   :  { %v5575_v34 = vld [vmem:[#allocation48_spill] sm:$0xff] }
 0x197   :  { %v511_v57 = vadd.f32 %v510_v27, %v275_v39  ;;  %v5563_v27 = vld [vmem:[#allocation40_spill] sm:$0xff]  ;;  %v5566_v39 = vld [vmem:[#allocation42_spill] sm:$0xff] }
 0x199   :  { %2967 = vtanh.f32 %v511_v57  ;;  %v5572_v57 = vld [vmem:[#allocation6_spill] sm:$0xff] }
 0x19f   :  { %v2968_v23 = vpop.eup %2967 }
 0x1a0   :  { %v514_v41 = vmul.f32 %v2968_v23, %v513_v46  ;;  %v5577_v46 = vld [vmem:[#allocation50_spill] sm:$0xff]  ;;  %v5578_v23 = vld [vmem:[#allocation51_spill] sm:$0xff] }
 0x1a2   :  { %v3908_v24 = vadd.f32 %v515_v19, %v514_v41  ;;  %v236_v41 = vpop.f32.mrf.mxu0  ;;  %v390_v19 = vld [vmem:[%s5380_s8] sm:$0x3f]  ;;  %s3240_s8 = smov 32  }
 0x1a4   :  { %v517_v32 = vsel %vm150_vm1, %v3908_v24, 0.0 }
 0x1a5   :  { %2840 = vmatmul.msk.f32.vlgmr.msra.gmra.mxu0 %vm518_vm10, %v517_v32  ;;  %2841 = vmatmul.msk.f32.vlgmr.msra.gmra.mxu1 %vm518_vm10, %v517_v32 }
 0x1a6   :  { %2842 = vmatmul.msk.f32.vlgmr.msra.gmra.mxu2 %vm518_vm10, %v517_v32  ;;  %2843 = vmatmul.msk.f32.vlgmr.msrb.gmra.mxu3 %vm518_vm10, %v517_v32 }
 0x1a7   :  { %748 = vmatpush.msra.mxu1 %v3463_v53  ;;  %819 = vmatpush.msra.mxu2 %v3569_v50 }
 0x1a8   :  { %839 = vmatpush.msrb.mxu3 %v3574_v51  ;;  %859 = vmatpush.msra.mxu0 %v3622_v7 }
 0x1a9   :  { %749 = vmatpush.msra.mxu1 %v3474_v58  ;;  %820 = vmatpush.msra.mxu2 %v3579_v52 }
 0x1aa   :  { %840 = vmatpush.msrb.mxu3 %v3586_v54  ;;  %860 = vmatpush.msra.mxu0 %v3647_v28 }
 0x1ab   :  { %750 = vmatpush.msra.mxu1 %v3485_v62  ;;  %821 = vmatpush.msra.mxu2 %v3598_v61 }
 0x1ac   :  { %841 = vmatpush.msrb.mxu3 %v3603_v0  ;;  %861 = vmatpush.msra.mxu0 %v3676_v42 }
 0x1ad   :  { %2844 = vmatmul.msk.f32.vlgmr.msrb.gmra.mxu0 %vm518_vm10, %v517_v32  ;;  %2845 = vmatmul.msk.f32.vlgmr.msrb.gmra.mxu1 %vm518_vm10, %v517_v32  ;;  %v3987_v32 = vperm.slane %v390_v19, 0 }
 0x1ae   :  { %2848 = vmatmul.msk.f32.vlgmr.msrb.gmra.mxu2 %vm150_vm1, %v3908_v24  ;;  %2849 = vmatmul.msk.f32.vlgmr.msra.gmra.mxu3 %vm150_vm1, %v3908_v24 }
 0x1af   :  { %751 = vmatpush.msra.mxu1 %v3493_v63  ;;  %822 = vmatpush.msra.mxu2 %v3610_v3  ;;  %5579 = vst [vmem:[#allocation8_spill] sm:$0xff] %v3987_v32 }
 0x1b0   :  { %842 = vmatpush.msrb.mxu3 %v3615_v5  ;;  %862 = vmatpush.msra.mxu0 %v3700_v55 }
 0x1b1   :  { %879 = vmatpush.msrb.mxu1 %v3627_v9  ;;  %823 = vmatpush.msra.mxu2 %v3635_v15 }
 0x1b2   :  { %843 = vmatpush.msrb.mxu3 %v3640_v25  ;;  %863 = vmatpush.msra.mxu0 %v3727_v17 }
 0x1b3   :  { %880 = vmatpush.msrb.mxu1 %v3652_v29  ;;  %824 = vmatpush.msra.mxu2 %v3659_v36 }
 0x1b4   :  { %844 = vmatpush.msrb.mxu3 %v3664_v37  ;;  %864 = vmatpush.msra.mxu0 %v3753_v11 }
 0x1b5   :  { %881 = vmatpush.msrb.mxu1 %v3681_v44  ;;  %825 = vmatpush.msra.mxu2 %v3688_v47 }
 0x1b6   :  { %2850 = vmatmul.msk.f32.vlgmr.msra.gmra.mxu1 %vm150_vm1, %v3908_v24  ;;  %845 = vmatpush.msrb.mxu3 %v3693_v48 }
 0x1b7   :  { %882 = vmatpush.msrb.mxu1 %v3705_v56  ;;  %826 = vmatpush.msra.mxu2 %v3714_v12 }
 0x1b8   :  { %846 = vmatpush.msrb.mxu3 %v3719_v35  ;;  %865 = vmatpush.msra.mxu0 %v3775_v49 }
 0x1b9   :  { %883 = vmatpush.msrb.mxu1 %v3732_v18  ;;  %899 = vmatpush.msrb.mxu2 %v3737_v13 }
 0x1ba   :  { %919 = vmatpush.msra.mxu3 %v3744_v14  ;;  %866 = vmatpush.msra.mxu0 %v3800_v2 }
 0x1bb   :  { %884 = vmatpush.msrb.mxu1 %v3758_v10  ;;  %900 = vmatpush.msrb.mxu2 %v3763_v59 }
 0x1bc   :  { %920 = vmatpush.msra.mxu3 %v3770_v21  ;;  %997 = vmatpush.msrb.mxu0 %v5564_v20  ;;  %v3989_v20 = vperm.slane %v390_v19, 3 }
 0x1bd   :  { %885 = vmatpush.msrb.mxu1 %v3780_v6  ;;  %901 = vmatpush.msrb.mxu2 %v3790_v38  ;;  %v5584_v6 = vld [vmem:[#allocation10_spill] sm:$0xff]  ;;  %v5585_v38 = vld [vmem:[#allocation28_spill] sm:$0xff] }
 0x1be   :  { %921 = vmatpush.msra.mxu3 %v3795_v16  ;;  %998 = vmatpush.msrb.mxu0 %v3438_v43  ;;  %v5576_v43 = vld [vmem:[#allocation7_spill] sm:$0xff]  ;;  %5580 = vst [vmem:[#allocation4_spill] sm:$0xff] %v3989_v20  ;;  %v5583_v16 = vld [vmem:[#allocation12_spill] sm:$0xff] }
 0x1bf   :  { %886 = vmatpush.msrb.mxu1 %v5563_v27  ;;  %902 = vmatpush.msrb.mxu2 %v5565_v33  ;;  %v196_v2 = vadd.f32 %v5584_v6, %v5583_v16 }
 0x1c0   :  { %922 = vmatpush.msra.mxu3 %v5566_v39  ;;  %999 = vmatpush.msrb.mxu0 %v3446_v45 }
 0x1c1   :  { %1017 = vmatpush.msra.mxu1 %v5567_v40  ;;  %903 = vmatpush.msrb.mxu2 %v5568_v8  ;;  %v3991_v40 = vperm.slane %v390_v19, 1 }
 0x1c2   :  { %923 = vmatpush.msra.mxu3 %v5569_v22  ;;  %1000 = vmatpush.msrb.mxu0 %v5573_v26 }
 0x1c3   :  { %1018 = vmatpush.msra.mxu1 %v5570_v60  ;;  %904 = vmatpush.msrb.mxu2 %v3844_v4  ;;  %5581 = vst [vmem:[#allocation5_spill] sm:$0xff] %v3991_v40  ;;  %v3993_v60 = vperm.slane %v390_v19, 4 }
 0x1c4   :  { %924 = vmatpush.msra.mxu3 %v5571_v1 }
 0x1c5   :  { %1019 = vmatpush.msra.mxu1 %v5572_v57  ;;  %905 = vmatpush.msrb.mxu2 %v5574_v30  ;;  %5582 = vst [vmem:[#allocation6_spill] sm:$0xff] %v3993_v60 }
 0x1c6   :  { %925 = vmatpush.msra.mxu3 %v5575_v34 }
 0x1c7   :  { %1020 = vmatpush.msra.mxu1 %v5576_v43  ;;  %906 = vmatpush.msrb.mxu2 %v5577_v46 }
 0x1c8   :  { %926 = vmatpush.msra.mxu3 %v5578_v23 }
 0x222   :  { %v539_v45 = vpop.f32.mrf.mxu0  ;;  %v559_v57 = vpop.f32.mrf.mxu1 }
 0x223   :  { %v540_v23 = vadd.f32 %v539_v45, %v3987_v32  ;;  %v560_v30 = vadd.f32 %v559_v57, %v3991_v40  ;;  %v237_v45 = vadd.f32 %v236_v41, %v5585_v38  ;;  %v5586_v32 = vld [vmem:[#allocation25_spill] sm:$0xff] }
 0x229   :  { %v3995_v26 = vpop.f32.mrf.mxu2  ;;  %v599_v43 = vpop.f32.mrf.mxu3 }
 0x22a   :  { %v600_v46 = vadd.f32 %v599_v43, %v3989_v20  ;;  %v619_v34 = vpop.f32.mrf.mxu0  ;;  %v5587_v20 = vld [vmem:[#allocation26_spill] sm:$0xff] }
 0x22b   :  { %v620_v1 = vadd.f32 %v619_v34, %v3993_v60 }
 0x22c   :  { %v642_v4 = vadd.f32 %v600_v46, %v540_v23 }
 0x22d   :  { %v662_v22 = vadd.f32 %v620_v1, %v560_v30 }
 0x22e   :  { %v2846_v8 = vmul.f32 -1.442695, %v642_v4 }
 0x22f   :  { %v2847_v39 = vmul.f32 -1.442695, %v662_v22 }
 0x230   :  { %2969 = vpow2.f32 %v2846_v8 }
 0x231   :  { %2971 = vpow2.f32 %v2847_v39  ;;  %v713_v27 = vpop.f32.mrf.mxu2  ;;  %v733_v33 = vpop.f32.mrf.mxu3 }
 0x232   :  { %v714_v43 = vadd.f32 %v713_v27, %v5586_v32  ;;  %v734_v21 = vadd.f32 %v733_v33, %v5587_v20  ;;  %v4008_v33 = vperm.slane %v390_v19, 5 }
 0x234   :  { %v756_v57 = vadd.f32 %v714_v43, %v196_v2  ;;  %v776_v40 = vadd.f32 %v734_v21, %v237_v45  ;;  %5588 = vst [vmem:[#allocation9_spill] sm:$0xff] %v4008_v33  ;;  %v639_v45 = vpop.f32.mrf.mxu1 }
 0x236   :  { %v2970_v34 = vpop.eup %2969  ;;  %v2851_v46 = vmul.f32 -1.442695, %v756_v57  ;;  %v2852_v22 = vmul.f32 -1.442695, %v776_v40 }
 0x237   :  { %v2972_v1 = vpop.eup %2971  ;;  %v646_v4 = vadd.f32 1.0, %v2970_v34 }
 0x238   :  { %v666_v8 = vadd.f32 1.0, %v2972_v1  ;;  %2973 = vpow2.f32 %v2851_v46  ;;  %v4011_v1 = vperm.slane %v390_v19, 2 }
 0x239   :  { %2975 = vrcp.f32 %v646_v4  ;;  %v658_v40 = vand.u32 2147483648, %v646_v4  ;;  %v656_v34 = vand.u32 2147483647, %v646_v4  ;;  %vm652_vm12 = vweird.f32 %v646_v4 }
 0x23a   :  { %2977 = vrcp.f32 %v666_v8  ;;  %v580_v16 = vadd.f32 %v3995_v26, %v4011_v1  ;;  %v678_v10 = vand.u32 2147483648, %v666_v8  ;;  %vm672_vm0 = vweird.f32 %v666_v8 }
 0x23b   :  { %2979 = vpow2.f32 %v2852_v22  ;;  %vm657_vm14 = vcmp.eq.f32.partialorder %v656_v34, 8.507059e+37 }
 0x23c   :  { %v679_v26 = vor.u32 1.1754944e-38, %v678_v10 }
 0x23e   :  { %v2974_v39 = vpop.eup %2973 }
 0x23f   :  { %v2976_v6 = vpop.eup %2975  ;;  %v760_v30 = vadd.f32 1.0, %v2974_v39 }
 0x240   :  { %v2978_v23 = vpop.eup %2977  ;;  %v648_v41 = vmul.f32 %v2976_v6, %v646_v4  ;;  %vm653_vm11 = vweird.f32 %v2976_v6 }
 0x241   :  { %v2980_v27 = vpop.eup %2979  ;;  %v668_v60 = vmul.f32 %v2978_v23, %v666_v8  ;;  %2981 = vrcp.f32 %v760_v30  ;;  %vm654_vm13 = vmor %vm652_vm12, %vm653_vm11  ;;  %vm673_vm15 = vweird.f32 %v2978_v23  ;;  %vm766_vm4 = vweird.f32 %v760_v30 }
 0x242   :  { %v649_v2 = vsub.f32 1.0, %v648_v41  ;;  %v4006_v21 = vadd.f32 1.0, %v2980_v27  ;;  %v659_v41 = vor.u32 1.1754944e-38, %v658_v40  ;;  %v640_v27 = vadd.f32 %v639_v45, %v4008_v33  ;;  %vm4017_vm3 = vmor %vm672_vm0, %vm673_vm15  ;;  %v5592_v33 = vld [vmem:[#allocation24_spill] sm:$0xff] }
 0x243   :  { %v669_v43 = vsub.f32 1.0, %v668_v60  ;;  %v676_v40 = vand.u32 2147483647, %v666_v8 }
 0x244   :  { %v650_v57 = vmul.f32 %v2976_v6, %v649_v2  ;;  %2983 = vrcp.f32 %v4006_v21  ;;  %vm786_vm9 = vweird.f32 %v4006_v21  ;;  %v790_v10 = vand.u32 2147483647, %v4006_v21 }
 0x245   :  { %v670_v46 = vmul.f32 %v2978_v23, %v669_v43  ;;  %vm677_vm6 = vcmp.eq.f32.partialorder %v676_v40, 8.507059e+37 }
 0x246   :  { %v651_v22 = vadd.f32 %v2976_v6, %v650_v57  ;;  %v772_v57 = vand.u32 2147483648, %v760_v30  ;;  %vm791_vm12 = vcmp.eq.f32.partialorder %v790_v10, 8.507059e+37 }
 0x247   :  { %v2982_v39 = vpop.eup %2981  ;;  %v671_v60 = vadd.f32 %v2978_v23, %v670_v46  ;;  %v753_v46 = vpop.f32.mrf.mxu1 }
 0x248   :  { %v655_v20 = vsel %vm654_vm13, %v2976_v6, %v651_v22  ;;  %v762_v32 = vmul.f32 %v2982_v39, %v760_v30  ;;  %vm767_vm2 = vweird.f32 %v2982_v39  ;;  %v770_v6 = vand.u32 2147483647, %v760_v30 }
 0x249   :  { %v660_v38 = vsel %vm657_vm14, %v659_v41, %v655_v20  ;;  %vm768_vm5 = vmor %vm766_vm4, %vm767_vm2  ;;  %v773_v8 = vor.u32 1.1754944e-38, %v772_v57  ;;  %v278_v20 = vadd.f32 %v5592_v33, %v3551_v31 }
 0x24a   :  { %v2984_v2 = vpop.eup %2983  ;;  %v682_v43 = vmul.f32 %v660_v38, %v640_v27  ;;  %v763_v19 = vsub.f32 1.0, %v762_v32  ;;  %v675_v38 = vsel %vm4017_vm3, %v2978_v23, %v671_v60  ;;  %vm771_vm7 = vcmp.eq.f32.partialorder %v770_v6, 8.507059e+37 }
 0x24b   :  { %v782_v4 = vmul.f32 %v2984_v2, %v4006_v21  ;;  %vm787_vm8 = vweird.f32 %v2984_v2 }
 0x24c   :  { %v683_v49 = vadd.f32 %v682_v43, %v580_v16  ;;  %v764_v45 = vmul.f32 %v2982_v39, %v763_v19  ;;  %v5591_v16 = vld [vmem:[#allocation52_spill] sm:$0xff]  ;;  %v680_v43 = vsel %vm677_vm6, %v679_v26, %v675_v38  ;;  %vm788_vm11 = vmor %vm786_vm9, %vm787_vm8 }
 0x24d   :  { %v783_v34 = vsub.f32 1.0, %v782_v4  ;;  %v754_v41 = vadd.f32 %v753_v46, %v5591_v16  ;;  %v685_v30 = vsub.f32 1.0, %v680_v43 }
 0x24e   :  { %2985 = vtanh.f32 %v683_v49  ;;  %v765_v32 = vadd.f32 %v2982_v39, %v764_v45  ;;  %v792_v49 = vand.u32 2147483648, %v4006_v21  ;;  %v687_v45 = vmul.f32 0.0, %v680_v43  ;;  %v5623_v43 = vld [vmem:[#allocation28_spill] sm:$0xff] }
 0x24f   :  { %v784_v22 = vmul.f32 %v2984_v2, %v783_v34 }
 0x250   :  { %v769_v27 = vsel %vm768_vm5, %v2982_v39, %v765_v32  ;;  %v793_v6 = vor.u32 1.1754944e-38, %v792_v49 }
 0x251   :  { %v774_v19 = vsel %vm771_vm7, %v773_v8, %v769_v27  ;;  %v785_v4 = vadd.f32 %v2984_v2, %v784_v22  ;;  %v5621_v8 = vld [vmem:[#allocation12_spill] sm:$0xff] }
 0x252   :  { %v796_v23 = vmul.f32 %v774_v19, %v754_v41  ;;  %v5622_v41 = vld [vmem:[#allocation11_spill] sm:$0xff] }
 0x253   :  { %v789_v39 = vsel %vm788_vm11, %v2984_v2, %v785_v4  ;;  %v199_v27 = vadd.f32 %v5622_v41, %v5621_v8  ;;  %v5624_v19 = vld [vmem:[#allocation19_spill] sm:$0xff] }
 0x254   :  { %v2986_v60 = vpop.eup %2985  ;;  %v797_v57 = vadd.f32 %v796_v23, %v278_v20  ;;  %v794_v31 = vsel %vm791_vm12, %v793_v6, %v789_v39  ;;  %v240_v4 = vadd.f32 %v5624_v19, %v5623_v43  ;;  %v5625_v20 = vld [vmem:[#allocation25_spill] sm:$0xff]  ;;  %v5626_v23 = vld [vmem:[#allocation26_spill] sm:$0xff] }
 0x255   :  { %v686_v40 = vmul.f32 %v2986_v60, %v685_v30  ;;  %v799_v21 = vsub.f32 1.0, %v794_v31  ;;  %v801_v2 = vmul.f32 %v794_v31, %v3908_v24  ;;  %v5627_v31 = vld [vmem:[#allocation5_spill] sm:$0xff] }
 0x256   :  { %2987 = vtanh.f32 %v797_v57  ;;  %v5629_v19 = vld [vmem:[#allocation9_spill] sm:$0xff] }
 0x257   :  { %v4029_v34 = vadd.f32 %v687_v45, %v686_v40 }
 0x259   :  { %804 = vrot.lane.b32.xlu0 %v4029_v34, %s3240_s8  ;;  %689 = vst.msk [vmem:[#allocation3] sm:$0xff] %vm150_vm1, %v4029_v34 }
 0x25c   :  { %v2988_v33 = vpop.eup %2987 }
 0x25d   :  { %v800_v46 = vmul.f32 %v2988_v33, %v799_v21  ;;  %v5628_v33 = vld [vmem:[#allocation6_spill] sm:$0xff] }
 0x25f   :  { %v4036_v38 = vadd.f32 %v801_v2, %v800_v46 }
 0x2cb   :  { %v805_v32 = vpop.permute.xlu0 %804 }
 0x2cc   :  { %v807_v26 = vsel %vm150_vm1, %v4036_v38, %v805_v32 }
 0x2cd   :  { %2853 = vmatmul.msk.f32.vlgmr.msra.gmra.mxu2 %vm518_vm10, %v807_v26  ;;  %2854 = vmatmul.msk.f32.vlgmr.msrb.gmra.mxu3 %vm518_vm10, %v807_v26 }
 0x2ce   :  { %2855 = vmatmul.msk.f32.vlgmr.msra.gmra.mxu0 %vm518_vm10, %v807_v26  ;;  %2856 = vmatmul.msk.f32.vlgmr.msrb.gmra.mxu1 %vm518_vm10, %v807_v26 }
 0x2cf   :  { %1037 = vmatpush.msra.mxu0 %v3463_v53  ;;  %1108 = vmatpush.msrb.mxu1 %v3569_v50  ;;  %v5593_v53 = vld [vmem:[#allocation34_spill] sm:$0xff] }
 0x2d0   :  { %1128 = vmatpush.msra.mxu2 %v3574_v51  ;;  %1148 = vmatpush.msrb.mxu3 %v3622_v7  ;;  %v5599_v50 = vld [vmem:[#allocation38_spill] sm:$0xff]  ;;  %v4127_v7 = vld [vmem:[%s5376_s5 + $0x18] sm:$0xff] }
 0x2d1   :  { %1038 = vmatpush.msra.mxu0 %v3474_v58  ;;  %1109 = vmatpush.msrb.mxu1 %v3579_v52  ;;  %v5594_v58 = vld [vmem:[#allocation32_spill] sm:$0xff]  ;;  %v5603_v51 = vld [vmem:[#allocation42_spill] sm:$0xff]  ;;  %v5604_v52 = vld [vmem:[#allocation43_spill] sm:$0xff] }
 0x2d2   :  { %1129 = vmatpush.msra.mxu2 %v3586_v54  ;;  %1149 = vmatpush.msrb.mxu3 %v3647_v28  ;;  %v4106_v54 = vld [vmem:[%s5376_s5 + $0x50] sm:$0xff]  ;;  %5611 = vst [vmem:[#allocation32_spill] sm:$0xff] %v4127_v7  ;;  %v4141_v28 = vld [vmem:[%s5376_s5] sm:$0xff] }
 0x2d3   :  { %1039 = vmatpush.msra.mxu0 %v3485_v62  ;;  %1110 = vmatpush.msrb.mxu1 %v3598_v61  ;;  %v5595_v62 = vld [vmem:[#allocation33_spill] sm:$0xff]  ;;  %5605 = vst [vmem:[#allocation10_spill] sm:$0xff] %v4106_v54  ;;  %v4113_v61 = vld [vmem:[%s5376_s5 + $0x30] sm:$0xff] }
 0x2d4   :  { %1130 = vmatpush.msra.mxu2 %v3603_v0  ;;  %1150 = vmatpush.msrb.mxu3 %v3676_v42  ;;  %5607 = vst [vmem:[#allocation24_spill] sm:$0xff] %v4113_v61  ;;  %v5608_v0 = vld [vmem:[#allocation45_spill] sm:$0xff] }
 0x2d5   :  { %2857 = vmatmul.msk.f32.vlgmr.msrb.gmra.mxu2 %vm518_vm10, %v807_v26  ;;  %2858 = vmatmul.msk.f32.vlgmr.msra.gmra.mxu3 %vm518_vm10, %v807_v26 }
 0x2d6   :  { %2861 = vmatmul.msk.f32.vlgmr.msrb.gmra.mxu0 %vm150_vm1, %v4036_v38  ;;  %2862 = vmatmul.msk.f32.vlgmr.msra.gmra.mxu1 %vm150_vm1, %v4036_v38 }
 0x2d7   :  { %1040 = vmatpush.msra.mxu0 %v3493_v63  ;;  %1111 = vmatpush.msrb.mxu1 %v3610_v3  ;;  %v5596_v63 = vld [vmem:[#allocation37_spill] sm:$0xff]  ;;  %v4120_v3 = vld [vmem:[%s5376_s5 + $0x38] sm:$0xff] }
 0x2d8   :  { %1131 = vmatpush.msra.mxu2 %v3615_v5  ;;  %1151 = vmatpush.msrb.mxu3 %v3700_v55  ;;  %5609 = vst [vmem:[#allocation34_spill] sm:$0xff] %v4120_v3  ;;  %v5610_v5 = vld [vmem:[#allocation46_spill] sm:$0xff] }
 0x2d9   :  { %1168 = vmatpush.msrb.mxu0 %v3627_v9  ;;  %1112 = vmatpush.msrb.mxu1 %v3635_v15  ;;  %v5612_v9 = vld [vmem:[#allocation47_spill] sm:$0xff]  ;;  %v4134_v15 = vld [vmem:[%s5376_s5 + $0x20] sm:$0xff]  ;;  %5615 = vst [vmem:[#allocation37_spill] sm:$0xff] %v4141_v28 }
 0x2da   :  { %1132 = vmatpush.msra.mxu2 %v3640_v25  ;;  %1152 = vmatpush.msrb.mxu3 %v3727_v17  ;;  %v5598_v17 = vld [vmem:[#allocation35_spill] sm:$0xff]  ;;  %5613 = vst [vmem:[#allocation33_spill] sm:$0xff] %v4134_v15  ;;  %v5614_v25 = vld [vmem:[#allocation48_spill] sm:$0xff] }
 0x2db   :  { %1169 = vmatpush.msrb.mxu0 %v3652_v29  ;;  %1113 = vmatpush.msrb.mxu1 %v3659_v36  ;;  %v5616_v29 = vld [vmem:[#allocation50_spill] sm:$0xff]  ;;  %v4148_v36 = vld [vmem:[%s5376_s5 + $0x8] sm:$0xff] }
 0x2dc   :  { %1133 = vmatpush.msra.mxu2 %v3664_v37  ;;  %1153 = vmatpush.msrb.mxu3 %v3753_v11  ;;  %v5597_v11 = vld [vmem:[#allocation39_spill] sm:$0xff] }
 0x2dd   :  { %1170 = vmatpush.msrb.mxu0 %v3681_v44  ;;  %1114 = vmatpush.msrb.mxu1 %v3688_v47  ;;  %5617 = vst [vmem:[#allocation39_spill] sm:$0xff] %v4148_v36  ;;  %v5618_v37 = vld [vmem:[#allocation51_spill] sm:$0xff] }
 0x2de   :  { %2863 = vmatmul.msk.f32.vlgmr.msra.gmra.mxu0 %vm150_vm1, %v4036_v38  ;;  %1134 = vmatpush.msra.mxu2 %v3693_v48  ;;  %v5619_v48 = vld [vmem:[#allocation4_spill] sm:$0xff] }
 0x2df   :  { %1171 = vmatpush.msrb.mxu0 %v3705_v56  ;;  %1115 = vmatpush.msrb.mxu1 %v3714_v12  ;;  %v5620_v56 = vld [vmem:[#allocation8_spill] sm:$0xff] }
 0x2e0   :  { %1135 = vmatpush.msra.mxu2 %v3719_v35  ;;  %1154 = vmatpush.msrb.mxu3 %v5593_v53 }
 0x2e1   :  { %1188 = vmatpush.msra.mxu1 %v3737_v13  ;;  %1172 = vmatpush.msrb.mxu0 %v3732_v18  ;;  %v5600_v13 = vld [vmem:[#allocation41_spill] sm:$0xff]  ;;  %v5602_v18 = vld [vmem:[#allocation40_spill] sm:$0xff] }
 0x2e2   :  { %1208 = vmatpush.msrb.mxu2 %v3744_v14  ;;  %1155 = vmatpush.msrb.mxu3 %v5597_v11  ;;  %v4097_v14 = vld [vmem:[%s5376_s5 + $0x48] sm:$0xff] }
 0x2e3   :  { %1189 = vmatpush.msra.mxu1 %v3763_v59  ;;  %1173 = vmatpush.msrb.mxu0 %v5594_v58  ;;  %5601 = vst [vmem:[#allocation7_spill] sm:$0xff] %v4097_v14  ;;  %v5606_v59 = vld [vmem:[#allocation44_spill] sm:$0xff] }
 0x2e4   :  { %1209 = vmatpush.msrb.mxu2 %v5595_v62  ;;  %1286 = vmatpush.msra.mxu3 %v4097_v14 }
 0x2e5   :  { %1190 = vmatpush.msra.mxu1 %v5596_v63  ;;  %1174 = vmatpush.msrb.mxu0 %v5598_v17 }
 0x2e6   :  { %1210 = vmatpush.msrb.mxu2 %v5599_v50  ;;  %1287 = vmatpush.msra.mxu3 %v4113_v61 }
 0x2e7   :  { %1191 = vmatpush.msra.mxu1 %v5600_v13  ;;  %1175 = vmatpush.msrb.mxu0 %v5602_v18 }
 0x2e8   :  { %1211 = vmatpush.msrb.mxu2 %v5603_v51  ;;  %1288 = vmatpush.msra.mxu3 %v4127_v7 }
 0x2e9   :  { %1192 = vmatpush.msra.mxu1 %v5604_v52  ;;  %1306 = vmatpush.msra.mxu0 %v4106_v54 }
 0x2ea   :  { %1212 = vmatpush.msrb.mxu2 %v5606_v59  ;;  %1289 = vmatpush.msra.mxu3 %v4141_v28 }
 0x2eb   :  { %1193 = vmatpush.msra.mxu1 %v5608_v0  ;;  %1307 = vmatpush.msra.mxu0 %v4120_v3 }
 0x2ec   :  { %1213 = vmatpush.msrb.mxu2 %v5610_v5 }
 0x2ed   :  { %1194 = vmatpush.msra.mxu1 %v5612_v9  ;;  %1308 = vmatpush.msra.mxu0 %v4134_v15 }
 0x2ee   :  { %1214 = vmatpush.msrb.mxu2 %v5614_v25 }
 0x2ef   :  { %1195 = vmatpush.msra.mxu1 %v5616_v29  ;;  %1309 = vmatpush.msra.mxu0 %v4148_v36 }
 0x2f0   :  { %1215 = vmatpush.msrb.mxu2 %v5618_v37 }
 0x34b   :  { %v868_v42 = vpop.f32.mrf.mxu0  ;;  %v888_v44 = vpop.f32.mrf.mxu1 }
 0x34c   :  { %v889_v55 = vadd.f32 %v888_v44, %v5619_v48 }
 0x350   :  { %v828_v47 = vpop.f32.mrf.mxu2  ;;  %v848_v60 = vpop.f32.mrf.mxu3 }
 0x351   :  { %v829_v12 = vadd.f32 %v828_v47, %v5620_v56  ;;  %v849_v21 = vadd.f32 %v848_v60, %v5627_v31 }
 0x353   :  { %v931_v35 = vadd.f32 %v889_v55, %v829_v12  ;;  %v1002_v24 = vpop.f32.mrf.mxu0  ;;  %v1022_v22 = vpop.f32.mrf.mxu1 }
 0x354   :  { %v1003_v49 = vadd.f32 %v1002_v24, %v5625_v20  ;;  %v1023_v10 = vadd.f32 %v1022_v22, %v5626_v23 }
 0x355   :  { %v2859_v30 = vmul.f32 -1.442695, %v931_v35 }
 0x356   :  { %v1045_v57 = vadd.f32 %v1003_v49, %v199_v27  ;;  %v1065_v39 = vadd.f32 %v1023_v10, %v240_v4  ;;  %v869_v27 = vadd.f32 %v868_v42, %v4011_v1 }
 0x357   :  { %2989 = vpow2.f32 %v2859_v30 }
 0x358   :  { %v2864_v40 = vmul.f32 -1.442695, %v1045_v57  ;;  %v2865_v45 = vmul.f32 -1.442695, %v1065_v39  ;;  %v908_v6 = vpop.f32.mrf.mxu2  ;;  %v928_v44 = vpop.f32.mrf.mxu3 }
 0x359   :  { %v909_v46 = vadd.f32 %v908_v6, %v5628_v33  ;;  %v929_v4 = vadd.f32 %v928_v44, %v5629_v19 }
 0x35a   :  { %2991 = vpow2.f32 %v2864_v40 }
 0x35b   :  { %2993 = vpow2.f32 %v2865_v45  ;;  %v951_v2 = vadd.f32 %v909_v46, %v849_v21  ;;  %v1042_v41 = vpop.f32.mrf.mxu0 }
 0x35c   :  { %v1043_v45 = vadd.f32 %v1042_v41, %v5591_v16 }
 0x35d   :  { %v2990_v32 = vpop.eup %2989  ;;  %v2860_v26 = vmul.f32 -1.442695, %v951_v2 }
 0x35e   :  { %v935_v53 = vadd.f32 1.0, %v2990_v32 }
 0x35f   :  { %2995 = vpow2.f32 %v2860_v26 }
 0x360   :  { %v2992_v58 = vpop.eup %2991  ;;  %2997 = vrcp.f32 %v935_v53  ;;  %v947_v12 = vand.u32 2147483648, %v935_v53  ;;  %v945_v8 = vand.u32 2147483647, %v935_v53  ;;  %vm941_vm14 = vweird.f32 %v935_v53 }
 0x361   :  { %v2994_v62 = vpop.eup %2993  ;;  %v1049_v63 = vadd.f32 1.0, %v2992_v58 }
 0x362   :  { %v4162_v11 = vadd.f32 1.0, %v2994_v62  ;;  %v948_v40 = vor.u32 1.1754944e-38, %v947_v12  ;;  %vm946_vm2 = vcmp.eq.f32.partialorder %v945_v8, 8.507059e+37  ;;  %v5632_v8 = vld [vmem:[#allocation27_spill] sm:$0xff] }
 0x363   :  { %2999 = vrcp.f32 %v1049_v63  ;;  %v1059_v10 = vand.u32 2147483647, %v1049_v63  ;;  %v1061_v57 = vand.u32 2147483648, %v1049_v63  ;;  %vm1055_vm3 = vweird.f32 %v1049_v63 }
 0x364   :  { %3001 = vrcp.f32 %v4162_v11  ;;  %vm1075_vm8 = vweird.f32 %v4162_v11 }
 0x365   :  { %v2996_v17 = vpop.eup %2995  ;;  %vm1060_vm4 = vcmp.eq.f32.partialorder %v1059_v10, 8.507059e+37 }
 0x366   :  { %v2998_v50 = vpop.eup %2997  ;;  %v4165_v13 = vadd.f32 1.0, %v2996_v17 }
 0x367   :  { %v937_v18 = vmul.f32 %v2998_v50, %v935_v53  ;;  %vm942_vm13 = vweird.f32 %v2998_v50  ;;  %v1062_v53 = vor.u32 1.1754944e-38, %v1061_v57 }
 0x368   :  { %3003 = vrcp.f32 %v4165_v13  ;;  %vm943_vm15 = vmor %vm941_vm14, %vm942_vm13  ;;  %v965_v62 = vand.u32 2147483647, %v4165_v13  ;;  %vm961_vm11 = vweird.f32 %v4165_v13 }
 0x369   :  { %v3000_v51 = vpop.eup %2999  ;;  %v938_v47 = vsub.f32 1.0, %v937_v18  ;;  %v967_v18 = vand.u32 2147483648, %v4165_v13 }
 0x36a   :  { %v4168_v55 = vpop.eup %3001  ;;  %v1051_v35 = vmul.f32 %v3000_v51, %v1049_v63  ;;  %vm1056_vm0 = vweird.f32 %v3000_v51  ;;  %v1081_v63 = vand.u32 2147483648, %v4162_v11  ;;  %vm966_vm13 = vcmp.eq.f32.partialorder %v965_v62, 8.507059e+37  ;;  %v4249_v62 = vld [vmem:[%s5379_s7 + $0x128] sm:$0xff] }
 0x36b   :  { %v1071_v24 = vmul.f32 %v4168_v55, %v4162_v11  ;;  %v939_v22 = vmul.f32 %v2998_v50, %v938_v47  ;;  %vm1057_vm5 = vmor %vm1055_vm3, %vm1056_vm0  ;;  %vm1076_vm6 = vweird.f32 %v4168_v55 }
 0x36c   :  { %v1052_v49 = vsub.f32 1.0, %v1051_v35  ;;  %vm4183_vm9 = vmor %vm1075_vm8, %vm1076_vm6  ;;  %v1082_v10 = vor.u32 1.1754944e-38, %v1081_v63  ;;  %v4297_v63 = vld [vmem:[%s5379_s7 + $0xc0] sm:$0xff] }
 0x36d   :  { %v1072_v30 = vsub.f32 1.0, %v1071_v24  ;;  %v940_v60 = vadd.f32 %v2998_v50, %v939_v22  ;;  %v4309_v24 = vld [vmem:[%s5379_s7 + $0x168] sm:$0xff] }
 0x36e   :  { %v3004_v39 = vpop.eup %3003  ;;  %v1053_v6 = vmul.f32 %v3000_v51, %v1052_v49 }
 0x36f   :  { %v1073_v21 = vmul.f32 %v4168_v55, %v1072_v30  ;;  %v957_v46 = vmul.f32 %v3004_v39, %v4165_v13  ;;  %v944_v42 = vsel %vm943_vm15, %v2998_v50, %v940_v60  ;;  %vm962_vm7 = vweird.f32 %v3004_v39 }
 0x370   :  { %v949_v2 = vsel %vm946_vm2, %v948_v40, %v944_v42  ;;  %v1054_v32 = vadd.f32 %v3000_v51, %v1053_v6  ;;  %vm963_vm12 = vmor %vm961_vm11, %vm962_vm7 }
 0x371   :  { %v971_v26 = vmul.f32 %v949_v2, %v929_v4  ;;  %v958_v58 = vsub.f32 1.0, %v957_v46  ;;  %v1074_v50 = vadd.f32 %v4168_v55, %v1073_v21 }
 0x372   :  { %v1058_v17 = vsel %vm1057_vm5, %v3000_v51, %v1054_v32  ;;  %v1079_v51 = vand.u32 2147483647, %v4162_v11  ;;  %v4225_v32 = vld [vmem:[%s5379_s7 + $0x158] sm:$0xff] }
 0x373   :  { %v972_v44 = vadd.f32 %v971_v26, %v869_v27  ;;  %v1063_v47 = vsel %vm1060_vm4, %v1062_v53, %v1058_v17  ;;  %v959_v12 = vmul.f32 %v3004_v39, %v958_v58  ;;  %v968_v27 = vor.u32 1.1754944e-38, %v967_v18  ;;  %v4231_v26 = vld [vmem:[%s5379_s7 + $0x160] sm:$0xff]  ;;  %v4255_v17 = vld [vmem:[%s5379_s7 + $0x130] sm:$0xff]  ;;  %v4261_v18 = vld [vmem:[%s5376_s5 + $0x28] sm:$0xff] }
 0x374   :  { %v1085_v35 = vmul.f32 %v1063_v47, %v1043_v45  ;;  %v1078_v4 = vsel %vm4183_vm9, %v4168_v55, %v1074_v50  ;;  %vm1080_vm14 = vcmp.eq.f32.partialorder %v1079_v51, 8.507059e+37  ;;  %v4237_v53 = vld [vmem:[%s5376_s5 + $0x40] sm:$0xff]  ;;  %v4273_v47 = vld [vmem:[%s5379_s7 + $0xf8] sm:$0xff]  ;;  %v4315_v51 = vld [vmem:[%s5379_s7 + $0x90] sm:$0xff] }
 0x375   :  { %3005 = vtanh.f32 %v972_v44  ;;  %v960_v22 = vadd.f32 %v3004_v39, %v959_v12  ;;  %v1083_v11 = vsel %vm1080_vm14, %v1082_v10, %v1078_v4  ;;  %v4243_v58 = vld [vmem:[%s5379_s7 + $0x120] sm:$0xff]  ;;  %v4267_v44 = vld [vmem:[%s5379_s7 + $0xf0] sm:$0xff]  ;;  %v4357_v10 = vld [vmem:[%s5379_s7 + $0x108] sm:$0xff] }
 0x376   :  { %v1086_v41 = vadd.f32 %v1085_v35, %v5632_v8  ;;  %v1088_v45 = vsub.f32 1.0, %v1083_v11  ;;  %v1090_v42 = vmul.f32 %v1083_v11, %v4036_v38  ;;  %v4219_v38 = vld [vmem:[%s5379_s7 + $0x150] sm:$0xff]  ;;  %v4279_v50 = vld [vmem:[%s5379_s7 + $0x100] sm:$0xff]  ;;  %v4303_v35 = vld [vmem:[%s5379_s7 + $0xc8] sm:$0xff] }
 0x377   :  { %v964_v49 = vsel %vm963_vm12, %v3004_v39, %v960_v22  ;;  %v4291_v12 = vld [vmem:[%s5376_s5 + $0x10] sm:$0xff]  ;;  %v4327_v8 = vld [vmem:[%s5379_s7 + $0x98] sm:$0xff]  ;;  %v4345_v4 = vld [vmem:[%s5379_s7 + $0xa0] sm:$0xff] }
 0x378   :  { %3007 = vtanh.f32 %v1086_v41  ;;  %v969_v30 = vsel %vm966_vm13, %v968_v27, %v964_v49  ;;  %v4321_v22 = vld [vmem:[%s5379_s7 + $0xd0] sm:$0xff]  ;;  %v4333_v41 = vld [vmem:[%s5379_s7 + $0x138] sm:$0xff]  ;;  %v4339_v27 = vld [vmem:[%s5379_s7 + $0x60] sm:$0xff] }
 0x379   :  { %v974_v60 = vsub.f32 1.0, %v969_v30  ;;  %v976_v13 = vmul.f32 %v969_v30, %v4029_v34  ;;  %v4213_v34 = vld [vmem:[%s5376_s5 + $0x58] sm:$0xff]  ;;  %v4351_v49 = vld [vmem:[%s5379_s7 + $0x68] sm:$0xff]  ;;  %v4363_v30 = vld [vmem:[%s5379_s7 + $0x30] sm:$0xff] }
 0x37a   :  { %v4377_v11 = vld [vmem:[%s5379_s7 + $0x38] sm:$0xff] }
 0x37b   :  { %v3006_v57 = vpop.eup %3005 }
 0x37c   :  { %v975_v40 = vmul.f32 %v3006_v57, %v974_v60  ;;  %v4369_v60 = vld [vmem:[%s5379_s7 + $0x70] sm:$0xff]  ;;  %v4383_v57 = vld [vmem:[%s5379_s7 + $0xd8] sm:$0xff] }
 0x37e   :  { %v3008_v6 = vpop.eup %3007  ;;  %v4195_v21 = vadd.f32 %v976_v13, %v975_v40  ;;  %v4389_v40 = vld [vmem:[%s5379_s7] sm:$0xff]  ;;  %v4395_v13 = vld [vmem:[%s5379_s7 + $0x8] sm:$0xff] }
 0x37f   :  { %v1089_v46 = vmul.f32 %v3008_v6, %v1088_v45  ;;  %v4401_v45 = vld [vmem:[%s5379_s7 + $0x170] sm:$0xff]  ;;  %v4407_v6 = vld [vmem:[%s5379_s7 + $0xa8] sm:$0xff] }
 0x380   :  { %1093 = vrot.lane.b32.xlu0 %v4195_v21, %s3240_s8  ;;  %978 = vst.msk [vmem:[#allocation3 + $0x8] sm:$0xff] %vm150_vm1, %v4195_v21 }
 0x381   :  { %v4202_v55 = vadd.f32 %v1090_v42, %v1089_v46  ;;  %v4413_v46 = vld [vmem:[%s5379_s7 + $0x178] sm:$0xff]  ;;  %v4419_v42 = vld [vmem:[%s5379_s7 + $0x140] sm:$0xff] }
 0x382   :  { %5633 = vst [vmem:[#allocation35_spill] sm:$0xff] %v4413_v46 }
 0x383   :  { %5634 = vst [vmem:[#allocation38_spill] sm:$0xff] %v4419_v42 }
 0x3f2   :  { %v1094_v39 = vpop.permute.xlu0 %1093 }
 0x3f3   :  { %v1096_v2 = vsel %vm150_vm1, %v4202_v55, %v1094_v39  ;;  %v4425_v39 = vld [vmem:[%s5379_s7 + $0x40] sm:$0xff] }
 0x3f4   :  { %2866 = vmatmul.msk.f32.vlgmr.msrb.gmra.mxu1 %vm518_vm10, %v1096_v2  ;;  %2867 = vmatmul.msk.f32.vlgmr.msra.gmra.mxu2 %vm518_vm10, %v1096_v2  ;;  %5635 = vst [vmem:[#allocation41_spill] sm:$0xff] %v4425_v39 }
 0x3f5   :  { %2868 = vmatmul.msk.f32.vlgmr.msrb.gmra.mxu3 %vm518_vm10, %v1096_v2  ;;  %2869 = vmatmul.msk.f32.vlgmr.msrb.gmra.mxu0 %vm518_vm10, %v1096_v2 }
 0x3f6   :  { %1326 = vmatpush.msrb.mxu3 %v4213_v34  ;;  %1397 = vmatpush.msrb.mxu0 %v4219_v38 }
 0x3f7   :  { %1417 = vmatpush.msrb.mxu1 %v4225_v32  ;;  %1437 = vmatpush.msra.mxu2 %v4231_v26 }
 0x3f8   :  { %1327 = vmatpush.msrb.mxu3 %v4237_v53  ;;  %1398 = vmatpush.msrb.mxu0 %v4243_v58 }
 0x3f9   :  { %1418 = vmatpush.msrb.mxu1 %v4249_v62  ;;  %1438 = vmatpush.msra.mxu2 %v4255_v17 }
 0x3fa   :  { %1328 = vmatpush.msrb.mxu3 %v4261_v18  ;;  %1399 = vmatpush.msrb.mxu0 %v4267_v44 }
 0x3fb   :  { %1419 = vmatpush.msrb.mxu1 %v4273_v47  ;;  %1439 = vmatpush.msra.mxu2 %v4279_v50 }
 0x3fc   :  { %2870 = vmatmul.msk.f32.vlgmr.msra.gmra.mxu1 %vm518_vm10, %v1096_v2  ;;  %2871 = vmatmul.msk.f32.vlgmr.msrb.gmra.mxu2 %vm518_vm10, %v1096_v2  ;;  %v4431_v2 = vld [vmem:[%s5379_s7 + $0x78] sm:$0xff] }
 0x3fd   :  { %2874 = vmatmul.msk.f32.vlgmr.msra.gmra.mxu3 %vm150_vm1, %v4202_v55  ;;  %2875 = vmatmul.msk.f32.vlgmr.msra.gmra.mxu0 %vm150_vm1, %v4202_v55  ;;  %5636 = vst [vmem:[#allocation40_spill] sm:$0xff] %v4431_v2 }
 0x3fe   :  { %1329 = vmatpush.msrb.mxu3 %v4291_v12  ;;  %1400 = vmatpush.msrb.mxu0 %v4297_v63 }
 0x3ff   :  { %1420 = vmatpush.msrb.mxu1 %v4303_v35  ;;  %1440 = vmatpush.msra.mxu2 %v4321_v22 }
 0x400   :  { %1457 = vmatpush.msra.mxu3 %v4309_v24  ;;  %1401 = vmatpush.msrb.mxu0 %v4315_v51 }
 0x401   :  { %1421 = vmatpush.msrb.mxu1 %v4327_v8  ;;  %1441 = vmatpush.msra.mxu2 %v4345_v4 }
 0x402   :  { %1458 = vmatpush.msra.mxu3 %v4333_v41  ;;  %1402 = vmatpush.msrb.mxu0 %v4339_v27 }
 0x403   :  { %1422 = vmatpush.msrb.mxu1 %v4351_v49  ;;  %1442 = vmatpush.msra.mxu2 %v4369_v60 }
 0x404   :  { %1459 = vmatpush.msra.mxu3 %v4357_v10  ;;  %1403 = vmatpush.msrb.mxu0 %v4363_v30 }
 0x405   :  { %2876 = vmatmul.msk.f32.vlgmr.msrb.gmra.mxu3 %vm150_vm1, %v4202_v55  ;;  %1423 = vmatpush.msrb.mxu1 %v4377_v11 }
 0x406   :  { %1460 = vmatpush.msra.mxu3 %v4383_v57  ;;  %1404 = vmatpush.msrb.mxu0 %v4389_v40 }
 0x407   :  { %1424 = vmatpush.msrb.mxu1 %v4395_v13  ;;  %1443 = vmatpush.msra.mxu2 %v4425_v39  ;;  %v4449_v39 = vld [vmem:[%s5379_s7 + $0x10] sm:$0xff] }
 0x408   :  { %1477 = vmatpush.msra.mxu0 %v4401_v45  ;;  %1461 = vmatpush.msra.mxu3 %v4407_v6  ;;  %5639 = vst [vmem:[#allocation44_spill] sm:$0xff] %v4449_v39 }
 0x409   :  { %1497 = vmatpush.msra.mxu1 %v4413_v46  ;;  %v4437_v46 = vld [vmem:[%s5379_s7 + $0x148] sm:$0xff]  ;;  %1444 = vmatpush.msra.mxu2 %v4449_v39 }
 0x40a   :  { %1478 = vmatpush.msra.mxu0 %v4419_v42  ;;  %1462 = vmatpush.msra.mxu3 %v4431_v2  ;;  %5637 = vst [vmem:[#allocation42_spill] sm:$0xff] %v4437_v46  ;;  %v4443_v42 = vld [vmem:[%s5379_s7 + $0x110] sm:$0xff]  ;;  %v4455_v2 = vld [vmem:[%s5379_s7 + $0x48] sm:$0xff] }
 0x40b   :  { %1498 = vmatpush.msra.mxu1 %v4437_v46  ;;  %5638 = vst [vmem:[#allocation43_spill] sm:$0xff] %v4443_v42  ;;  %v4461_v46 = vld [vmem:[%s5379_s7 + $0x118] sm:$0xff]  ;;  %1575 = vmatpush.msrb.mxu2 %v4097_v14 }
 0x40c   :  { %1479 = vmatpush.msra.mxu0 %v4443_v42  ;;  %5640 = vst [vmem:[#allocation45_spill] sm:$0xff] %v4455_v2  ;;  %1463 = vmatpush.msra.mxu3 %v4455_v2  ;;  %v4467_v42 = vld [vmem:[%s5379_s7 + $0xe0] sm:$0xff]  ;;  %v4474_v2 = vld [vmem:[%s5379_s7 + $0x18] sm:$0xff] }
 0x40d   :  { %5641 = vst [vmem:[#allocation46_spill] sm:$0xff] %v4461_v46  ;;  %1499 = vmatpush.msra.mxu1 %v4461_v46  ;;  %v4480_v46 = vld [vmem:[%s5379_s7 + $0xe8] sm:$0xff]  ;;  %1576 = vmatpush.msrb.mxu2 %v4113_v61 }
 0x40e   :  { %5642 = vst [vmem:[#allocation47_spill] sm:$0xff] %v4467_v42  ;;  %1480 = vmatpush.msra.mxu0 %v4467_v42  ;;  %1464 = vmatpush.msra.mxu3 %v4474_v2 }
 0x40f   :  { %5643 = vst [vmem:[#allocation48_spill] sm:$0xff] %v4474_v2  ;;  %1500 = vmatpush.msra.mxu1 %v4480_v46  ;;  %1577 = vmatpush.msrb.mxu2 %v4127_v7 }
 0x410   :  { %5644 = vst [vmem:[#allocation50_spill] sm:$0xff] %v4480_v46  ;;  %1481 = vmatpush.msra.mxu0 %v5604_v52  ;;  %1595 = vmatpush.msrb.mxu3 %v4106_v54 }
 0x411   :  { %1501 = vmatpush.msra.mxu1 %v5606_v59  ;;  %1578 = vmatpush.msrb.mxu2 %v4141_v28 }
 0x412   :  { %1482 = vmatpush.msra.mxu0 %v5608_v0  ;;  %1596 = vmatpush.msrb.mxu3 %v4120_v3 }
 0x413   :  { %1502 = vmatpush.msra.mxu1 %v5610_v5 }
 0x414   :  { %1483 = vmatpush.msra.mxu0 %v5612_v9  ;;  %1597 = vmatpush.msrb.mxu3 %v4134_v15 }
 0x415   :  { %1503 = vmatpush.msra.mxu1 %v5614_v25 }
 0x416   :  { %1484 = vmatpush.msra.mxu0 %v5616_v29  ;;  %1598 = vmatpush.msrb.mxu3 %v4148_v36  ;;  %v5645_v36 = vld [vmem:[#allocation22_spill] sm:$0xff] }
 0x417   :  { %1504 = vmatpush.msra.mxu1 %v5618_v37  ;;  %v243_v37 = vadd.f32 %v5645_v36, %v5623_v43 }
 0x471   :  { %v1117_v52 = vpop.f32.mrf.mxu1 }
 0x472   :  { %v1118_v59 = vadd.f32 %v1117_v52, %v5620_v56  ;;  %v1177_v0 = vpop.f32.mrf.mxu0 }
 0x473   :  { %v1178_v5 = vadd.f32 %v1177_v0, %v5619_v48 }
 0x475   :  { %v1220_v7 = vadd.f32 %v1178_v5, %v1118_v59 }
 0x477   :  { %v2872_v9 = vmul.f32 -1.442695, %v1220_v7  ;;  %v1137_v3 = vpop.f32.mrf.mxu2 }
 0x478   :  { %v1157_v15 = vpop.f32.mrf.mxu3  ;;  %v1138_v28 = vadd.f32 %v1137_v3, %v5627_v31  ;;  %v5646_v3 = vld [vmem:[#allocation13_spill] sm:$0xff] }
 0x479   :  { %3009 = vpow2.f32 %v2872_v9  ;;  %v1197_v25 = vpop.f32.mrf.mxu1 }
 0x47a   :  { %v1198_v29 = vadd.f32 %v1197_v25, %v5628_v33  ;;  %v1311_v61 = vpop.f32.mrf.mxu0 }
 0x47b   :  { %v1312_v54 = vadd.f32 %v1311_v61, %v5626_v23 }
 0x47c   :  { %v1240_v52 = vadd.f32 %v1198_v29, %v1138_v28 }
 0x47d   :  { %v1354_v56 = vadd.f32 %v1312_v54, %v243_v37 }
 0x47e   :  { %v2873_v46 = vmul.f32 -1.442695, %v1240_v52 }
 0x47f   :  { %v3010_v0 = vpop.eup %3009  ;;  %v2878_v59 = vmul.f32 -1.442695, %v1354_v56 }
 0x480   :  { %v1224_v7 = vadd.f32 1.0, %v3010_v0  ;;  %3011 = vpow2.f32 %v2873_v46  ;;  %v1291_v5 = vpop.f32.mrf.mxu3  ;;  %v1217_v0 = vpop.f32.mrf.mxu2 }
 0x481   :  { %3013 = vpow2.f32 %v2878_v59  ;;  %v1292_v9 = vadd.f32 %v1291_v5, %v5625_v20 }
 0x482   :  { %3015 = vrcp.f32 %v1224_v7  ;;  %v1236_v46 = vand.u32 2147483648, %v1224_v7  ;;  %v1234_v52 = vand.u32 2147483647, %v1224_v7  ;;  %vm1230_vm0 = vweird.f32 %v1224_v7 }
 0x483   :  { %v1334_v25 = vadd.f32 %v1292_v9, %v5646_v3  ;;  %v1218_v3 = vadd.f32 %v1217_v0, %v5629_v19 }
 0x484   :  { %vm1235_vm3 = vcmp.eq.f32.partialorder %v1234_v52, 8.507059e+37 }
 0x485   :  { %v2877_v33 = vmul.f32 -1.442695, %v1334_v25 }
 0x486   :  { %v3012_v31 = vpop.eup %3011 }
 0x487   :  { %v3014_v48 = vpop.eup %3013  ;;  %v1244_v36 = vadd.f32 1.0, %v3012_v31  ;;  %3017 = vpow2.f32 %v2877_v33  ;;  %v1237_v33 = vor.u32 1.1754944e-38, %v1236_v46 }
 0x488   :  { %v3016_v61 = vpop.eup %3015  ;;  %v4507_v28 = vadd.f32 1.0, %v3014_v48 }
 0x489   :  { %3019 = vrcp.f32 %v1244_v36  ;;  %v1226_v54 = vmul.f32 %v3016_v61, %v1224_v7  ;;  %vm1231_vm15 = vweird.f32 %v3016_v61  ;;  %v1256_v43 = vand.u32 2147483648, %v1244_v36 }
 0x48a   :  { %3021 = vrcp.f32 %v4507_v28  ;;  %vm1232_vm2 = vmor %vm1230_vm0, %vm1231_vm15  ;;  %v1254_v7 = vand.u32 2147483647, %v1244_v36  ;;  %vm1250_vm5 = vweird.f32 %v1244_v36  ;;  %vm1364_vm14 = vweird.f32 %v4507_v28 }
 0x48b   :  { %v1227_v56 = vsub.f32 1.0, %v1226_v54 }
 0x48c   :  { %vm1255_vm7 = vcmp.eq.f32.partialorder %v1254_v7, 8.507059e+37 }
 0x48d   :  { %v3018_v29 = vpop.eup %3017  ;;  %v1228_v37 = vmul.f32 %v3016_v61, %v1227_v56  ;;  %v1158_v56 = vadd.f32 %v1157_v15, %v4011_v1 }
 0x48e   :  { %v1338_v59 = vadd.f32 1.0, %v3018_v29 }
 0x48f   :  { %v3020_v5 = vpop.eup %3019  ;;  %v1229_v9 = vadd.f32 %v3016_v61, %v1228_v37 }
 0x490   :  { %v1246_v31 = vmul.f32 %v3020_v5, %v1244_v36  ;;  %3023 = vrcp.f32 %v1338_v59  ;;  %v3022_v48 = vpop.eup %3021  ;;  %vm1251_vm4 = vweird.f32 %v3020_v5  ;;  %vm1344_vm9 = vweird.f32 %v1338_v59 }
 0x491   :  { %v1233_v25 = vsel %vm1232_vm2, %v3016_v61, %v1229_v9  ;;  %v1360_v29 = vmul.f32 %v3022_v48, %v4507_v28  ;;  %vm1252_vm6 = vmor %vm1250_vm5, %vm1251_vm4  ;;  %v1257_v61 = vor.u32 1.1754944e-38, %v1256_v43  ;;  %vm1365_vm13 = vweird.f32 %v3022_v48 }
 0x492   :  { %v1238_v54 = vsel %vm1235_vm3, %v1237_v33, %v1233_v25  ;;  %v1247_v23 = vsub.f32 1.0, %v1246_v31  ;;  %v1350_v31 = vand.u32 2147483648, %v1338_v59  ;;  %vm1366_vm15 = vmor %vm1364_vm14, %vm1365_vm13 }
 0x493   :  { %v1260_v20 = vmul.f32 %v1238_v54, %v1218_v3  ;;  %v1361_v52 = vsub.f32 1.0, %v1360_v29  ;;  %v1331_v54 = vpop.f32.mrf.mxu3 }
 0x494   :  { %v1248_v2 = vmul.f32 %v3020_v5, %v1247_v23  ;;  %v1348_v23 = vand.u32 2147483647, %v1338_v59 }
 0x495   :  { %v1261_v37 = vadd.f32 %v1260_v20, %v1158_v56  ;;  %v1362_v25 = vmul.f32 %v3022_v48, %v1361_v52 }
 0x496   :  { %v3024_v14 = vpop.eup %3023  ;;  %v1249_v46 = vadd.f32 %v3020_v5, %v1248_v2  ;;  %v1351_v2 = vor.u32 1.1754944e-38, %v1350_v31  ;;  %vm1349_vm12 = vcmp.eq.f32.partialorder %v1348_v23, 8.507059e+37 }
 0x497   :  { %3025 = vtanh.f32 %v1261_v37  ;;  %v1340_v42 = vmul.f32 %v3024_v14, %v1338_v59  ;;  %vm1345_vm8 = vweird.f32 %v3024_v14  ;;  %v1363_v7 = vadd.f32 %v3022_v48, %v1362_v25 }
 0x498   :  { %v1253_v0 = vsel %vm1252_vm6, %v3020_v5, %v1249_v46  ;;  %vm1346_vm11 = vmor %vm1344_vm9, %vm1345_vm8  ;;  %v1332_v5 = vadd.f32 %v1331_v54, %v5591_v16  ;;  %v1370_v46 = vand.u32 2147483648, %v4507_v28  ;;  %v1368_v59 = vand.u32 2147483647, %v4507_v28  ;;  %v5650_v54 = vld [vmem:[#allocation41_spill] sm:$0xff] }
 0x499   :  { %v1341_v9 = vsub.f32 1.0, %v1340_v42  ;;  %v1258_v15 = vsel %vm1255_vm7, %v1257_v61, %v1253_v0  ;;  %v1367_v52 = vsel %vm1366_vm15, %v3022_v48, %v1363_v7  ;;  %v5649_v48 = vld [vmem:[#allocation38_spill] sm:$0xff] }
 0x49a   :  { %v1263_v33 = vsub.f32 1.0, %v1258_v15  ;;  %v1265_v43 = vmul.f32 %v1258_v15, %v4195_v21  ;;  %v1371_v0 = vor.u32 1.1754944e-38, %v1370_v46  ;;  %vm1369_vm0 = vcmp.eq.f32.partialorder %v1368_v59, 8.507059e+37  ;;  %v5659_v7 = vld [vmem:[#allocation50_spill] sm:$0xff]  ;;  %v4597_v59 = vld [vmem:[%s5379_s7 + $0xb8] sm:$0xff] }
 0x49b   :  { %v1342_v3 = vmul.f32 %v3024_v14, %v1341_v9  ;;  %v4590_v46 = vld [vmem:[%s5379_s7 + $0xb0] sm:$0xff]  ;;  %5662 = vst [vmem:[#allocation12_spill] sm:$0xff] %v4597_v59 }
 0x49c   :  { %v1372_v9 = vsel %vm1369_vm0, %v1371_v0, %v1367_v52  ;;  %5660 = vst [vmem:[#allocation51_spill] sm:$0xff] %v4590_v46  ;;  %v5665_v52 = vld [vmem:[#allocation34_spill] sm:$0xff]  ;;  %v4611_v0 = vld [vmem:[%s5379_s7 + $0x88] sm:$0xff] }
 0x49d   :  { %v3026_v20 = vpop.eup %3025  ;;  %v1343_v56 = vadd.f32 %v3024_v14, %v1342_v3  ;;  %v1377_v15 = vsub.f32 1.0, %v1372_v9  ;;  %v1379_v3 = vmul.f32 %v1372_v9, %v4202_v55  ;;  %v5648_v55 = vld [vmem:[#allocation35_spill] sm:$0xff]  ;;  %5666 = vst [vmem:[#allocation19_spill] sm:$0xff] %v4611_v0  ;;  %v5667_v9 = vld [vmem:[#allocation32_spill] sm:$0xff] }
 0x49e   :  { %v1264_v36 = vmul.f32 %v3026_v20, %v1263_v33  ;;  %v5651_v20 = vld [vmem:[#allocation40_spill] sm:$0xff] }
 0x49f   :  { %v1347_v29 = vsel %vm1346_vm11, %v3024_v14, %v1343_v56  ;;  %v5647_v14 = vld [vmem:[#allocation29_spill] sm:$0xff]  ;;  %v5652_v56 = vld [vmem:[#allocation42_spill] sm:$0xff] }
 0x4a0   :  { %v1352_v42 = vsel %vm1349_vm12, %v1351_v2, %v1347_v29  ;;  %v4515_v37 = vadd.f32 %v1265_v43, %v1264_v36  ;;  %v5653_v2 = vld [vmem:[#allocation43_spill] sm:$0xff]  ;;  %v5654_v36 = vld [vmem:[#allocation45_spill] sm:$0xff]  ;;  %v5655_v43 = vld [vmem:[#allocation46_spill] sm:$0xff] }
 0x4a1   :  { %v1374_v61 = vmul.f32 %v1352_v42, %v1332_v5  ;;  %v5656_v5 = vld [vmem:[#allocation47_spill] sm:$0xff]  ;;  %v5658_v42 = vld [vmem:[#allocation48_spill] sm:$0xff] }
 0x4a2   :  { %1382 = vrot.lane.b32.xlu1 %v4515_v37, %s3240_s8  ;;  %1267 = vst.msk [vmem:[#allocation3 + $0x10] sm:$0xff] %vm150_vm1, %v4515_v37  ;;  %v5657_v29 = vld [vmem:[#allocation7_spill] sm:$0xff] }
 0x4a3   :  { %v1375_v21 = vadd.f32 %v1374_v61, %v5647_v14  ;;  %v5661_v61 = vld [vmem:[#allocation10_spill] sm:$0xff]  ;;  %v5663_v14 = vld [vmem:[#allocation24_spill] sm:$0xff] }
 0x4a5   :  { %3027 = vtanh.f32 %v1375_v21  ;;  %v4604_v21 = vld [vmem:[%s5379_s7 + $0x80] sm:$0xff] }
 0x4a6   :  { %5664 = vst [vmem:[#allocation11_spill] sm:$0xff] %v4604_v21 }
 0x4ab   :  { %v3028_v31 = vpop.eup %3027 }
 0x4ac   :  { %v1378_v33 = vmul.f32 %v3028_v31, %v1377_v15  ;;  %v4618_v15 = vld [vmem:[%s5379_s7 + $0x50] sm:$0xff]  ;;  %v5669_v31 = vld [vmem:[#allocation33_spill] sm:$0xff] }
 0x4ad   :  { %5668 = vst [vmem:[#allocation9_spill] sm:$0xff] %v4618_v15 }
 0x4ae   :  { %v4526_v28 = vadd.f32 %v1379_v3, %v1378_v33  ;;  %v4625_v33 = vld [vmem:[%s5379_s7 + $0x58] sm:$0xff]  ;;  %v5671_v3 = vld [vmem:[#allocation37_spill] sm:$0xff] }
 0x4af   :  { %5670 = vst [vmem:[#allocation27_spill] sm:$0xff] %v4625_v33 }
 0x514   :  { %v1383_v23 = vpop.permute.xlu1 %1382 }
 0x515   :  { %v1385_v25 = vsel %vm150_vm1, %v4526_v28, %v1383_v23  ;;  %v4632_v23 = vld [vmem:[%s5379_s7 + $0x20] sm:$0xff] }
 0x516   :  { %2879 = vmatmul.msk.f32.vlgmr.msrb.gmra.mxu0 %vm518_vm10, %v1385_v25  ;;  %2880 = vmatmul.msk.f32.vlgmr.msrb.gmra.mxu1 %vm518_vm10, %v1385_v25  ;;  %5672 = vst [vmem:[#allocation22_spill] sm:$0xff] %v4632_v23 }
 0x517   :  { %2881 = vmatmul.msk.f32.vlgmr.msra.gmra.mxu2 %vm518_vm10, %v1385_v25  ;;  %2882 = vmatmul.msk.f32.vlgmr.msra.gmra.mxu3 %vm518_vm10, %v1385_v25 }
 0x518   :  { %1615 = vmatpush.msra.mxu2 %v4213_v34  ;;  %1686 = vmatpush.msra.mxu3 %v4219_v38 }
 0x519   :  { %1706 = vmatpush.msrb.mxu0 %v4225_v32  ;;  %1726 = vmatpush.msrb.mxu1 %v4231_v26 }
 0x51a   :  { %1616 = vmatpush.msra.mxu2 %v4237_v53  ;;  %1687 = vmatpush.msra.mxu3 %v4243_v58 }
 0x51b   :  { %1707 = vmatpush.msrb.mxu0 %v4249_v62  ;;  %1727 = vmatpush.msrb.mxu1 %v4255_v17 }
 0x51c   :  { %1617 = vmatpush.msra.mxu2 %v4261_v18  ;;  %1688 = vmatpush.msra.mxu3 %v4267_v44 }
 0x51d   :  { %1708 = vmatpush.msrb.mxu0 %v4273_v47  ;;  %1728 = vmatpush.msrb.mxu1 %v4279_v50 }
 0x51e   :  { %2883 = vmatmul.msk.f32.vlgmr.msra.gmra.mxu0 %vm518_vm10, %v1385_v25  ;;  %2884 = vmatmul.msk.f32.vlgmr.msra.gmra.mxu1 %vm518_vm10, %v1385_v25  ;;  %v5673_v25 = vld [vmem:[#allocation39_spill] sm:$0xff] }
 0x51f   :  { %2887 = vmatmul.msk.f32.vlgmr.msrb.gmra.mxu2 %vm150_vm1, %v4526_v28  ;;  %2888 = vmatmul.msk.f32.vlgmr.msrb.gmra.mxu3 %vm150_vm1, %v4526_v28 }
 0x520   :  { %1618 = vmatpush.msra.mxu2 %v4291_v12  ;;  %1689 = vmatpush.msra.mxu3 %v4297_v63 }
 0x521   :  { %1709 = vmatpush.msrb.mxu0 %v4303_v35  ;;  %1729 = vmatpush.msrb.mxu1 %v4321_v22 }
 0x522   :  { %1746 = vmatpush.msrb.mxu2 %v4309_v24  ;;  %1690 = vmatpush.msra.mxu3 %v4315_v51 }
 0x523   :  { %1710 = vmatpush.msrb.mxu0 %v4327_v8  ;;  %1730 = vmatpush.msrb.mxu1 %v4345_v4 }
 0x524   :  { %1747 = vmatpush.msrb.mxu2 %v4333_v41  ;;  %1691 = vmatpush.msra.mxu3 %v4339_v27 }
 0x525   :  { %1711 = vmatpush.msrb.mxu0 %v4351_v49  ;;  %1731 = vmatpush.msrb.mxu1 %v4369_v60 }
 0x526   :  { %1748 = vmatpush.msrb.mxu2 %v4357_v10  ;;  %1692 = vmatpush.msra.mxu3 %v4363_v30 }
 0x527   :  { %2889 = vmatmul.msk.f32.vlgmr.msra.gmra.mxu2 %vm150_vm1, %v4526_v28  ;;  %1712 = vmatpush.msrb.mxu0 %v4377_v11 }
 0x528   :  { %1749 = vmatpush.msrb.mxu2 %v4383_v57  ;;  %1693 = vmatpush.msra.mxu3 %v4389_v40 }
 0x529   :  { %1713 = vmatpush.msrb.mxu0 %v4395_v13  ;;  %1732 = vmatpush.msrb.mxu1 %v5650_v54 }
 0x52a   :  { %1766 = vmatpush.msrb.mxu3 %v4401_v45  ;;  %1750 = vmatpush.msrb.mxu2 %v4407_v6 }
 0x52b   :  { %1786 = vmatpush.msra.mxu0 %v5648_v55  ;;  %1733 = vmatpush.msrb.mxu1 %v4449_v39  ;;  %v5680_v39 = vld [vmem:[#allocation23_spill] sm:$0xff] }
 0x52c   :  { %1767 = vmatpush.msrb.mxu3 %v5649_v48  ;;  %1751 = vmatpush.msrb.mxu2 %v5651_v20 }
 0x52d   :  { %1787 = vmatpush.msra.mxu0 %v5652_v56  ;;  %1864 = vmatpush.msra.mxu1 %v5657_v29  ;;  %v4639_v29 = vld [vmem:[%s5379_s7 + $0x28] sm:$0xff] }
 0x52e   :  { %1768 = vmatpush.msrb.mxu3 %v5653_v2  ;;  %1752 = vmatpush.msrb.mxu2 %v5654_v36  ;;  %5674 = vst [vmem:[#allocation13_spill] sm:$0xff] %v4639_v29  ;;  %v5679_v36 = vld [vmem:[#allocation28_spill] sm:$0xff]  ;;  %v5681_v56 = vld [vmem:[#allocation25_spill] sm:$0xff] }
 0x52f   :  { %1788 = vmatpush.msra.mxu0 %v5655_v43  ;;  %1865 = vmatpush.msra.mxu1 %v5663_v14  ;;  %v246_v2 = vadd.f32 %v5680_v39, %v5679_v36 }
 0x530   :  { %1769 = vmatpush.msrb.mxu3 %v5656_v5  ;;  %1753 = vmatpush.msrb.mxu2 %v5658_v42 }
 0x531   :  { %1789 = vmatpush.msra.mxu0 %v5659_v7  ;;  %1866 = vmatpush.msra.mxu1 %v5667_v9 }
 0x532   :  { %1770 = vmatpush.msrb.mxu3 %v4590_v46  ;;  %1884 = vmatpush.msra.mxu2 %v5661_v61 }
 0x533   :  { %1790 = vmatpush.msra.mxu0 %v4597_v59  ;;  %1867 = vmatpush.msra.mxu1 %v5671_v3  ;;  %v5678_v59 = vld [vmem:[#allocation6_spill] sm:$0xff] }
 0x534   :  { %1771 = vmatpush.msrb.mxu3 %v4604_v21  ;;  %1885 = vmatpush.msra.mxu2 %v5665_v52  ;;  %v5677_v21 = vld [vmem:[#allocation5_spill] sm:$0xff] }
 0x535   :  { %1791 = vmatpush.msra.mxu0 %v4611_v0 }
 0x536   :  { %1772 = vmatpush.msrb.mxu3 %v4618_v15  ;;  %1886 = vmatpush.msra.mxu2 %v5669_v31  ;;  %v5675_v31 = vld [vmem:[#allocation8_spill] sm:$0xff] }
 0x537   :  { %1792 = vmatpush.msra.mxu0 %v4625_v33  ;;  %v5676_v33 = vld [vmem:[#allocation4_spill] sm:$0xff] }
 0x538   :  { %1773 = vmatpush.msrb.mxu3 %v4632_v23  ;;  %1887 = vmatpush.msra.mxu2 %v5673_v25 }
 0x539   :  { %1793 = vmatpush.msra.mxu0 %v4639_v29 }
 0x593   :  { %v1406_v61 = vpop.f32.mrf.mxu0  ;;  %v1426_v14 = vpop.f32.mrf.mxu1 }
 0x594   :  { %v1407_v3 = vadd.f32 %v1406_v61, %v5675_v31  ;;  %v1427_v23 = vadd.f32 %v1426_v14, %v5677_v21  ;;  %v5682_v31 = vld [vmem:[#allocation26_spill] sm:$0xff] }
 0x59a   :  { %v1446_v52 = vpop.f32.mrf.mxu2  ;;  %v1466_v9 = vpop.f32.mrf.mxu3 }
 0x59b   :  { %v1467_v15 = vadd.f32 %v1466_v9, %v5676_v33  ;;  %v1486_v0 = vpop.f32.mrf.mxu0  ;;  %v5683_v33 = vld [vmem:[#allocation14_spill] sm:$0xff] }
 0x59c   :  { %v1487_v25 = vadd.f32 %v1486_v0, %v5678_v59 }
 0x59d   :  { %v1509_v46 = vadd.f32 %v1467_v15, %v1407_v3 }
 0x59e   :  { %v1529_v7 = vadd.f32 %v1487_v25, %v1427_v23 }
 0x59f   :  { %v2885_v42 = vmul.f32 -1.442695, %v1509_v46 }
 0x5a0   :  { %v2886_v5 = vmul.f32 -1.442695, %v1529_v7 }
 0x5a1   :  { %3029 = vpow2.f32 %v2885_v42 }
 0x5a2   :  { %3031 = vpow2.f32 %v2886_v5  ;;  %v1580_v29 = vpop.f32.mrf.mxu2  ;;  %v1600_v43 = vpop.f32.mrf.mxu3 }
 0x5a3   :  { %v1581_v61 = vadd.f32 %v1580_v29, %v5681_v56  ;;  %v1601_v9 = vadd.f32 %v1600_v43, %v5682_v31 }
 0x5a5   :  { %v1623_v20 = vadd.f32 %v1581_v61, %v5683_v33  ;;  %v1643_v14 = vadd.f32 %v1601_v9, %v246_v2 }
 0x5a7   :  { %v3030_v21 = vpop.eup %3029  ;;  %v2890_v0 = vmul.f32 -1.442695, %v1623_v20  ;;  %v2891_v46 = vmul.f32 -1.442695, %v1643_v14  ;;  %v1506_v14 = vpop.f32.mrf.mxu1 }
 0x5a8   :  { %v3032_v15 = vpop.eup %3031  ;;  %v1513_v23 = vadd.f32 1.0, %v3030_v21  ;;  %v1507_v31 = vadd.f32 %v1506_v14, %v5629_v19 }
 0x5a9   :  { %v1533_v7 = vadd.f32 1.0, %v3032_v15  ;;  %3033 = vpow2.f32 %v2890_v0 }
 0x5aa   :  { %3035 = vrcp.f32 %v1513_v23  ;;  %v1525_v20 = vand.u32 2147483648, %v1513_v23  ;;  %v1523_v9 = vand.u32 2147483647, %v1513_v23  ;;  %vm1519_vm3 = vweird.f32 %v1513_v23  ;;  %v1620_v14 = vpop.f32.mrf.mxu2 }
 0x5ab   :  { %3037 = vrcp.f32 %v1533_v7  ;;  %v1545_v48 = vand.u32 2147483648, %v1533_v7  ;;  %vm1539_vm7 = vweird.f32 %v1533_v7 }
 0x5ac   :  { %3039 = vpow2.f32 %v2891_v46  ;;  %vm1524_vm5 = vcmp.eq.f32.partialorder %v1523_v9, 8.507059e+37 }
 0x5af   :  { %v3034_v5 = vpop.eup %3033 }
 0x5b0   :  { %v3036_v42 = vpop.eup %3035  ;;  %v1627_v39 = vadd.f32 1.0, %v3034_v5  ;;  %v1526_v5 = vor.u32 1.1754944e-38, %v1525_v20 }
 0x5b1   :  { %v3038_v3 = vpop.eup %3037  ;;  %v1515_v29 = vmul.f32 %v3036_v42, %v1513_v23  ;;  %vm1520_vm2 = vweird.f32 %v3036_v42 }
 0x5b2   :  { %v3040_v25 = vpop.eup %3039  ;;  %v1535_v43 = vmul.f32 %v3038_v3, %v1533_v7  ;;  %3041 = vrcp.f32 %v1627_v39  ;;  %vm1521_vm4 = vmor %vm1519_vm3, %vm1520_vm2  ;;  %vm1540_vm6 = vweird.f32 %v3038_v3  ;;  %v1639_v23 = vand.u32 2147483648, %v1627_v39 }
 0x5b3   :  { %v1516_v33 = vsub.f32 1.0, %v1515_v29  ;;  %v4651_v2 = vadd.f32 1.0, %v3040_v25  ;;  %vm4657_vm9 = vmor %vm1539_vm7, %vm1540_vm6  ;;  %vm1633_vm11 = vweird.f32 %v1627_v39 }
 0x5b4   :  { %v1536_v61 = vsub.f32 1.0, %v1535_v43 }
 0x5b5   :  { %v1517_v21 = vmul.f32 %v3036_v42, %v1516_v33  ;;  %3043 = vrcp.f32 %v4651_v2  ;;  %v1447_v33 = vadd.f32 %v1446_v52, %v4011_v1  ;;  %vm1653_vm0 = vweird.f32 %v4651_v2 }
 0x5b6   :  { %v1537_v0 = vmul.f32 %v3038_v3, %v1536_v61 }
 0x5b7   :  { %v1518_v15 = vadd.f32 %v3036_v42, %v1517_v21  ;;  %v1543_v21 = vand.u32 2147483647, %v1533_v7  ;;  %v1640_v7 = vor.u32 1.1754944e-38, %v1639_v23 }
 0x5b8   :  { %v3042_v46 = vpop.eup %3041  ;;  %v1538_v59 = vadd.f32 %v3038_v3, %v1537_v0  ;;  %v1546_v0 = vor.u32 1.1754944e-38, %v1545_v48 }
 0x5b9   :  { %v1522_v36 = vsel %vm1521_vm4, %v3036_v42, %v1518_v15  ;;  %v1629_v29 = vmul.f32 %v3042_v46, %v1627_v39  ;;  %vm1634_vm8 = vweird.f32 %v3042_v46  ;;  %v1637_v42 = vand.u32 2147483647, %v1627_v39  ;;  %v5686_v39 = vld [vmem:[#allocation30_spill] sm:$0xff] }
 0x5ba   :  { %v1527_v25 = vsel %vm1524_vm5, %v1526_v5, %v1522_v36  ;;  %v1542_v52 = vsel %vm4657_vm9, %v3038_v3, %v1538_v59  ;;  %vm1635_vm12 = vmor %vm1633_vm11, %vm1634_vm8  ;;  %vm1544_vm13 = vcmp.eq.f32.partialorder %v1543_v21, 8.507059e+37 }
 0x5bb   :  { %v3044_v43 = vpop.eup %3043  ;;  %v1549_v56 = vmul.f32 %v1527_v25, %v1507_v31  ;;  %v1630_v54 = vsub.f32 1.0, %v1629_v29  ;;  %vm1638_vm14 = vcmp.eq.f32.partialorder %v1637_v42, 8.507059e+37  ;;  %v1547_v5 = vsel %vm1544_vm13, %v1546_v0, %v1542_v52  ;;  %v5708_v0 = vld [vmem:[#allocation4_spill] sm:$0xff] }
 0x5bc   :  { %v1649_v61 = vmul.f32 %v3044_v43, %v4651_v2  ;;  %vm1654_vm15 = vweird.f32 %v3044_v43  ;;  %v1552_v48 = vsub.f32 1.0, %v1547_v5 }
 0x5bd   :  { %v1550_v20 = vadd.f32 %v1549_v56, %v1447_v33  ;;  %v1631_v55 = vmul.f32 %v3042_v46, %v1630_v54  ;;  %v1621_v54 = vadd.f32 %v1620_v14, %v5591_v16  ;;  %v1659_v33 = vand.u32 2147483648, %v4651_v2  ;;  %vm1655_vm2 = vmor %vm1653_vm0, %vm1654_vm15 }
 0x5be   :  { %v1650_v36 = vsub.f32 1.0, %v1649_v61 }
 0x5bf   :  { %3045 = vtanh.f32 %v1550_v20  ;;  %v1632_v31 = vadd.f32 %v3042_v46, %v1631_v55  ;;  %v1657_v55 = vand.u32 2147483647, %v4651_v2  ;;  %v1660_v20 = vor.u32 1.1754944e-38, %v1659_v33  ;;  %v5710_v33 = vld [vmem:[#allocation15_spill] sm:$0xff] }
 0x5c0   :  { %v1651_v15 = vmul.f32 %v3044_v43, %v1650_v36 }
 0x5c1   :  { %v1636_v56 = vsel %vm1635_vm12, %v3042_v46, %v1632_v31  ;;  %v1554_v46 = vmul.f32 %v1547_v5, %v4515_v37  ;;  %vm1658_vm3 = vcmp.eq.f32.partialorder %v1657_v55, 8.507059e+37 }
 0x5c2   :  { %v1641_v29 = vsel %vm1638_vm14, %v1640_v7, %v1636_v56  ;;  %v1652_v25 = vadd.f32 %v3044_v43, %v1651_v15  ;;  %v5709_v56 = vld [vmem:[#allocation25_spill] sm:$0xff] }
 0x5c3   :  { %v1663_v61 = vmul.f32 %v1641_v29, %v1621_v54 }
 0x5c4   :  { %v1656_v23 = vsel %vm1655_vm2, %v3044_v43, %v1652_v25 }
 0x5c5   :  { %v3046_v59 = vpop.eup %3045  ;;  %v1664_v3 = vadd.f32 %v1663_v61, %v5686_v39  ;;  %v1661_v9 = vsel %vm1658_vm3, %v1660_v20, %v1656_v23  ;;  %v5714_v20 = vld [vmem:[#allocation16_spill] sm:$0xff] }
 0x5c6   :  { %v1553_v21 = vmul.f32 %v3046_v59, %v1552_v48  ;;  %v1666_v2 = vsub.f32 1.0, %v1661_v9  ;;  %v1668_v43 = vmul.f32 %v1661_v9, %v4526_v28  ;;  %v5711_v59 = vld [vmem:[#allocation5_spill] sm:$0xff] }
 0x5c7   :  { %3047 = vtanh.f32 %v1664_v3  ;;  %v5712_v3 = vld [vmem:[#allocation6_spill] sm:$0xff] }
 0x5c8   :  { %v4669_v42 = vadd.f32 %v1554_v46, %v1553_v21  ;;  %v5713_v46 = vld [vmem:[#allocation28_spill] sm:$0xff] }
 0x5c9   :  { %v249_v9 = vadd.f32 %v5714_v20, %v5713_v46 }
 0x5ca   :  { %1671 = vrot.lane.b32.xlu1 %v4669_v42, %s3240_s8  ;;  %1556 = vst.msk [vmem:[#allocation3 + $0x18] sm:$0xff] %vm150_vm1, %v4669_v42 }
 0x5cd   :  { %v3048_v36 = vpop.eup %3047 }
 0x5ce   :  { %v1667_v14 = vmul.f32 %v3048_v36, %v1666_v2  ;;  %v5715_v2 = vld [vmem:[#allocation26_spill] sm:$0xff] }
 0x5d0   :  { %v4676_v52 = vadd.f32 %v1668_v43, %v1667_v14 }
 0x63c   :  { %v1672_v37 = vpop.permute.xlu1 %1671 }
 0x63d   :  { %v1674_v31 = vsel %vm150_vm1, %v4676_v52, %v1672_v37 }
 0x63e   :  { %2892 = vmatmul.msk.f32.vlgmr.msra.gmra.mxu3 %vm518_vm10, %v1674_v31  ;;  %2893 = vmatmul.msk.f32.vlgmr.msrb.gmra.mxu0 %vm518_vm10, %v1674_v31 }
 0x63f   :  { %2894 = vmatmul.msk.f32.vlgmr.msrb.gmra.mxu1 %vm518_vm10, %v1674_v31  ;;  %2895 = vmatmul.msk.f32.vlgmr.msrb.gmra.mxu2 %vm518_vm10, %v1674_v31 }
 0x640   :  { %1904 = vmatpush.msrb.mxu1 %v4213_v34  ;;  %1975 = vmatpush.msrb.mxu2 %v4219_v38  ;;  %v5687_v34 = vld [vmem:[#allocation35_spill] sm:$0xff]  ;;  %v5688_v38 = vld [vmem:[#allocation38_spill] sm:$0xff] }
 0x641   :  { %1995 = vmatpush.msra.mxu3 %v4225_v32  ;;  %2015 = vmatpush.msrb.mxu0 %v4231_v26  ;;  %v5689_v32 = vld [vmem:[#allocation41_spill] sm:$0xff]  ;;  %v5690_v26 = vld [vmem:[#allocation40_spill] sm:$0xff] }
 0x642   :  { %1905 = vmatpush.msrb.mxu1 %v4237_v53  ;;  %1976 = vmatpush.msrb.mxu2 %v4243_v58  ;;  %v5691_v53 = vld [vmem:[#allocation42_spill] sm:$0xff]  ;;  %v5692_v58 = vld [vmem:[#allocation43_spill] sm:$0xff] }
 0x643   :  { %1996 = vmatpush.msra.mxu3 %v4249_v62  ;;  %2016 = vmatpush.msrb.mxu0 %v4255_v17  ;;  %v5693_v62 = vld [vmem:[#allocation44_spill] sm:$0xff]  ;;  %v5694_v17 = vld [vmem:[#allocation45_spill] sm:$0xff] }
 0x644   :  { %1906 = vmatpush.msrb.mxu1 %v4261_v18  ;;  %1977 = vmatpush.msrb.mxu2 %v4267_v44  ;;  %v5695_v18 = vld [vmem:[#allocation46_spill] sm:$0xff]  ;;  %v5696_v44 = vld [vmem:[#allocation47_spill] sm:$0xff] }
 0x645   :  { %1997 = vmatpush.msra.mxu3 %v4273_v47  ;;  %2017 = vmatpush.msrb.mxu0 %v4279_v50  ;;  %v4737_v47 = vld [vmem:[%s5376_s5 + $0x48] sm:$0xff]  ;;  %v5697_v50 = vld [vmem:[#allocation48_spill] sm:$0xff] }
 0x646   :  { %2896 = vmatmul.msk.f32.vlgmr.msrb.gmra.mxu3 %vm518_vm10, %v1674_v31  ;;  %2897 = vmatmul.msk.f32.vlgmr.msra.gmra.mxu0 %vm518_vm10, %v1674_v31 }
 0x647   :  { %2900 = vmatmul.msk.f32.vlgmr.msra.gmra.mxu1 %vm150_vm1, %v4676_v52  ;;  %2901 = vmatmul.msk.f32.vlgmr.msra.gmra.mxu2 %vm150_vm1, %v4676_v52 }
 0x648   :  { %1907 = vmatpush.msrb.mxu1 %v4291_v12  ;;  %1978 = vmatpush.msrb.mxu2 %v4297_v63  ;;  %v5698_v12 = vld [vmem:[#allocation50_spill] sm:$0xff]  ;;  %v5699_v63 = vld [vmem:[#allocation51_spill] sm:$0xff] }
 0x649   :  { %1998 = vmatpush.msra.mxu3 %v4303_v35  ;;  %2018 = vmatpush.msrb.mxu0 %v4321_v22  ;;  %v4746_v35 = vld [vmem:[%s5376_s5 + $0x50] sm:$0xff]  ;;  %v5701_v22 = vld [vmem:[#allocation11_spill] sm:$0xff] }
 0x64a   :  { %2035 = vmatpush.msra.mxu1 %v4309_v24  ;;  %1979 = vmatpush.msrb.mxu2 %v4315_v51  ;;  %v5700_v24 = vld [vmem:[#allocation12_spill] sm:$0xff]  ;;  %v4753_v51 = vld [vmem:[%s5376_s5 + $0x30] sm:$0xff] }
 0x64b   :  { %1999 = vmatpush.msra.mxu3 %v4327_v8  ;;  %2019 = vmatpush.msrb.mxu0 %v4345_v4  ;;  %v4760_v8 = vld [vmem:[%s5376_s5 + $0x38] sm:$0xff]  ;;  %v5703_v4 = vld [vmem:[#allocation9_spill] sm:$0xff] }
 0x64c   :  { %2036 = vmatpush.msra.mxu1 %v4333_v41  ;;  %1980 = vmatpush.msrb.mxu2 %v4339_v27  ;;  %v5702_v41 = vld [vmem:[#allocation19_spill] sm:$0xff] }
 0x64d   :  { %2000 = vmatpush.msra.mxu3 %v4351_v49  ;;  %2020 = vmatpush.msrb.mxu0 %v4369_v60  ;;  %v4767_v27 = vld [vmem:[%s5376_s5 + $0x18] sm:$0xff]  ;;  %v4774_v49 = vld [vmem:[%s5376_s5 + $0x20] sm:$0xff]  ;;  %v5705_v60 = vld [vmem:[#allocation22_spill] sm:$0xff] }
 0x64e   :  { %2037 = vmatpush.msra.mxu1 %v4357_v10  ;;  %1981 = vmatpush.msrb.mxu2 %v4363_v30  ;;  %v5704_v10 = vld [vmem:[#allocation27_spill] sm:$0xff]  ;;  %v4781_v30 = vld [vmem:[%s5376_s5] sm:$0xff] }
 0x64f   :  { %2902 = vmatmul.msk.f32.vlgmr.msrb.gmra.mxu1 %vm150_vm1, %v4676_v52  ;;  %2001 = vmatpush.msra.mxu3 %v4377_v11  ;;  %v4788_v11 = vld [vmem:[%s5376_s5 + $0x8] sm:$0xff] }
 0x650   :  { %2038 = vmatpush.msra.mxu1 %v4383_v57  ;;  %1982 = vmatpush.msrb.mxu2 %v4389_v40  ;;  %v5706_v57 = vld [vmem:[#allocation13_spill] sm:$0xff] }
 0x651   :  { %2002 = vmatpush.msra.mxu3 %v4395_v13  ;;  %2021 = vmatpush.msrb.mxu0 %v5689_v32 }
 0x652   :  { %2055 = vmatpush.msra.mxu2 %v4401_v45  ;;  %2039 = vmatpush.msra.mxu1 %v4407_v6  ;;  %v5707_v45 = vld [vmem:[#allocation8_spill] sm:$0xff] }
 0x653   :  { %2075 = vmatpush.msrb.mxu3 %v5687_v34  ;;  %2022 = vmatpush.msrb.mxu0 %v5693_v62 }
 0x654   :  { %2056 = vmatpush.msra.mxu2 %v5688_v38  ;;  %2040 = vmatpush.msra.mxu1 %v5690_v26 }
 0x655   :  { %2076 = vmatpush.msrb.mxu3 %v5691_v53  ;;  %2153 = vmatpush.msra.mxu0 %v4737_v47 }
 0x656   :  { %2057 = vmatpush.msra.mxu2 %v5692_v58  ;;  %2041 = vmatpush.msra.mxu1 %v5694_v17 }
 0x657   :  { %2077 = vmatpush.msrb.mxu3 %v5695_v18  ;;  %2154 = vmatpush.msra.mxu0 %v4753_v51 }
 0x658   :  { %2058 = vmatpush.msra.mxu2 %v5696_v44  ;;  %2042 = vmatpush.msra.mxu1 %v5697_v50 }
 0x659   :  { %2078 = vmatpush.msrb.mxu3 %v5698_v12  ;;  %2155 = vmatpush.msra.mxu0 %v4767_v27 }
 0x65a   :  { %2059 = vmatpush.msra.mxu2 %v5699_v63  ;;  %2173 = vmatpush.msrb.mxu1 %v4746_v35 }
 0x65b   :  { %2079 = vmatpush.msrb.mxu3 %v5700_v24  ;;  %2156 = vmatpush.msra.mxu0 %v4781_v30 }
 0x65c   :  { %2060 = vmatpush.msra.mxu2 %v5701_v22  ;;  %2174 = vmatpush.msrb.mxu1 %v4760_v8 }
 0x65d   :  { %2080 = vmatpush.msrb.mxu3 %v5702_v41 }
 0x65e   :  { %2061 = vmatpush.msra.mxu2 %v5703_v4  ;;  %2175 = vmatpush.msrb.mxu1 %v4774_v49 }
 0x65f   :  { %2081 = vmatpush.msrb.mxu3 %v5704_v10 }
 0x660   :  { %2062 = vmatpush.msra.mxu2 %v5705_v60  ;;  %2176 = vmatpush.msrb.mxu1 %v4788_v11 }
 0x661   :  { %2082 = vmatpush.msrb.mxu3 %v5706_v57 }
 0x6bb   :  { %v1715_v29 = vpop.f32.mrf.mxu0 }
 0x6bc   :  { %v1735_v40 = vpop.f32.mrf.mxu1  ;;  %v1716_v39 = vadd.f32 %v1715_v29, %v5711_v59 }
 0x6bd   :  { %v1736_v29 = vadd.f32 %v1735_v40, %v4011_v1 }
 0x6c1   :  { %v1695_v13 = vpop.f32.mrf.mxu3 }
 0x6c2   :  { %v1696_v6 = vadd.f32 %v1695_v13, %v5707_v45  ;;  %v1755_v28 = vpop.f32.mrf.mxu2 }
 0x6c3   :  { %v1756_v15 = vadd.f32 %v1755_v28, %v5708_v0  ;;  %v1795_v12 = vpop.f32.mrf.mxu0 }
 0x6c4   :  { %v1869_v7 = vpop.f32.mrf.mxu1 }
 0x6c5   :  { %v1798_v54 = vadd.f32 %v1756_v15, %v1696_v6  ;;  %v1870_v5 = vadd.f32 %v1869_v7, %v5709_v56 }
 0x6c7   :  { %v2898_v25 = vmul.f32 -1.442695, %v1798_v54  ;;  %v1912_v61 = vadd.f32 %v1870_v5, %v5710_v33 }
 0x6c9   :  { %3049 = vpow2.f32 %v2898_v25  ;;  %v2903_v55 = vmul.f32 -1.442695, %v1912_v61  ;;  %v1775_v48 = vpop.f32.mrf.mxu3  ;;  %v1796_v25 = vadd.f32 %v1795_v12, %v5629_v19 }
 0x6ca   :  { %v1776_v23 = vadd.f32 %v1775_v48, %v5712_v3  ;;  %v1889_v21 = vpop.f32.mrf.mxu2 }
 0x6cb   :  { %3051 = vpow2.f32 %v2903_v55  ;;  %v1890_v36 = vadd.f32 %v1889_v21, %v5715_v2 }
 0x6cc   :  { %v1818_v14 = vadd.f32 %v1776_v23, %v1716_v39  ;;  %v1909_v15 = vpop.f32.mrf.mxu1 }
 0x6cd   :  { %v1932_v43 = vadd.f32 %v1890_v36, %v249_v9  ;;  %v1910_v39 = vadd.f32 %v1909_v15, %v5591_v16 }
 0x6ce   :  { %v2899_v37 = vmul.f32 -1.442695, %v1818_v14 }
 0x6cf   :  { %v3050_v31 = vpop.eup %3049  ;;  %v2904_v34 = vmul.f32 -1.442695, %v1932_v43 }
 0x6d0   :  { %v1802_v38 = vadd.f32 1.0, %v3050_v31  ;;  %3053 = vpow2.f32 %v2899_v37 }
 0x6d1   :  { %v3052_v32 = vpop.eup %3051  ;;  %3055 = vpow2.f32 %v2904_v34 }
 0x6d2   :  { %3057 = vrcp.f32 %v1802_v38  ;;  %v1916_v26 = vadd.f32 1.0, %v3052_v32  ;;  %v1812_v6 = vand.u32 2147483647, %v1802_v38  ;;  %v1814_v28 = vand.u32 2147483648, %v1802_v38 }
 0x6d3   :  { %vm1808_vm5 = vweird.f32 %v1802_v38 }
 0x6d4   :  { %3059 = vrcp.f32 %v1916_v26  ;;  %v1926_v5 = vand.u32 2147483647, %v1916_v26  ;;  %v1928_v61 = vand.u32 2147483648, %v1916_v26  ;;  %vm1813_vm6 = vcmp.eq.f32.partialorder %v1812_v6, 8.507059e+37 }
 0x6d5   :  { %v1815_v21 = vor.u32 1.1754944e-38, %v1814_v28  ;;  %vm1922_vm9 = vweird.f32 %v1916_v26 }
 0x6d6   :  { %v3054_v53 = vpop.eup %3053  ;;  %vm4812_vm11 = vcmp.eq.f32.partialorder %v1926_v5, 8.507059e+37  ;;  %v1929_v31 = vor.u32 1.1754944e-38, %v1928_v61  ;;  %v5718_v5 = vld [vmem:[#allocation31_spill] sm:$0xff] }
 0x6d7   :  { %v3056_v58 = vpop.eup %3055  ;;  %v4801_v62 = vadd.f32 1.0, %v3054_v53 }
 0x6d8   :  { %v3058_v17 = vpop.eup %3057  ;;  %v4803_v18 = vadd.f32 1.0, %v3056_v58 }
 0x6d9   :  { %v1804_v44 = vmul.f32 %v3058_v17, %v1802_v38  ;;  %3061 = vrcp.f32 %v4801_v62  ;;  %vm1809_vm4 = vweird.f32 %v3058_v17  ;;  %vm1828_vm13 = vweird.f32 %v4801_v62 }
 0x6da   :  { %3063 = vrcp.f32 %v4803_v18  ;;  %v3060_v50 = vpop.eup %3059  ;;  %vm1810_vm7 = vmor %vm1808_vm5, %vm1809_vm4  ;;  %v1834_v53 = vand.u32 2147483648, %v4801_v62  ;;  %vm1942_vm0 = vweird.f32 %v4803_v18  ;;  %v1948_v6 = vand.u32 2147483648, %v4803_v18 }
 0x6db   :  { %v1805_v13 = vsub.f32 1.0, %v1804_v44  ;;  %v1918_v7 = vmul.f32 %v3060_v50, %v1916_v26  ;;  %vm1923_vm8 = vweird.f32 %v3060_v50  ;;  %v1832_v26 = vand.u32 2147483647, %v4801_v62 }
 0x6dc   :  { %vm1924_vm12 = vmor %vm1922_vm9, %vm1923_vm8 }
 0x6dd   :  { %v1806_v54 = vmul.f32 %v3058_v17, %v1805_v13  ;;  %v1919_v33 = vsub.f32 1.0, %v1918_v7  ;;  %vm1833_vm4 = vcmp.eq.f32.partialorder %v1832_v26, 8.507059e+37  ;;  %v4900_v26 = vld [vmem:[%s5379_s7 + $0xf0] sm:$0xff] }
 0x6df   :  { %v3062_v55 = vpop.eup %3061  ;;  %v1807_v48 = vadd.f32 %v3058_v17, %v1806_v54  ;;  %v1920_v9 = vmul.f32 %v3060_v50, %v1919_v33  ;;  %v1835_v54 = vor.u32 1.1754944e-38, %v1834_v53  ;;  %v4882_v53 = vld [vmem:[%s5379_s7 + $0x128] sm:$0xff] }
 0x6e0   :  { %v3064_v23 = vpop.eup %3063  ;;  %v1824_v20 = vmul.f32 %v3062_v55, %v4801_v62  ;;  %vm1829_vm14 = vweird.f32 %v3062_v55 }
 0x6e1   :  { %v1811_v36 = vsel %vm1810_vm7, %v3058_v17, %v1807_v48  ;;  %v1938_v40 = vmul.f32 %v3064_v23, %v4803_v18  ;;  %v1921_v37 = vadd.f32 %v3060_v50, %v1920_v9  ;;  %vm1943_vm15 = vweird.f32 %v3064_v23  ;;  %vm1830_vm2 = vmor %vm1828_vm13, %vm1829_vm14 }
 0x6e2   :  { %v1816_v43 = vsel %vm1813_vm6, %v1815_v21, %v1811_v36  ;;  %v1825_v34 = vsub.f32 1.0, %v1824_v20  ;;  %vm1944_vm3 = vmor %vm1942_vm0, %vm1943_vm15  ;;  %v1949_v48 = vor.u32 1.1754944e-38, %v1948_v6  ;;  %v4930_v6 = vld [vmem:[%s5379_s7 + $0xc0] sm:$0xff] }
 0x6e3   :  { %v1838_v38 = vmul.f32 %v1816_v43, %v1796_v25  ;;  %v1939_v32 = vsub.f32 1.0, %v1938_v40  ;;  %v1925_v58 = vsel %vm1924_vm12, %v3060_v50, %v1921_v37  ;;  %v1946_v50 = vand.u32 2147483647, %v4803_v18 }
 0x6e4   :  { %v1826_v17 = vmul.f32 %v3062_v55, %v1825_v34  ;;  %v1930_v13 = vsel %vm4812_vm11, %v1929_v31, %v1925_v58  ;;  %v4858_v31 = vld [vmem:[%s5379_s7 + $0x158] sm:$0xff]  ;;  %v4864_v34 = vld [vmem:[%s5379_s7 + $0x160] sm:$0xff]  ;;  %v4888_v58 = vld [vmem:[%s5379_s7 + $0x130] sm:$0xff] }
 0x6e5   :  { %v1839_v44 = vadd.f32 %v1838_v38, %v1736_v29  ;;  %v1940_v12 = vmul.f32 %v3064_v23, %v1939_v32  ;;  %v1952_v28 = vmul.f32 %v1930_v13, %v1910_v39  ;;  %vm1947_vm5 = vcmp.eq.f32.partialorder %v1946_v50, 8.507059e+37  ;;  %v4870_v38 = vld [vmem:[%s5376_s5 + $0x40] sm:$0xff]  ;;  %v4924_v13 = vld [vmem:[%s5376_s5 + $0x10] sm:$0xff] }
 0x6e6   :  { %v1827_v15 = vadd.f32 %v3062_v55, %v1826_v17  ;;  %v4876_v32 = vld [vmem:[%s5379_s7 + $0x120] sm:$0xff]  ;;  %v4894_v17 = vld [vmem:[%s5376_s5 + $0x28] sm:$0xff]  ;;  %v4954_v50 = vld [vmem:[%s5379_s7 + $0xd0] sm:$0xff] }
 0x6e7   :  { %3065 = vtanh.f32 %v1839_v44  ;;  %v1941_v7 = vadd.f32 %v3064_v23, %v1940_v12  ;;  %v1953_v29 = vadd.f32 %v1952_v28, %v5718_v5  ;;  %v4906_v44 = vld [vmem:[%s5379_s7 + $0xf8] sm:$0xff]  ;;  %v4912_v12 = vld [vmem:[%s5379_s7 + $0x100] sm:$0xff]  ;;  %v4936_v28 = vld [vmem:[%s5379_s7 + $0xc8] sm:$0xff] }
 0x6e8   :  { %v1831_v25 = vsel %vm1830_vm2, %v3062_v55, %v1827_v15  ;;  %v4942_v15 = vld [vmem:[%s5379_s7 + $0x168] sm:$0xff]  ;;  %v4966_v5 = vld [vmem:[%s5379_s7 + $0x138] sm:$0xff] }
 0x6e9   :  { %v1945_v33 = vsel %vm1944_vm3, %v3064_v23, %v1941_v7  ;;  %v1836_v61 = vsel %vm1833_vm4, %v1835_v54, %v1831_v25  ;;  %3067 = vtanh.f32 %v1953_v29  ;;  %v4948_v7 = vld [vmem:[%s5379_s7 + $0x90] sm:$0xff]  ;;  %v4960_v54 = vld [vmem:[%s5379_s7 + $0x98] sm:$0xff]  ;;  %v4972_v29 = vld [vmem:[%s5379_s7 + $0x60] sm:$0xff] }
 0x6ea   :  { %v1841_v21 = vsub.f32 1.0, %v1836_v61  ;;  %v1950_v39 = vsel %vm1947_vm5, %v1949_v48, %v1945_v33  ;;  %v1843_v18 = vmul.f32 %v1836_v61, %v4669_v42  ;;  %v4846_v42 = vld [vmem:[%s5376_s5 + $0x58] sm:$0xff]  ;;  %v4978_v25 = vld [vmem:[%s5379_s7 + $0xa0] sm:$0xff]  ;;  %v4984_v33 = vld [vmem:[%s5379_s7 + $0x68] sm:$0xff] }
 0x6eb   :  { %v1955_v36 = vsub.f32 1.0, %v1950_v39  ;;  %v1957_v43 = vmul.f32 %v1950_v39, %v4676_v52  ;;  %v4852_v52 = vld [vmem:[%s5379_s7 + $0x150] sm:$0xff]  ;;  %v4990_v61 = vld [vmem:[%s5379_s7 + $0x108] sm:$0xff]  ;;  %v5010_v39 = vld [vmem:[%s5379_s7 + $0x38] sm:$0xff] }
 0x6ec   :  { %v4996_v48 = vld [vmem:[%s5379_s7 + $0x30] sm:$0xff] }
 0x6ed   :  { %v3066_v20 = vpop.eup %3065 }
 0x6ee   :  { %v1842_v9 = vmul.f32 %v3066_v20, %v1841_v21  ;;  %v5002_v21 = vld [vmem:[%s5379_s7 + $0x70] sm:$0xff]  ;;  %v5016_v20 = vld [vmem:[%s5379_s7 + $0xd8] sm:$0xff] }
 0x6ef   :  { %v3068_v62 = vpop.eup %3067 }
 0x6f0   :  { %v4828_v40 = vadd.f32 %v1843_v18, %v1842_v9  ;;  %v1956_v14 = vmul.f32 %v3068_v62, %v1955_v36  ;;  %v5022_v9 = vld [vmem:[%s5379_s7] sm:$0xff]  ;;  %v5028_v18 = vld [vmem:[%s5379_s7 + $0x8] sm:$0xff]  ;;  %v5034_v36 = vld [vmem:[%s5379_s7 + $0x170] sm:$0xff] }
 0x6f1   :  { %v5040_v62 = vld [vmem:[%s5379_s7 + $0xa8] sm:$0xff] }
 0x6f2   :  { %1960 = vrot.lane.b32.xlu2 %v4828_v40, %s3240_s8  ;;  %1845 = vst.msk [vmem:[#allocation3 + $0x20] sm:$0xff] %vm150_vm1, %v4828_v40  ;;  %v4835_v55 = vadd.f32 %v1957_v43, %v1956_v14  ;;  %v5046_v14 = vld [vmem:[%s5379_s7 + $0x178] sm:$0xff]  ;;  %v5052_v43 = vld [vmem:[%s5379_s7 + $0x140] sm:$0xff] }
 0x6f3   :  { %5719 = vst [vmem:[#allocation29_spill] sm:$0xff] %v5040_v62 }
 0x6f4   :  { %5720 = vst [vmem:[#allocation7_spill] sm:$0xff] %v5046_v14 }
 0x6f5   :  { %5721 = vst [vmem:[#allocation10_spill] sm:$0xff] %v5052_v43 }
 0x74c   :  { %v1961_v23 = vpop.permute.xlu2 %1960 }
 0x74d   :  { %v1963_v37 = vsel %vm150_vm1, %v4835_v55, %v1961_v23  ;;  %v5058_v23 = vld [vmem:[%s5379_s7 + $0x40] sm:$0xff] }
 0x74e   :  { %2905 = vmatmul.msk.f32.vlgmr.msrb.gmra.mxu2 %vm518_vm10, %v1963_v37  ;;  %2906 = vmatmul.msk.f32.vlgmr.msra.gmra.mxu3 %vm518_vm10, %v1963_v37  ;;  %5722 = vst [vmem:[#allocation24_spill] sm:$0xff] %v5058_v23 }
 0x74f   :  { %2907 = vmatmul.msk.f32.vlgmr.msrb.gmra.mxu0 %vm518_vm10, %v1963_v37  ;;  %2908 = vmatmul.msk.f32.vlgmr.msra.gmra.mxu1 %vm518_vm10, %v1963_v37 }
 0x750   :  { %2193 = vmatpush.msrb.mxu0 %v4846_v42  ;;  %2264 = vmatpush.msra.mxu1 %v4852_v52 }
 0x751   :  { %2284 = vmatpush.msrb.mxu2 %v4858_v31  ;;  %2304 = vmatpush.msra.mxu3 %v4864_v34 }
 0x752   :  { %2194 = vmatpush.msrb.mxu0 %v4870_v38  ;;  %2265 = vmatpush.msra.mxu1 %v4876_v32 }
 0x753   :  { %2285 = vmatpush.msrb.mxu2 %v4882_v53  ;;  %2305 = vmatpush.msra.mxu3 %v4888_v58 }
 0x754   :  { %2195 = vmatpush.msrb.mxu0 %v4894_v17  ;;  %2266 = vmatpush.msra.mxu1 %v4900_v26 }
 0x755   :  { %2286 = vmatpush.msrb.mxu2 %v4906_v44  ;;  %2306 = vmatpush.msra.mxu3 %v4912_v12 }
 0x756   :  { %2909 = vmatmul.msk.f32.vlgmr.msra.gmra.mxu2 %vm518_vm10, %v1963_v37  ;;  %2910 = vmatmul.msk.f32.vlgmr.msrb.gmra.mxu3 %vm518_vm10, %v1963_v37  ;;  %v5064_v37 = vld [vmem:[%s5379_s7 + $0x78] sm:$0xff] }
 0x757   :  { %2913 = vmatmul.msk.f32.vlgmr.msra.gmra.mxu0 %vm150_vm1, %v4835_v55  ;;  %2914 = vmatmul.msk.f32.vlgmr.msrb.gmra.mxu1 %vm150_vm1, %v4835_v55  ;;  %5723 = vst [vmem:[#allocation34_spill] sm:$0xff] %v5064_v37 }
 0x758   :  { %2196 = vmatpush.msrb.mxu0 %v4924_v13  ;;  %2267 = vmatpush.msra.mxu1 %v4930_v6 }
 0x759   :  { %2287 = vmatpush.msrb.mxu2 %v4936_v28  ;;  %2307 = vmatpush.msra.mxu3 %v4954_v50 }
 0x75a   :  { %2324 = vmatpush.msra.mxu0 %v4942_v15  ;;  %2268 = vmatpush.msra.mxu1 %v4948_v7 }
 0x75b   :  { %2288 = vmatpush.msrb.mxu2 %v4960_v54  ;;  %2308 = vmatpush.msra.mxu3 %v4978_v25 }
 0x75c   :  { %2325 = vmatpush.msra.mxu0 %v4966_v5  ;;  %2269 = vmatpush.msra.mxu1 %v4972_v29 }
 0x75d   :  { %2289 = vmatpush.msrb.mxu2 %v4984_v33  ;;  %2309 = vmatpush.msra.mxu3 %v5002_v21 }
 0x75e   :  { %2326 = vmatpush.msra.mxu0 %v4990_v61  ;;  %2270 = vmatpush.msra.mxu1 %v4996_v48 }
 0x75f   :  { %2915 = vmatmul.msk.f32.vlgmr.msrb.gmra.mxu0 %vm150_vm1, %v4835_v55  ;;  %2290 = vmatpush.msrb.mxu2 %v5010_v39 }
 0x760   :  { %2327 = vmatpush.msra.mxu0 %v5016_v20  ;;  %2271 = vmatpush.msra.mxu1 %v5022_v9 }
 0x761   :  { %2291 = vmatpush.msrb.mxu2 %v5028_v18  ;;  %2310 = vmatpush.msra.mxu3 %v5058_v23  ;;  %v5082_v23 = vld [vmem:[%s5379_s7 + $0x10] sm:$0xff] }
 0x762   :  { %2344 = vmatpush.msrb.mxu1 %v5034_v36  ;;  %2328 = vmatpush.msra.mxu0 %v5040_v62  ;;  %5726 = vst [vmem:[#allocation37_spill] sm:$0xff] %v5082_v23 }
 0x763   :  { %2364 = vmatpush.msra.mxu2 %v5046_v14  ;;  %v5070_v14 = vld [vmem:[%s5379_s7 + $0x148] sm:$0xff]  ;;  %2311 = vmatpush.msra.mxu3 %v5082_v23 }
 0x764   :  { %2345 = vmatpush.msrb.mxu1 %v5052_v43  ;;  %2329 = vmatpush.msra.mxu0 %v5064_v37  ;;  %5724 = vst [vmem:[#allocation32_spill] sm:$0xff] %v5070_v14  ;;  %v5076_v43 = vld [vmem:[%s5379_s7 + $0x110] sm:$0xff]  ;;  %v5088_v37 = vld [vmem:[%s5379_s7 + $0x48] sm:$0xff] }
 0x765   :  { %2365 = vmatpush.msra.mxu2 %v5070_v14  ;;  %5725 = vst [vmem:[#allocation33_spill] sm:$0xff] %v5076_v43  ;;  %v5094_v14 = vld [vmem:[%s5379_s7 + $0x118] sm:$0xff]  ;;  %2442 = vmatpush.msrb.mxu3 %v4737_v47 }
 0x766   :  { %2346 = vmatpush.msrb.mxu1 %v5076_v43  ;;  %5727 = vst [vmem:[#allocation39_spill] sm:$0xff] %v5088_v37  ;;  %2330 = vmatpush.msra.mxu0 %v5088_v37  ;;  %v5100_v43 = vld [vmem:[%s5379_s7 + $0xe0] sm:$0xff]  ;;  %v5107_v37 = vld [vmem:[%s5379_s7 + $0x18] sm:$0xff] }
 0x767   :  { %5728 = vst [vmem:[#allocation23_spill] sm:$0xff] %v5094_v14  ;;  %2366 = vmatpush.msra.mxu2 %v5094_v14  ;;  %v5113_v14 = vld [vmem:[%s5379_s7 + $0xe8] sm:$0xff]  ;;  %2443 = vmatpush.msrb.mxu3 %v4753_v51 }
 0x768   :  { %5729 = vst [vmem:[#allocation14_spill] sm:$0xff] %v5100_v43  ;;  %2347 = vmatpush.msrb.mxu1 %v5100_v43  ;;  %2331 = vmatpush.msra.mxu0 %v5107_v37 }
 0x769   :  { %5730 = vst [vmem:[#allocation30_spill] sm:$0xff] %v5107_v37  ;;  %2367 = vmatpush.msra.mxu2 %v5113_v14  ;;  %2444 = vmatpush.msrb.mxu3 %v4767_v27  ;;  %v5732_v27 = vld [vmem:[#allocation18_spill] sm:$0xff] }
 0x76a   :  { %5731 = vst [vmem:[#allocation35_spill] sm:$0xff] %v5113_v14  ;;  %2348 = vmatpush.msrb.mxu1 %v5699_v63  ;;  %2462 = vmatpush.msrb.mxu0 %v4746_v35 }
 0x76b   :  { %2368 = vmatpush.msra.mxu2 %v5700_v24  ;;  %2445 = vmatpush.msrb.mxu3 %v4781_v30 }
 0x76c   :  { %2349 = vmatpush.msrb.mxu1 %v5701_v22  ;;  %2463 = vmatpush.msrb.mxu0 %v4760_v8 }
 0x76d   :  { %2369 = vmatpush.msra.mxu2 %v5702_v41 }
 0x76e   :  { %2350 = vmatpush.msrb.mxu1 %v5703_v4  ;;  %2464 = vmatpush.msrb.mxu0 %v4774_v49  ;;  %v252_v4 = vadd.f32 %v5732_v27, %v5713_v46 }
 0x76f   :  { %2370 = vmatpush.msra.mxu2 %v5704_v10 }
 0x770   :  { %2351 = vmatpush.msrb.mxu1 %v5705_v60  ;;  %2465 = vmatpush.msrb.mxu0 %v4788_v11  ;;  %v5733_v11 = vld [vmem:[#allocation17_spill] sm:$0xff] }
 0x771   :  { %2371 = vmatpush.msra.mxu2 %v5706_v57 }
 0x7cc   :  { %v2024_v47 = vpop.f32.mrf.mxu0  ;;  %v2044_v63 = vpop.f32.mrf.mxu1 }
 0x7cd   :  { %v2045_v24 = vadd.f32 %v2044_v63, %v5708_v0 }
 0x7d1   :  { %v1984_v35 = vpop.f32.mrf.mxu2  ;;  %v2004_v60 = vpop.f32.mrf.mxu3 }
 0x7d2   :  { %v1985_v51 = vadd.f32 %v1984_v35, %v5707_v45  ;;  %v2005_v35 = vadd.f32 %v2004_v60, %v5711_v59 }
 0x7d4   :  { %v2087_v22 = vadd.f32 %v2045_v24, %v1985_v51  ;;  %v2158_v8 = vpop.f32.mrf.mxu0  ;;  %v2178_v41 = vpop.f32.mrf.mxu1 }
 0x7d5   :  { %v2159_v49 = vadd.f32 %v2158_v8, %v5709_v56  ;;  %v2179_v10 = vadd.f32 %v2178_v41, %v5715_v2 }
 0x7d6   :  { %v2911_v30 = vmul.f32 -1.442695, %v2087_v22 }
 0x7d7   :  { %v2201_v57 = vadd.f32 %v2159_v49, %v5733_v11  ;;  %v2221_v14 = vadd.f32 %v2179_v10, %v252_v4 }
 0x7d8   :  { %3069 = vpow2.f32 %v2911_v30 }
 0x7d9   :  { %v2916_v37 = vmul.f32 -1.442695, %v2201_v57  ;;  %v2917_v63 = vmul.f32 -1.442695, %v2221_v14  ;;  %v2064_v0 = vpop.f32.mrf.mxu2  ;;  %v2084_v60 = vpop.f32.mrf.mxu3 }
 0x7da   :  { %v2065_v24 = vadd.f32 %v2064_v0, %v5712_v3 }
 0x7db   :  { %3071 = vpow2.f32 %v2916_v37 }
 0x7dc   :  { %3073 = vpow2.f32 %v2917_v63  ;;  %v2107_v51 = vadd.f32 %v2065_v24, %v2005_v35 }
 0x7de   :  { %v3070_v27 = vpop.eup %3069  ;;  %v2912_v8 = vmul.f32 -1.442695, %v2107_v51 }
 0x7df   :  { %v2091_v56 = vadd.f32 1.0, %v3070_v27 }
 0x7e0   :  { %3075 = vpow2.f32 %v2912_v8  ;;  %v2198_v8 = vpop.f32.mrf.mxu0 }
 0x7e1   :  { %v3072_v22 = vpop.eup %3071  ;;  %3077 = vrcp.f32 %v2091_v56  ;;  %v2103_v63 = vand.u32 2147483648, %v2091_v56  ;;  %v2101_v27 = vand.u32 2147483647, %v2091_v56  ;;  %vm2097_vm7 = vweird.f32 %v2091_v56 }
 0x7e2   :  { %v3074_v41 = vpop.eup %3073  ;;  %v2205_v49 = vadd.f32 1.0, %v3072_v22  ;;  %v2025_v22 = vadd.f32 %v2024_v47, %v4011_v1  ;;  %v2199_v43 = vadd.f32 %v2198_v8, %v5591_v16 }
 0x7e3   :  { %v5140_v4 = vadd.f32 1.0, %v3074_v41  ;;  %v2085_v41 = vadd.f32 %v2084_v60, %v5629_v19  ;;  %v2104_v45 = vor.u32 1.1754944e-38, %v2103_v63  ;;  %vm2102_vm11 = vcmp.eq.f32.partialorder %v2101_v27, 8.507059e+37 }
 0x7e4   :  { %3079 = vrcp.f32 %v2205_v49  ;;  %v2215_v2 = vand.u32 2147483647, %v2205_v49  ;;  %vm2211_vm12 = vweird.f32 %v2205_v49 }
 0x7e5   :  { %3081 = vrcp.f32 %v5140_v4  ;;  %vm2231_vm2 = vweird.f32 %v5140_v4 }
 0x7e6   :  { %v3076_v14 = vpop.eup %3075  ;;  %vm2216_vm13 = vcmp.eq.f32.partialorder %v2215_v2, 8.507059e+37  ;;  %v2237_v2 = vand.u32 2147483648, %v5140_v4 }
 0x7e7   :  { %v3078_v10 = vpop.eup %3077  ;;  %v5143_v30 = vadd.f32 1.0, %v3076_v14 }
 0x7e8   :  { %v2093_v0 = vmul.f32 %v3078_v10, %v2091_v56  ;;  %vm2098_vm6 = vweird.f32 %v3078_v10 }
 0x7e9   :  { %3083 = vrcp.f32 %v5143_v30  ;;  %vm2099_vm8 = vmor %vm2097_vm7, %vm2098_vm6  ;;  %v2121_v63 = vand.u32 2147483647, %v5143_v30  ;;  %vm2117_vm4 = vweird.f32 %v5143_v30 }
 0x7ea   :  { %v3080_v37 = vpop.eup %3079  ;;  %v2094_v11 = vsub.f32 1.0, %v2093_v0  ;;  %v2217_v0 = vand.u32 2147483648, %v2205_v49 }
 0x7eb   :  { %v5146_v57 = vpop.eup %3081  ;;  %v2207_v35 = vmul.f32 %v3080_v37, %v2205_v49  ;;  %vm2212_vm9 = vweird.f32 %v3080_v37  ;;  %v2235_v49 = vand.u32 2147483647, %v5140_v4  ;;  %vm2122_vm6 = vcmp.eq.f32.partialorder %v2121_v63, 8.507059e+37 }
 0x7ec   :  { %v2227_v24 = vmul.f32 %v5146_v57, %v5140_v4  ;;  %v2095_v51 = vmul.f32 %v3078_v10, %v2094_v11  ;;  %vm2213_vm14 = vmor %vm2211_vm12, %vm2212_vm9  ;;  %v2218_v56 = vor.u32 1.1754944e-38, %v2217_v0  ;;  %vm2232_vm15 = vweird.f32 %v5146_v57 }
 0x7ed   :  { %v2208_v14 = vsub.f32 1.0, %v2207_v35  ;;  %vm5161_vm3 = vmor %vm2231_vm2, %vm2232_vm15  ;;  %vm2236_vm7 = vcmp.eq.f32.partialorder %v2235_v49, 8.507059e+37  ;;  %v5756_v49 = vld [vmem:[#allocation26_spill] sm:$0xff] }
 0x7ee   :  { %v2228_v46 = vsub.f32 1.0, %v2227_v24  ;;  %v2096_v3 = vadd.f32 %v3078_v10, %v2095_v51 }
 0x7ef   :  { %v3084_v59 = vpop.eup %3083  ;;  %v2209_v23 = vmul.f32 %v3080_v37, %v2208_v14 }
 0x7f0   :  { %v2229_v11 = vmul.f32 %v5146_v57, %v2228_v46  ;;  %v2113_v62 = vmul.f32 %v3084_v59, %v5143_v30  ;;  %v2100_v47 = vsel %vm2099_vm8, %v3078_v10, %v2096_v3  ;;  %vm2118_vm0 = vweird.f32 %v3084_v59 }
 0x7f1   :  { %v2105_v60 = vsel %vm2102_vm11, %v2104_v45, %v2100_v47  ;;  %v2210_v35 = vadd.f32 %v3080_v37, %v2209_v23  ;;  %v2123_v46 = vand.u32 2147483648, %v5143_v30  ;;  %vm2119_vm5 = vmor %vm2117_vm4, %vm2118_vm0 }
 0x7f2   :  { %v2127_v24 = vmul.f32 %v2105_v60, %v2085_v41  ;;  %v2114_v51 = vsub.f32 1.0, %v2113_v62  ;;  %v2230_v3 = vadd.f32 %v5146_v57, %v2229_v11 }
 0x7f3   :  { %v2214_v8 = vsel %vm2213_vm14, %v3080_v37, %v2210_v35  ;;  %v5736_v37 = vld [vmem:[#allocation36_spill] sm:$0xff] }
 0x7f4   :  { %v2128_v14 = vadd.f32 %v2127_v24, %v2025_v22  ;;  %v2219_v16 = vsel %vm2216_vm13, %v2218_v56, %v2214_v8  ;;  %v2115_v45 = vmul.f32 %v3084_v59, %v2114_v51  ;;  %v2124_v22 = vor.u32 1.1754944e-38, %v2123_v46 }
 0x7f5   :  { %v2241_v23 = vmul.f32 %v2219_v16, %v2199_v43  ;;  %v2234_v41 = vsel %vm5161_vm3, %v5146_v57, %v2230_v3  ;;  %v2238_v43 = vor.u32 1.1754944e-38, %v2237_v2  ;;  %v5754_v2 = vld [vmem:[#allocation28_spill] sm:$0xff] }
 0x7f6   :  { %3085 = vtanh.f32 %v2128_v14  ;;  %v2116_v10 = vadd.f32 %v3084_v59, %v2115_v45  ;;  %v5753_v14 = vld [vmem:[#allocation6_spill] sm:$0xff] }
 0x7f7   :  { %v2242_v27 = vadd.f32 %v2241_v23, %v5736_v37  ;;  %v2239_v4 = vsel %vm2236_vm7, %v2238_v43, %v2234_v41  ;;  %v5755_v23 = vld [vmem:[#allocation21_spill] sm:$0xff] }
 0x7f8   :  { %v2120_v16 = vsel %vm2119_vm5, %v3084_v59, %v2116_v10  ;;  %v2244_v35 = vsub.f32 1.0, %v2239_v4  ;;  %v2246_v8 = vmul.f32 %v2239_v4, %v4835_v55  ;;  %v5738_v55 = vld [vmem:[#allocation7_spill] sm:$0xff]  ;;  %v255_v62 = vadd.f32 %v5755_v23, %v5754_v2 }
 0x7f9   :  { %3087 = vtanh.f32 %v2242_v27  ;;  %v2125_v0 = vsel %vm2122_vm6, %v2124_v22, %v2120_v16 }
 0x7fa   :  { %v2130_v11 = vsub.f32 1.0, %v2125_v0  ;;  %v2132_v30 = vmul.f32 %v2125_v0, %v4828_v40  ;;  %v5737_v40 = vld [vmem:[#allocation29_spill] sm:$0xff] }
 0x7fc   :  { %v3086_v47 = vpop.eup %3085 }
 0x7fd   :  { %v2131_v60 = vmul.f32 %v3086_v47, %v2130_v11  ;;  %v5757_v11 = vld [vmem:[#allocation25_spill] sm:$0xff]  ;;  %v5758_v47 = vld [vmem:[#allocation20_spill] sm:$0xff] }
 0x7ff   :  { %v3088_v24 = vpop.eup %3087  ;;  %v5173_v56 = vadd.f32 %v2132_v30, %v2131_v60 }
 0x800   :  { %v2245_v51 = vmul.f32 %v3088_v24, %v2244_v35 }
 0x801   :  { %2249 = vrot.lane.b32.xlu2 %v5173_v56, %s3240_s8  ;;  %2134 = vst.msk [vmem:[#allocation3 + $0x28] sm:$0xff] %vm150_vm1, %v5173_v56 }
 0x802   :  { %v5180_v59 = vadd.f32 %v2246_v8, %v2245_v51 }
 0x85b   :  { %v2250_v57 = vpop.permute.xlu2 %2249 }
 0x85c   :  { %v2252_v63 = vsel %vm150_vm1, %v5180_v59, %v2250_v57 }
 0x85d   :  { %2918 = vmatmul.msk.f32.vlgmr.msra.gmra.mxu1 %vm518_vm10, %v2252_v63  ;;  %2919 = vmatmul.msk.f32.vlgmr.msrb.gmra.mxu2 %vm518_vm10, %v2252_v63 }
 0x85e   :  { %2920 = vmatmul.msk.f32.vlgmr.msra.gmra.mxu3 %vm518_vm10, %v2252_v63  ;;  %2921 = vmatmul.msk.f32.vlgmr.msra.gmra.mxu0 %vm518_vm10, %v2252_v63 }
 0x85f   :  { %2482 = vmatpush.msra.mxu3 %v4846_v42  ;;  %2553 = vmatpush.msra.mxu0 %v4852_v52  ;;  %v5739_v42 = vld [vmem:[#allocation10_spill] sm:$0xff]  ;;  %v5740_v52 = vld [vmem:[#allocation24_spill] sm:$0xff] }
 0x860   :  { %2573 = vmatpush.msra.mxu1 %v4858_v31  ;;  %2593 = vmatpush.msrb.mxu2 %v4864_v34  ;;  %v5741_v31 = vld [vmem:[#allocation34_spill] sm:$0xff]  ;;  %v5742_v34 = vld [vmem:[#allocation32_spill] sm:$0xff] }
 0x861   :  { %2483 = vmatpush.msra.mxu3 %v4870_v38  ;;  %2554 = vmatpush.msra.mxu0 %v4876_v32  ;;  %v5743_v38 = vld [vmem:[#allocation33_spill] sm:$0xff] }
 0x862   :  { %2574 = vmatpush.msra.mxu1 %v4882_v53  ;;  %2594 = vmatpush.msrb.mxu2 %v4888_v58  ;;  %v5744_v32 = vld [vmem:[#allocation37_spill] sm:$0xff]  ;;  %v5745_v53 = vld [vmem:[#allocation39_spill] sm:$0xff] }
 0x863   :  { %2484 = vmatpush.msra.mxu3 %v4894_v17  ;;  %2555 = vmatpush.msra.mxu0 %v4900_v26  ;;  %v5746_v58 = vld [vmem:[#allocation23_spill] sm:$0xff]  ;;  %v5747_v17 = vld [vmem:[#allocation14_spill] sm:$0xff] }
 0x864   :  { %2575 = vmatpush.msra.mxu1 %v4906_v44  ;;  %2595 = vmatpush.msrb.mxu2 %v4912_v12  ;;  %v5748_v26 = vld [vmem:[#allocation30_spill] sm:$0xff]  ;;  %v5749_v44 = vld [vmem:[#allocation35_spill] sm:$0xff] }
 0x865   :  { %2922 = vmatmul.msk.f32.vlgmr.msrb.gmra.mxu1 %vm518_vm10, %v2252_v63  ;;  %2923 = vmatmul.msk.f32.vlgmr.msra.gmra.mxu2 %vm518_vm10, %v2252_v63  ;;  %v3231_v12 = vld [vmem:[%s5379_s7 + $0xb0] sm:$0xff] }
 0x866   :  { %2926 = vmatmul.msk.f32.vlgmr.msrb.gmra.mxu3 %vm150_vm1, %v5180_v59  ;;  %2927 = vmatmul.msk.f32.vlgmr.msrb.gmra.mxu0 %vm150_vm1, %v5180_v59 }
 0x867   :  { %2485 = vmatpush.msra.mxu3 %v4924_v13  ;;  %2556 = vmatpush.msra.mxu0 %v4930_v6  ;;  %v3232_v13 = vld [vmem:[%s5379_s7 + $0xb8] sm:$0xff]  ;;  %v3233_v6 = vld [vmem:[%s5379_s7 + $0x80] sm:$0xff] }
 0x868   :  { %2576 = vmatpush.msra.mxu1 %v4936_v28  ;;  %2596 = vmatpush.msrb.mxu2 %v4954_v50  ;;  %v3234_v28 = vld [vmem:[%s5379_s7 + $0x88] sm:$0xff]  ;;  %v3237_v50 = vld [vmem:[%s5379_s7 + $0x20] sm:$0xff] }
 0x869   :  { %2613 = vmatpush.msrb.mxu3 %v4942_v15  ;;  %2557 = vmatpush.msra.mxu0 %v4948_v7  ;;  %v3235_v15 = vld [vmem:[%s5379_s7 + $0x50] sm:$0xff]  ;;  %v3236_v7 = vld [vmem:[%s5379_s7 + $0x58] sm:$0xff] }
 0x86a   :  { %2577 = vmatpush.msra.mxu1 %v4960_v54  ;;  %2597 = vmatpush.msrb.mxu2 %v4978_v25  ;;  %v3238_v54 = vld [vmem:[%s5379_s7 + $0x28] sm:$0xff] }
 0x86b   :  { %2614 = vmatpush.msrb.mxu3 %v4966_v5  ;;  %2558 = vmatpush.msra.mxu0 %v4972_v29  ;;  %v5750_v29 = vld [vmem:[#allocation8_spill] sm:$0xff] }
 0x86c   :  { %2578 = vmatpush.msra.mxu1 %v4984_v33  ;;  %2598 = vmatpush.msrb.mxu2 %v5002_v21 }
 0x86d   :  { %2615 = vmatpush.msrb.mxu3 %v4990_v61  ;;  %2559 = vmatpush.msra.mxu0 %v4996_v48  ;;  %v5751_v61 = vld [vmem:[#allocation4_spill] sm:$0xff] }
 0x86e   :  { %2928 = vmatmul.msk.f32.vlgmr.msra.gmra.mxu3 %vm150_vm1, %v5180_v59  ;;  %2579 = vmatpush.msra.mxu1 %v5010_v39 }
 0x86f   :  { %2616 = vmatpush.msrb.mxu3 %v5016_v20  ;;  %2560 = vmatpush.msra.mxu0 %v5022_v9 }
 0x870   :  { %2580 = vmatpush.msra.mxu1 %v5028_v18  ;;  %2599 = vmatpush.msrb.mxu2 %v5740_v52 }
 0x871   :  { %2633 = vmatpush.msrb.mxu0 %v5034_v36  ;;  %2617 = vmatpush.msrb.mxu3 %v5737_v40  ;;  %v5752_v36 = vld [vmem:[#allocation5_spill] sm:$0xff] }
 0x872   :  { %2653 = vmatpush.msrb.mxu1 %v5738_v55  ;;  %2600 = vmatpush.msrb.mxu2 %v5744_v32 }
 0x873   :  { %2634 = vmatpush.msrb.mxu0 %v5739_v42  ;;  %2618 = vmatpush.msrb.mxu3 %v5741_v31 }
 0x874   :  { %2654 = vmatpush.msrb.mxu1 %v5742_v34 }
 0x875   :  { %2635 = vmatpush.msrb.mxu0 %v5743_v38  ;;  %2619 = vmatpush.msrb.mxu3 %v5745_v53 }
 0x876   :  { %2655 = vmatpush.msrb.mxu1 %v5746_v58 }
 0x877   :  { %2636 = vmatpush.msrb.mxu0 %v5747_v17  ;;  %2620 = vmatpush.msrb.mxu3 %v5748_v26 }
 0x878   :  { %2656 = vmatpush.msrb.mxu1 %v5749_v44 }
 0x879   :  { %2637 = vmatpush.msrb.mxu0 %v3231_v12 }
 0x87a   :  { %2657 = vmatpush.msrb.mxu1 %v3232_v13 }
 0x87b   :  { %2638 = vmatpush.msrb.mxu0 %v3233_v6 }
 0x87c   :  { %2658 = vmatpush.msrb.mxu1 %v3234_v28 }
 0x87d   :  { %2639 = vmatpush.msrb.mxu0 %v3235_v15 }
 0x87e   :  { %2659 = vmatpush.msrb.mxu1 %v3236_v7 }
 0x87f   :  { %2640 = vmatpush.msrb.mxu0 %v3237_v50 }
 0x880   :  { %2660 = vmatpush.msrb.mxu1 %v3238_v54 }
 0x8da   :  { %v2273_v5 = vpop.f32.mrf.mxu1 }
 0x8db   :  { %v2274_v25 = vadd.f32 %v2273_v5, %v5750_v29  ;;  %v2333_v33 = vpop.f32.mrf.mxu0 }
 0x8dc   :  { %v2334_v48 = vadd.f32 %v2333_v33, %v5751_v61 }
 0x8de   :  { %v2376_v21 = vadd.f32 %v2334_v48, %v2274_v25 }
 0x8e0   :  { %v2924_v39 = vmul.f32 -1.442695, %v2376_v21  ;;  %v2293_v20 = vpop.f32.mrf.mxu2 }
 0x8e1   :  { %v2313_v9 = vpop.f32.mrf.mxu3  ;;  %v2294_v46 = vadd.f32 %v2293_v20, %v5752_v36 }
 0x8e2   :  { %3089 = vpow2.f32 %v2924_v39  ;;  %v2353_v18 = vpop.f32.mrf.mxu1  ;;  %v2314_v28 = vadd.f32 %v2313_v9, %v4011_v1 }
 0x8e3   :  { %v2354_v3 = vadd.f32 %v2353_v18, %v5753_v14  ;;  %v2467_v45 = vpop.f32.mrf.mxu0 }
 0x8e4   :  { %v2468_v10 = vadd.f32 %v2467_v45, %v5756_v49 }
 0x8e5   :  { %v2396_v37 = vadd.f32 %v2354_v3, %v2294_v46 }
 0x8e6   :  { %v2510_v27 = vadd.f32 %v2468_v10, %v255_v62 }
 0x8e7   :  { %v2925_v22 = vmul.f32 -1.442695, %v2396_v37 }
 0x8e8   :  { %v3090_v41 = vpop.eup %3089  ;;  %v2930_v16 = vmul.f32 -1.442695, %v2510_v27  ;;  %v2373_v34 = vpop.f32.mrf.mxu2 }
 0x8e9   :  { %v2380_v43 = vadd.f32 1.0, %v3090_v41  ;;  %3091 = vpow2.f32 %v2925_v22  ;;  %v2447_v0 = vpop.f32.mrf.mxu3  ;;  %v2374_v44 = vadd.f32 %v2373_v34, %v5629_v19  ;;  %v2724_v34 = vld [vmem:[%s5381_s9 + $0x18] sm:$0xff] }
 0x8ea   :  { %3093 = vpow2.f32 %v2930_v16  ;;  %v2448_v4 = vadd.f32 %v2447_v0, %v5757_v11  ;;  %v5759_v16 = vld [vmem:[#allocation52_spill] sm:$0xff]  ;;  %2765 = vmatpush.msra.mxu2 %v2724_v34 }
 0x8eb   :  { %3095 = vrcp.f32 %v2380_v43  ;;  %v2392_v55 = vand.u32 2147483648, %v2380_v43  ;;  %v2390_v31 = vand.u32 2147483647, %v2380_v43  ;;  %vm2386_vm9 = vweird.f32 %v2380_v43 }
 0x8ec   :  { %v2490_v60 = vadd.f32 %v2448_v4, %v5758_v47 }
 0x8ed   :  { %v2393_v17 = vor.u32 1.1754944e-38, %v2392_v55  ;;  %vm2391_vm12 = vcmp.eq.f32.partialorder %v2390_v31, 8.507059e+37 }
 0x8ee   :  { %v2929_v30 = vmul.f32 -1.442695, %v2490_v60 }
 0x8ef   :  { %v3092_v35 = vpop.eup %3091 }
 0x8f0   :  { %v3094_v24 = vpop.eup %3093  ;;  %v2400_v51 = vadd.f32 1.0, %v3092_v35  ;;  %3097 = vpow2.f32 %v2929_v30  ;;  %v5760_v35 = vld [vmem:[#allocation49_spill] sm:$0xff] }
 0x8f1   :  { %v3096_v8 = vpop.eup %3095  ;;  %v5273_v57 = vadd.f32 1.0, %v3094_v24  ;;  %v2487_v62 = vpop.f32.mrf.mxu3 }
 0x8f2   :  { %3099 = vrcp.f32 %v2400_v51  ;;  %v2382_v63 = vmul.f32 %v3096_v8, %v2380_v43  ;;  %vm2387_vm8 = vweird.f32 %v3096_v8  ;;  %v2412_v7 = vand.u32 2147483648, %v2400_v51 }
 0x8f3   :  { %3101 = vrcp.f32 %v5273_v57  ;;  %vm2388_vm11 = vmor %vm2386_vm9, %vm2387_vm8  ;;  %v2410_v5 = vand.u32 2147483647, %v2400_v51  ;;  %vm2406_vm14 = vweird.f32 %v2400_v51  ;;  %v2488_v43 = vadd.f32 %v2487_v62, %v5759_v16 }
 0x8f4   :  { %v2383_v40 = vsub.f32 1.0, %v2382_v63  ;;  %v2413_v39 = vor.u32 1.1754944e-38, %v2412_v7  ;;  %v2526_v30 = vand.u32 2147483648, %v5273_v57  ;;  %vm2520_vm7 = vweird.f32 %v5273_v57 }
 0x8f5   :  { %vm2411_vm0 = vcmp.eq.f32.partialorder %v2410_v5, 8.507059e+37 }
 0x8f6   :  { %v3098_v42 = vpop.eup %3097  ;;  %v2384_v52 = vmul.f32 %v3096_v8, %v2383_v40 }
 0x8f7   :  { %v2494_v38 = vadd.f32 1.0, %v3098_v42 }
 0x8f8   :  { %v3100_v32 = vpop.eup %3099  ;;  %v2385_v53 = vadd.f32 %v3096_v8, %v2384_v52 }
 0x8f9   :  { %v2402_v58 = vmul.f32 %v3100_v32, %v2400_v51  ;;  %3103 = vrcp.f32 %v2494_v38  ;;  %v3102_v26 = vpop.eup %3101  ;;  %vm2407_vm13 = vweird.f32 %v3100_v32  ;;  %v2506_v3 = vand.u32 2147483648, %v2494_v38 }
 0x8fa   :  { %v2389_v12 = vsel %vm2388_vm11, %v3096_v8, %v2385_v53  ;;  %v2516_v50 = vmul.f32 %v3102_v26, %v5273_v57  ;;  %vm2408_vm15 = vmor %vm2406_vm14, %vm2407_vm13  ;;  %v2504_v23 = vand.u32 2147483647, %v2494_v38  ;;  %vm2500_vm3 = vweird.f32 %v2494_v38 }
 0x8fb   :  { %v2394_v13 = vsel %vm2391_vm12, %v2393_v17, %v2389_v12  ;;  %v2403_v6 = vsub.f32 1.0, %v2402_v58  ;;  %v2507_v27 = vor.u32 1.1754944e-38, %v2506_v3  ;;  %vm2521_vm6 = vweird.f32 %v3102_v26  ;;  %v2713_v58 = vld [vmem:[#allocation3] sm:$0xff]  ;;  %v2714_v17 = vld [vmem:[#allocation3 + $0x8] sm:$0xff] }
 0x8fc   :  { %v2416_v15 = vmul.f32 %v2394_v13, %v2374_v44  ;;  %v2517_v20 = vsub.f32 1.0, %v2516_v50  ;;  %vm2505_vm5 = vcmp.eq.f32.partialorder %v2504_v23, 8.507059e+37  ;;  %vm2522_vm8 = vmor %vm2520_vm7, %vm2521_vm6  ;;  %v2527_v8 = vor.u32 1.1754944e-38, %v2526_v30  ;;  %v2716_v44 = vld [vmem:[#allocation3 + $0x18] sm:$0xff]  ;;  %v2717_v12 = vld [vmem:[#allocation3 + $0x20] sm:$0xff] }
 0x8fd   :  { %v2404_v54 = vmul.f32 %v3100_v32, %v2403_v6  ;;  %v2718_v13 = vld [vmem:[#allocation3 + $0x28] sm:$0xff] }
 0x8fe   :  { %v2417_v25 = vadd.f32 %v2416_v15, %v2314_v28  ;;  %v2518_v49 = vmul.f32 %v3102_v26, %v2517_v20 }
 0x8ff   :  { %v3104_v33 = vpop.eup %3103  ;;  %v2405_v48 = vadd.f32 %v3100_v32, %v2404_v54 }
 0x900   :  { %3105 = vtanh.f32 %v2417_v25  ;;  %v2496_v21 = vmul.f32 %v3104_v33, %v2494_v38  ;;  %vm2501_vm2 = vweird.f32 %v3104_v33  ;;  %v2519_v47 = vadd.f32 %v3102_v26, %v2518_v49  ;;  %v2722_v38 = vld [vmem:[%s5381_s9 + $0x8] sm:$0xff] }
 0x901   :  { %v2409_v18 = vsel %vm2408_vm15, %v3100_v32, %v2405_v48  ;;  %vm2502_vm4 = vmor %vm2500_vm3, %vm2501_vm2  ;;  %v2721_v32 = vld [vmem:[%s5381_s9] sm:$0xff] }
 0x902   :  { %v2497_v46 = vsub.f32 1.0, %v2496_v21  ;;  %v2414_v9 = vsel %vm2411_vm0, %v2413_v39, %v2409_v18  ;;  %v2523_v51 = vsel %vm2522_vm8, %v3102_v26, %v2519_v47  ;;  %v2715_v26 = vld [vmem:[#allocation3 + $0x10] sm:$0xff]  ;;  %v5325_v18 = vld [vmem:[%s5382_s10] ss:$0 sm:$0xff] }
 0x903   :  { %v2419_v45 = vsub.f32 1.0, %v2414_v9  ;;  %v2421_v41 = vmul.f32 %v2414_v9, %v5173_v56  ;;  %v2524_v56 = vand.u32 2147483647, %v5273_v57  ;;  %v2723_v57 = vld [vmem:[%s5381_s9 + $0x10] sm:$0xff] }
 0x904   :  { %v2498_v2 = vmul.f32 %v3104_v33, %v2497_v46  ;;  %2766 = vmatpush.msra.mxu2 %v2723_v57 }
 0x905   :  { %vm2525_vm9 = vcmp.eq.f32.partialorder %v2524_v56, 8.507059e+37 }
 0x906   :  { %v3106_v10 = vpop.eup %3105  ;;  %v2499_v37 = vadd.f32 %v3104_v33, %v2498_v2  ;;  %v2528_v63 = vsel %vm2525_vm9, %v2527_v8, %v2523_v51  ;;  %2767 = vmatpush.msra.mxu2 %v2722_v38 }
 0x907   :  { %v2420_v22 = vmul.f32 %v3106_v10, %v2419_v45  ;;  %v2533_v40 = vsub.f32 1.0, %v2528_v63  ;;  %v2535_v52 = vmul.f32 %v2528_v63, %v5180_v59 }
 0x908   :  { %v2503_v0 = vsel %vm2502_vm4, %v3104_v33, %v2499_v37  ;;  %2768 = vmatpush.msra.mxu2 %v2721_v32 }
 0x909   :  { %v2508_v11 = vsel %vm2505_vm5, %v2507_v27, %v2503_v0  ;;  %v5281_v4 = vadd.f32 %v2421_v41, %v2420_v22 }
 0x90a   :  { %v2530_v60 = vmul.f32 %v2508_v11, %v2488_v43 }
 0x90b   :  { %2538 = vrot.lane.b32.xlu0 %v5281_v4, %s3240_s8  ;;  %2423 = vst.msk [vmem:[#allocation3 + $0x30] sm:$0xff] %vm150_vm1, %v5281_v4 }
 0x90c   :  { %v2531_v24 = vadd.f32 %v2530_v60, %v5760_v35 }
 0x90e   :  { %3107 = vtanh.f32 %v2531_v24 }
 0x912   :  { %v2719_v6 = vld [vmem:[#allocation3 + $0x30] sm:$0xff] }
 0x914   :  { %v3108_v55 = vpop.eup %3107 }
 0x915   :  { %v2534_v42 = vmul.f32 %v3108_v55, %v2533_v40 }
 0x917   :  { %v2536_v31 = vadd.f32 %v2535_v52, %v2534_v42 }
 0x97d   :  { %v2539_v59 = vpop.permute.xlu0 %2538 }
 0x97e   :  { %v2541_v53 = vsel %vm150_vm1, %v2536_v31, %v2539_v59 }
 0x97f   :  { %2931 = vmatmul.msk.f32.vlgmr.msra.gmra.mxu0 %vm518_vm10, %v2541_v53  ;;  %2932 = vmatmul.msk.f32.vlgmr.msra.gmra.mxu1 %vm518_vm10, %v2541_v53 }
 0x980   :  { %2933 = vmatmul.msk.f32.vlgmr.msrb.gmra.mxu2 %vm518_vm10, %v2541_v53  ;;  %2934 = vmatmul.msk.f32.vlgmr.msrb.gmra.mxu3 %vm518_vm10, %v2541_v53 }
 0x987   :  { %2935 = vmatmul.msk.f32.vlgmr.msrb.gmra.mxu0 %vm518_vm10, %v2541_v53  ;;  %2936 = vmatmul.msk.f32.vlgmr.msrb.gmra.mxu1 %vm518_vm10, %v2541_v53 }
 0x988   :  { %2939 = vmatmul.msk.f32.vlgmr.msra.gmra.mxu2 %vm150_vm1, %v2713_v58 }
 0x990   :  { %2940 = vmatmul.msk.f32.gmra.mxu2 %vm150_vm1, %v2714_v17 }
 0x998   :  { %2941 = vmatmul.msk.f32.gmra.mxu2 %vm150_vm1, %v2715_v26 }
 0x9a0   :  { %2942 = vmatmul.msk.f32.gmra.mxu2 %vm150_vm1, %v2716_v44 }
 0x9a8   :  { %2943 = vmatmul.msk.f32.gmra.mxu2 %vm150_vm1, %v2717_v12 }
 0x9b0   :  { %2944 = vmatmul.msk.f32.gmra.mxu2 %vm150_vm1, %v2718_v13 }
 0x9b8   :  { %2945 = vmatmul.msk.f32.gmra.mxu2 %vm150_vm1, %v2719_v6 }
 0x9fc   :  { %v2562_v28 = vpop.f32.mrf.mxu0  ;;  %v2582_v15 = vpop.f32.mrf.mxu1 }
 0x9fd   :  { %v2563_v54 = vadd.f32 %v2562_v28, %v5750_v29  ;;  %v2583_v33 = vadd.f32 %v2582_v15, %v5752_v36 }
 0xa03   :  { %v2602_v7 = vpop.f32.mrf.mxu2  ;;  %v2622_v50 = vpop.f32.mrf.mxu3 }
 0xa04   :  { %v2623_v5 = vadd.f32 %v2622_v50, %v5751_v61  ;;  %v2642_v25 = vpop.f32.mrf.mxu0  ;;  %v2662_v47 = vpop.f32.mrf.mxu1  ;;  %v2603_v63 = vadd.f32 %v2602_v7, %v4011_v1 }
 0xa05   :  { %v2643_v48 = vadd.f32 %v2642_v25, %v5753_v14  ;;  %v2663_v56 = vadd.f32 %v2662_v47, %v5629_v19 }
 0xa06   :  { %v2665_v21 = vadd.f32 %v2623_v5, %v2563_v54 }
 0xa07   :  { %v2685_v39 = vadd.f32 %v2643_v48, %v2583_v33 }
 0xa08   :  { %v2937_v20 = vmul.f32 -1.442695, %v2665_v21 }
 0xa09   :  { %v2938_v46 = vmul.f32 -1.442695, %v2685_v39 }
 0xa0a   :  { %3109 = vpow2.f32 %v2937_v20 }
 0xa0b   :  { %3111 = vpow2.f32 %v2938_v46  ;;  %v2770_v9 = vpop.f32.mrf.mxu2 }
 0xa0c   :  { %v2771_v29 = vadd.f32 %v5325_v18, %v2770_v9 }
 0xa0e   :  { %2794 = vst.msk [vmem:[%s5383_s11] sm:$0xff] %vm150_vm1, %v2771_v29 }
 0xa10   :  { %v3110_v61 = vpop.eup %3109 }
 0xa11   :  { %v3112_v36 = vpop.eup %3111  ;;  %v2669_v14 = vadd.f32 1.0, %v3110_v61 }
 0xa12   :  { %v2689_v3 = vadd.f32 1.0, %v3112_v36 }
 0xa13   :  { %3113 = vrcp.f32 %v2669_v14  ;;  %v2773_v45 = vpop.f32.mrf.mxu2  ;;  %v2681_v16 = vand.u32 2147483648, %v2669_v14  ;;  %v2679_v0 = vand.u32 2147483647, %v2669_v14  ;;  %vm2675_vm11 = vweird.f32 %v2669_v14 }
 0xa14   :  { %3115 = vrcp.f32 %v2689_v3  ;;  %v2774_v2 = vadd.f32 %v5325_v18, %v2773_v45  ;;  %v2701_v40 = vand.u32 2147483648, %v2689_v3  ;;  %vm2695_vm15 = vweird.f32 %v2689_v3 }
 0xa15   :  { %v2682_v30 = vor.u32 1.1754944e-38, %v2681_v16  ;;  %vm2680_vm13 = vcmp.eq.f32.partialorder %v2679_v0, 8.507059e+37  ;;  %v2699_v52 = vand.u32 2147483647, %v2689_v3 }
 0xa16   :  { %2795 = vst.msk [vmem:[%s5383_s11 + $0x8] sm:$0xff] %vm150_vm1, %v2774_v2  ;;  %v2702_v34 = vor.u32 1.1754944e-38, %v2701_v40 }
 0xa17   :  { %vm2700_vm2 = vcmp.eq.f32.partialorder %v2699_v52, 8.507059e+37 }
 0xa19   :  { %v3114_v23 = vpop.eup %3113 }
 0xa1a   :  { %v3116_v62 = vpop.eup %3115  ;;  %v2671_v49 = vmul.f32 %v3114_v23, %v2669_v14  ;;  %vm2676_vm10 = vweird.f32 %v3114_v23 }
 0xa1b   :  { %v2691_v10 = vmul.f32 %v3116_v62, %v2689_v3  ;;  %v2776_v37 = vpop.f32.mrf.mxu2  ;;  %vm2677_vm12 = vmor %vm2675_vm11, %vm2676_vm10  ;;  %vm2696_vm14 = vweird.f32 %v3116_v62 }
 0xa1c   :  { %v2672_v27 = vsub.f32 1.0, %v2671_v49  ;;  %v2777_v22 = vadd.f32 %v5325_v18, %v2776_v37  ;;  %vm2697_vm0 = vmor %vm2695_vm15, %vm2696_vm14 }
 0xa1d   :  { %v2692_v41 = vsub.f32 1.0, %v2691_v10 }
 0xa1e   :  { %v2673_v43 = vmul.f32 %v3114_v23, %v2672_v27  ;;  %2796 = vst.msk [vmem:[%s5383_s11 + $0x10] sm:$0xff] %vm150_vm1, %v2777_v22 }
 0xa1f   :  { %v2693_v11 = vmul.f32 %v3116_v62, %v2692_v41 }
 0xa20   :  { %v2674_v60 = vadd.f32 %v3114_v23, %v2673_v43 }
 0xa21   :  { %v2694_v51 = vadd.f32 %v3116_v62, %v2693_v11 }
 0xa22   :  { %v2678_v35 = vsel %vm2677_vm12, %v3114_v23, %v2674_v60 }
 0xa23   :  { %v2683_v24 = vsel %vm2680_vm13, %v2682_v30, %v2678_v35  ;;  %v2779_v8 = vpop.f32.mrf.mxu2  ;;  %v2698_v19 = vsel %vm2697_vm0, %v3116_v62, %v2694_v51 }
 0xa24   :  { %v2705_v55 = vmul.f32 %v2683_v24, %v2663_v56  ;;  %v2780_v42 = vadd.f32 %v5325_v18, %v2779_v8  ;;  %v2703_v57 = vsel %vm2700_vm2, %v2702_v34, %v2698_v19 }
 0xa25   :  { %v2708_v32 = vsub.f32 1.0, %v2703_v57  ;;  %v2710_v58 = vmul.f32 %v2703_v57, %v5281_v4 }
 0xa26   :  { %v2706_v31 = vadd.f32 %v2705_v55, %v2603_v63  ;;  %2797 = vst.msk [vmem:[%s5383_s11 + $0x18] sm:$0xff] %vm150_vm1, %v2780_v42 }
 0xa28   :  { %3117 = vtanh.f32 %v2706_v31 }
 0xa2b   :  { %v2782_v38 = vpop.f32.mrf.mxu2 }
 0xa2c   :  { %v2783_v1 = vadd.f32 %v5325_v18, %v2782_v38 }
 0xa2e   :  { %v3118_v59 = vpop.eup %3117  ;;  %2798 = vst.msk [vmem:[%s5383_s11 + $0x20] sm:$0xff] %vm150_vm1, %v2783_v1 }
 0xa2f   :  { %v2709_v53 = vmul.f32 %v3118_v59, %v2708_v32 }
 0xa31   :  { %v2711_v17 = vadd.f32 %v2710_v58, %v2709_v53 }
 0xa33   :  { %2712 = vst.msk [vmem:[#allocation3 + $0x38] sm:$0xff] %vm150_vm1, %v2711_v17  ;;  %v2785_v26 = vpop.f32.mrf.mxu2 }
 0xa34   :  { %v2786_v44 = vadd.f32 %v5325_v18, %v2785_v26 }
 0xa36   :  { %2799 = vst.msk [vmem:[%s5383_s11 + $0x28] sm:$0xff] %vm150_vm1, %v2786_v44 }
 0xa3a   :  { %v2720_v12 = vld [vmem:[#allocation3 + $0x38] sm:$0xff] }
 0xa3b   :  { %v2788_v13 = vpop.f32.mrf.mxu2  ;;  %2946 = vmatmul.msk.f32.gmra.mxu2 %vm150_vm1, %v2720_v12 }
 0xa3c   :  { %v2789_v6 = vadd.f32 %v5325_v18, %v2788_v13 }
 0xa3e   :  { %2800 = vst.msk [vmem:[%s5383_s11 + $0x30] sm:$0xff] %vm150_vm1, %v2789_v6 }
 0xabe   :  { %v2791_v4 = vpop.f32.mrf.mxu2 }
 0xabf   :  { %v2792_v28 = vadd.f32 %v5325_v18, %v2791_v4 }
 0xac1   :  { %2801 = vst.msk [vmem:[%s5383_s11 + $0x38] sm:$0xff] %vm150_vm1, %v2792_v28 }

</bundles_post_ra>
